<compile_context>
chip_gen: v7x
topology: tpu7x:2x2x1
jax: 0.10.0
libtpu: 0.0.40
codegen_flags: <defaults>
</compile_context>

<pallas_src>
import math
import functools

import jax
import jax.numpy as jnp
from jax import lax
from jax.experimental import pallas as pl
from jax.experimental.pallas import tpu as pltpu


_LN_EPS = 1e-5


# ----------------------------- in-kernel helpers -----------------------------

def _layernorm_2d(x, g, b):
    """LayerNorm over the last axis of a 2-D slab.  g, b: (1, D)."""
    mean = jnp.mean(x, axis=-1, keepdims=True)
    var = jnp.mean((x - mean) ** 2, axis=-1, keepdims=True)
    return (x - mean) * lax.rsqrt(var + _LN_EPS) * g + b


def _mha_block(x, kv, bias, g, bln, Wq, bq, Wk, bk, Wv, bv, Wo, bo,
               *, self_attention, n_heads, d_q, d_v):
    """Fused pre-LN multi-head attention with residual.

    x:  (B, Sq, D) queries (and keys/values for self-attention)
    kv: (B, Sk, D) key/value sequence (encoder output for cross-attention)
    bias: (B, Sq, Sk) additive mask bias (0 valid / -1e30 masked)
    """
    B, Sq, D = x.shape
    Sk = kv.shape[1]

    x2 = x.reshape(B * Sq, D)
    residual = x2
    xn2 = _layernorm_2d(x2, g, bln)
    # PyTorch: keys/values are layer-normed only for self-attention.
    kvn2 = xn2 if self_attention else kv.reshape(B * Sk, D)

    scale = 1.0 / math.sqrt(d_q)
    q2 = (jnp.dot(xn2, Wq, preferred_element_type=jnp.float32) + bq) * scale
    k2 = jnp.dot(kvn2, Wk, preferred_element_type=jnp.float32) + bk
    v2 = jnp.dot(kvn2, Wv, preferred_element_type=jnp.float32) + bv

    q3 = q2.reshape(B, Sq, n_heads * d_q)
    k3 = k2.reshape(B, Sk, n_heads * d_q)
    v3 = v2.reshape(B, Sk, n_heads * d_v)

    # Output projection accumulated head-by-head (no concat, no head transpose):
    #   out = sum_h attn_h @ Wo[h*dv:(h+1)*dv, :] + bo + residual
    acc = residual + bo                                   # (B*Sq, D)
    for h in range(n_heads):
        qh = q3[:, :, h * d_q:(h + 1) * d_q]               # (B, Sq, dq)
        kh = k3[:, :, h * d_q:(h + 1) * d_q]               # (B, Sk, dq)
        vh = v3[:, :, h * d_v:(h + 1) * d_v]               # (B, Sk, dv)

        s = jnp.einsum('bqd,bkd->bqk', qh, kh,
                       preferred_element_type=jnp.float32) + bias
        m = jnp.max(s, axis=-1, keepdims=True)
        p = jnp.exp(s - m)
        p = p * pl.reciprocal(jnp.sum(p, axis=-1, keepdims=True), approx=True)

        oh = jnp.einsum('bqk,bkd->bqd', p, vh,
                        preferred_element_type=jnp.float32)          # (B, Sq, dv)
        acc = acc + jnp.dot(oh.reshape(B * Sq, d_v),
                            Wo[h * d_v:(h + 1) * d_v, :],
                            preferred_element_type=jnp.float32)
    return acc.reshape(B, Sq, D)


# ------------------------------- Pallas kernels -------------------------------

def _decoder_layer_kernel(
        x_ref, enc_ref, dbias_ref, ebias_ref,
        # self-attention params
        sa_g, sa_b, sa_wq, sa_bq, sa_wk, sa_bk, sa_wv, sa_bv, sa_wo, sa_bo,
        # cross-attention params
        ca_g, ca_b, ca_wq, ca_bq, ca_wk, ca_bk, ca_wv, ca_bv, ca_wo, ca_bo,
        # position-wise FFN params
        f_g, f_b, f_w1, f_b1, f_w2, f_b2,
        o_ref, *, n_heads, d_q, d_v):
    """One full decoder layer: causal self-attn + cross-attn + FFN (all fused)."""
    x = x_ref[...]                 # (B, S, D)
    enc = enc_ref[...]             # (B, Se, D)
    B, S, D = x.shape

    # masked causal self-attention
    x = _mha_block(x, x, dbias_ref[...],
                   sa_g[...], sa_b[...], sa_wq[...], sa_bq[...],
                   sa_wk[...], sa_bk[...], sa_wv[...], sa_bv[...],
                   sa_wo[...], sa_bo[...],
                   self_attention=True, n_heads=n_heads, d_q=d_q, d_v=d_v)

    # cross-attention over encoder outputs
    x = _mha_block(x, enc, ebias_ref[...],
                   ca_g[...], ca_b[...], ca_wq[...], ca_bq[...],
                   ca_wk[...], ca_bk[...], ca_wv[...], ca_bv[...],
                   ca_wo[...], ca_bo[...],
                   self_attention=False, n_heads=n_heads, d_q=d_q, d_v=d_v)

    # PositionWiseFCNetwork: fc2(relu(fc1(LN(x)))) + x
    x2 = x.reshape(B * S, D)
    xn = _layernorm_2d(x2, f_g[...], f_b[...])
    h = jnp.maximum(
        jnp.dot(xn, f_w1[...], preferred_element_type=jnp.float32) + f_b1[...],
        0.0)
    y2 = jnp.dot(h, f_w2[...], preferred_element_type=jnp.float32) + f_b2[...] + x2
    o_ref[...] = y2.reshape(B, S, D)


def _final_kernel(x_ref, g_ref, b_ref, w_ref, fb_ref, o_ref):
    """Final LayerNorm + vocab projection (N padded to a lane-dense width)."""
    xn = _layernorm_2d(x_ref[...], g_ref[...], b_ref[...])
    o_ref[...] = (jnp.dot(xn, w_ref[...], preferred_element_type=jnp.float32)
                  + fb_ref[...])


# --------------------------- pallas_call wrappers -----------------------------

def _vmem_spec():
    return pl.BlockSpec(memory_space=pltpu.MemorySpace.VMEM)


def decoder_layer(x, enc, dec_bias, enc_bias, p, cfg):
    B, S, D = x.shape
    sa, ca, ff = p["self_attn"], p["cross_attn"], p["ffn"]
    args = (x, enc, dec_bias, enc_bias,
            sa["ln_g"], sa["ln_b"], sa["Wq"], sa["bq"], sa["Wk"], sa["bk"],
            sa["Wv"], sa["bv"], sa["Wo"], sa["bo"],
            ca["ln_g"], ca["ln_b"], ca["Wq"], ca["bq"], ca["Wk"], ca["bk"],
            ca["Wv"], ca["bv"], ca["Wo"], ca["bo"],
            ff["ln_g"], ff["ln_b"], ff["W1"], ff["b1"], ff["W2"], ff["b2"])
    kernel = functools.partial(
        _decoder_layer_kernel,
        n_heads=cfg["n_heads"], d_q=cfg["d_queries"], d_v=cfg["d_values"])
    return pl.pallas_call(
        kernel,
        out_shape=jax.ShapeDtypeStruct((B, S, D), jnp.float32),
        in_specs=[_vmem_spec()] * len(args),
        out_specs=_vmem_spec(),
    )(*args)


def final_projection(x2d, ln_g, ln_b, fc_W, fc_b):
    M, D = x2d.shape
    V = fc_W.shape[1]
    v_pad = ((V + 127) // 128) * 128      # lane-dense (unmasked) output stores
    w_p = jnp.pad(fc_W, ((0, 0), (0, v_pad - V)))
    b_p = jnp.pad(fc_b, ((0, 0), (0, v_pad - V)))
    out = pl.pallas_call(
        _final_kernel,
        out_shape=jax.ShapeDtypeStruct((M, v_pad), jnp.float32),
        in_specs=[_vmem_spec()] * 5,
        out_specs=_vmem_spec(),
    )(x2d, ln_g, ln_b, w_p, b_p)
    return out[:, :V]


# ------------------------------ model forward ---------------------------------

def _attn_bias(lens, B, Sq, Sk, causal):
    """Additive attention bias (0 = valid, -1e30 = masked), shape (B, Sq, Sk)."""
    col = jnp.arange(Sk, dtype=jnp.int32)[None, None, :]
    mask = col < lens.astype(jnp.int32)[:, None, None]        # key-padding mask
    if causal:
        row = jnp.arange(Sq, dtype=jnp.int32)[None, :, None]
        mask = jnp.logical_and(mask, col <= row)               # no-future mask
    mask = jnp.broadcast_to(mask, (B, Sq, Sk))
    return jnp.where(mask, 0.0, -1e30).astype(jnp.float32)


def decoder_forward(params, dec_ids, dec_lens, enc_seq, enc_lens, cfg):
    B, S = dec_ids.shape
    D = cfg["d_model"]
    Se = enc_seq.shape[1]

    # Embedding gather + positional encoding (plain-JAX glue).
    x = params["emb"][dec_ids] * math.sqrt(D) + params["pos"][:, :S, :]
    # dropout -> identity (inference)

    dec_bias = _attn_bias(dec_lens, B, S, S, causal=True)
    enc_bias = _attn_bias(enc_lens, B, S, Se, causal=False)

    for layer in params["layers"]:
        x = decoder_layer(x, enc_seq, dec_bias, enc_bias, layer, cfg)

    logits = final_projection(
        x.reshape(B * S, D), params["ln_g"], params["ln_b"],
        params["fc_W"], params["fc_b"])
    return logits.reshape(B, S, cfg["vocab_size"])


# ------------------------------ param builders ---------------------------------

def sinusoidal_positional_encoding(max_len, d_model):
    pos = jnp.arange(max_len)[:, None].astype(jnp.float32)
    i = jnp.arange(d_model)[None, :]
    angle = pos / jnp.power(10000.0, (2 * (i // 2)).astype(jnp.float32) / d_model)
    pe = jnp.where(i % 2 == 0, jnp.sin(angle), jnp.cos(angle))
    return pe[None, :, :].astype(jnp.float32)


def init_params(key, cfg):
    D, H, dq, dv, Di, V, L = (cfg["d_model"], cfg["n_heads"], cfg["d_queries"],
                              cfg["d_values"], cfg["d_inner"], cfg["vocab_size"],
                              cfg["n_layers"])

    def dense(k, fan_in, fan_out):
        return jax.random.normal(k, (fan_in, fan_out), jnp.float32) * 0.02

    keys = jax.random.split(key, 2 + 10 * L)
    ki = iter(keys)

    def mha_params():
        # NOTE: the PyTorch fused cast_keys_values weight is represented here as
        # separate Wk/Wv (equivalent to splitting its output columns).
        return dict(
            ln_g=jnp.ones((1, D), jnp.float32), ln_b=jnp.zeros((1, D), jnp.float32),
            Wq=dense(next(ki), D, H * dq), bq=jnp.zeros((1, H * dq), jnp.float32),
            Wk=dense(next(ki), D, H * dq), bk=jnp.zeros((1, H * dq), jnp.float32),
            Wv=dense(next(ki), D, H * dv), bv=jnp.zeros((1, H * dv), jnp.float32),
            Wo=dense(next(ki), H * dv, D), bo=jnp.zeros((1, D), jnp.float32),
        )

    def ffn_params():
        return dict(
            ln_g=jnp.ones((1, D), jnp.float32), ln_b=jnp.zeros((1, D), jnp.float32),
            W1=dense(next(ki), D, Di), b1=jnp.zeros((1, Di), jnp.float32),
            W2=dense(next(ki), Di, D), b2=jnp.zeros((1, D), jnp.float32),
        )

    layers = [dict(self_attn=mha_params(), cross_attn=mha_params(), ffn=ffn_params())
              for _ in range(L)]

    return dict(
        emb=dense(next(ki), V, D),
        pos=sinusoidal_positional_encoding(cfg["max_len"], D),
        layers=layers,
        ln_g=jnp.ones((1, D), jnp.float32), ln_b=jnp.zeros((1, D), jnp.float32),
        fc_W=dense(next(ki), D, V), fc_b=jnp.zeros((1, V), jnp.float32),
    )


# ----------------------------------- main ---------------------------------------

if __name__ == "__main__":
    cfg = dict(
        vocab_size=50, d_model=32, n_heads=4, d_queries=8, d_values=8,
        d_inner=64, n_layers=2, dropout=0.0, max_len=32,
    )

    key = jax.random.PRNGKey(0)
    kp, kd, ke = jax.random.split(key, 3)

    params = init_params(kp, cfg)

    B, S_dec, S_enc = 2, 8, 8
    decoder_sequences = jax.random.randint(kd, (B, S_dec), 0, cfg["vocab_size"], jnp.int32)
    decoder_sequence_lengths = jnp.array([8, 5], jnp.int32)
    encoder_sequences = jax.random.normal(ke, (B, S_enc, cfg["d_model"]), jnp.float32)
    encoder_sequence_lengths = jnp.array([8, 6], jnp.int32)

    fwd = jax.jit(lambda p, di, dl, es, el: decoder_forward(p, di, dl, es, el, cfg))
    logits = fwd(params, decoder_sequences, decoder_sequence_lengths,
                 encoder_sequences, encoder_sequence_lengths)
    jax.block_until_ready(logits)

    assert logits.shape == (B, S_dec, cfg["vocab_size"])
    assert bool(jnp.all(jnp.isfinite(logits)))
    print("KERNEL_OK")
</pallas_src>

<mosaic_0001>
module attributes {stable_mosaic.version = 11 : i64} {
  func.func @_decoder_layer_kernel(%arg0: memref<2x8x32xf32, #tpu.memory_space<vmem>>, %arg1: memref<2x8x32xf32, #tpu.memory_space<vmem>>, %arg2: memref<2x8x8xf32, #tpu.memory_space<vmem>>, %arg3: memref<2x8x8xf32, #tpu.memory_space<vmem>>, %arg4: memref<1x32xf32, #tpu.memory_space<vmem>>, %arg5: memref<1x32xf32, #tpu.memory_space<vmem>>, %arg6: memref<32x32xf32, #tpu.memory_space<vmem>>, %arg7: memref<1x32xf32, #tpu.memory_space<vmem>>, %arg8: memref<32x32xf32, #tpu.memory_space<vmem>>, %arg9: memref<1x32xf32, #tpu.memory_space<vmem>>, %arg10: memref<32x32xf32, #tpu.memory_space<vmem>>, %arg11: memref<1x32xf32, #tpu.memory_space<vmem>>, %arg12: memref<32x32xf32, #tpu.memory_space<vmem>>, %arg13: memref<1x32xf32, #tpu.memory_space<vmem>>, %arg14: memref<1x32xf32, #tpu.memory_space<vmem>>, %arg15: memref<1x32xf32, #tpu.memory_space<vmem>>, %arg16: memref<32x32xf32, #tpu.memory_space<vmem>>, %arg17: memref<1x32xf32, #tpu.memory_space<vmem>>, %arg18: memref<32x32xf32, #tpu.memory_space<vmem>>, %arg19: memref<1x32xf32, #tpu.memory_space<vmem>>, %arg20: memref<32x32xf32, #tpu.memory_space<vmem>>, %arg21: memref<1x32xf32, #tpu.memory_space<vmem>>, %arg22: memref<32x32xf32, #tpu.memory_space<vmem>>, %arg23: memref<1x32xf32, #tpu.memory_space<vmem>>, %arg24: memref<1x32xf32, #tpu.memory_space<vmem>>, %arg25: memref<1x32xf32, #tpu.memory_space<vmem>>, %arg26: memref<32x64xf32, #tpu.memory_space<vmem>>, %arg27: memref<1x64xf32, #tpu.memory_space<vmem>>, %arg28: memref<64x32xf32, #tpu.memory_space<vmem>>, %arg29: memref<1x32xf32, #tpu.memory_space<vmem>>, %arg30: memref<2x8x32xf32, #tpu.memory_space<vmem>>) attributes {dimension_semantics = [], scalar_prefetch = 0 : i64, scratch_operands = 0 : i64, tpu.core_type = #tpu.core_type<tc>} {
    %c0 = arith.constant 0 : index
    %c0_0 = arith.constant 0 : index
    %c0_1 = arith.constant 0 : index
    %0 = vector.load %arg0[%c0, %c0_0, %c0_1] : memref<2x8x32xf32, #tpu.memory_space<vmem>>, vector<2x8x32xf32>
    %c0_2 = arith.constant 0 : index
    %c0_3 = arith.constant 0 : index
    %c0_4 = arith.constant 0 : index
    %1 = vector.load %arg1[%c0_2, %c0_3, %c0_4] : memref<2x8x32xf32, #tpu.memory_space<vmem>>, vector<2x8x32xf32>
    %c0_5 = arith.constant 0 : index
    %c0_6 = arith.constant 0 : index
    %c0_7 = arith.constant 0 : index
    %2 = vector.load %arg2[%c0_5, %c0_6, %c0_7] : memref<2x8x8xf32, #tpu.memory_space<vmem>>, vector<2x8x8xf32>
    %c0_8 = arith.constant 0 : index
    %c0_9 = arith.constant 0 : index
    %3 = vector.load %arg4[%c0_8, %c0_9] : memref<1x32xf32, #tpu.memory_space<vmem>>, vector<1x32xf32>
    %c0_10 = arith.constant 0 : index
    %c0_11 = arith.constant 0 : index
    %4 = vector.load %arg5[%c0_10, %c0_11] : memref<1x32xf32, #tpu.memory_space<vmem>>, vector<1x32xf32>
    %c0_12 = arith.constant 0 : index
    %c0_13 = arith.constant 0 : index
    %5 = vector.load %arg6[%c0_12, %c0_13] : memref<32x32xf32, #tpu.memory_space<vmem>>, vector<32x32xf32>
    %c0_14 = arith.constant 0 : index
    %c0_15 = arith.constant 0 : index
    %6 = vector.load %arg7[%c0_14, %c0_15] : memref<1x32xf32, #tpu.memory_space<vmem>>, vector<1x32xf32>
    %c0_16 = arith.constant 0 : index
    %c0_17 = arith.constant 0 : index
    %7 = vector.load %arg8[%c0_16, %c0_17] : memref<32x32xf32, #tpu.memory_space<vmem>>, vector<32x32xf32>
    %c0_18 = arith.constant 0 : index
    %c0_19 = arith.constant 0 : index
    %8 = vector.load %arg9[%c0_18, %c0_19] : memref<1x32xf32, #tpu.memory_space<vmem>>, vector<1x32xf32>
    %c0_20 = arith.constant 0 : index
    %c0_21 = arith.constant 0 : index
    %9 = vector.load %arg10[%c0_20, %c0_21] : memref<32x32xf32, #tpu.memory_space<vmem>>, vector<32x32xf32>
    %c0_22 = arith.constant 0 : index
    %c0_23 = arith.constant 0 : index
    %10 = vector.load %arg11[%c0_22, %c0_23] : memref<1x32xf32, #tpu.memory_space<vmem>>, vector<1x32xf32>
    %c0_24 = arith.constant 0 : index
    %c0_25 = arith.constant 0 : index
    %11 = vector.load %arg12[%c0_24, %c0_25] : memref<32x32xf32, #tpu.memory_space<vmem>>, vector<32x32xf32>
    %c0_26 = arith.constant 0 : index
    %c0_27 = arith.constant 0 : index
    %12 = vector.load %arg13[%c0_26, %c0_27] : memref<1x32xf32, #tpu.memory_space<vmem>>, vector<1x32xf32>
    %13 = vector.shape_cast %0 : vector<2x8x32xf32> to vector<16x32xf32>
    %cst = arith.constant dense<0.000000e+00> : vector<16xf32>
    %14 = vector.multi_reduction <add>, %13, %cst [1] : vector<16x32xf32> to vector<16xf32>
    %15 = vector.shape_cast %14 : vector<16xf32> to vector<16x1xf32>
    %cst_28 = arith.constant 3.200000e+01 : f32
    %16 = vector.broadcast %cst_28 : f32 to vector<16x1xf32>
    %17 = arith.divf %15, %16 : vector<16x1xf32>
    %18 = vector.broadcast %17 : vector<16x1xf32> to vector<16x32xf32>
    %19 = arith.subf %13, %18 : vector<16x32xf32>
    %20 = arith.mulf %19, %19 : vector<16x32xf32>
    %cst_29 = arith.constant dense<0.000000e+00> : vector<16xf32>
    %21 = vector.multi_reduction <add>, %20, %cst_29 [1] : vector<16x32xf32> to vector<16xf32>
    %22 = vector.shape_cast %21 : vector<16xf32> to vector<16x1xf32>
    %cst_30 = arith.constant 3.200000e+01 : f32
    %23 = vector.broadcast %cst_30 : f32 to vector<16x1xf32>
    %24 = arith.divf %22, %23 : vector<16x1xf32>
    %25 = vector.broadcast %17 : vector<16x1xf32> to vector<16x32xf32>
    %26 = arith.subf %13, %25 : vector<16x32xf32>
    %cst_31 = arith.constant 9.99999974E-6 : f32
    %27 = vector.broadcast %cst_31 : f32 to vector<16x1xf32>
    %28 = arith.addf %24, %27 : vector<16x1xf32>
    %29 = math.rsqrt %28 : vector<16x1xf32>
    %30 = vector.broadcast %29 : vector<16x1xf32> to vector<16x32xf32>
    %31 = arith.mulf %26, %30 : vector<16x32xf32>
    %32 = vector.broadcast %3 : vector<1x32xf32> to vector<16x32xf32>
    %33 = arith.mulf %31, %32 : vector<16x32xf32>
    %34 = vector.broadcast %4 : vector<1x32xf32> to vector<16x32xf32>
    %35 = arith.addf %33, %34 : vector<16x32xf32>
    %cst_32 = arith.constant dense<0.000000e+00> : vector<16x32xf32>
    %36 = tpu.matmul %35, %5, %cst_32 {dimension_numbers = #tpu.dot_dimension_numbers<[1], [0], [0], [1], [0, 0, 1, 1], [], []>} : vector<16x32xf32>, vector<32x32xf32>, vector<16x32xf32> -> vector<16x32xf32>
    %37 = vector.broadcast %6 : vector<1x32xf32> to vector<16x32xf32>
    %38 = arith.addf %36, %37 : vector<16x32xf32>
    %cst_33 = arith.constant 0.353553385 : f32
    %39 = vector.broadcast %cst_33 : f32 to vector<16x32xf32>
    %40 = arith.mulf %38, %39 : vector<16x32xf32>
    %cst_34 = arith.constant dense<0.000000e+00> : vector<16x32xf32>
    %41 = tpu.matmul %35, %7, %cst_34 {dimension_numbers = #tpu.dot_dimension_numbers<[1], [0], [0], [1], [0, 0, 1, 1], [], []>} : vector<16x32xf32>, vector<32x32xf32>, vector<16x32xf32> -> vector<16x32xf32>
    %42 = vector.broadcast %8 : vector<1x32xf32> to vector<16x32xf32>
    %43 = arith.addf %41, %42 : vector<16x32xf32>
    %cst_35 = arith.constant dense<0.000000e+00> : vector<16x32xf32>
    %44 = tpu.matmul %35, %9, %cst_35 {dimension_numbers = #tpu.dot_dimension_numbers<[1], [0], [0], [1], [0, 0, 1, 1], [], []>} : vector<16x32xf32>, vector<32x32xf32>, vector<16x32xf32> -> vector<16x32xf32>
    %45 = vector.broadcast %10 : vector<1x32xf32> to vector<16x32xf32>
    %46 = arith.addf %44, %45 : vector<16x32xf32>
    %47 = vector.shape_cast %40 : vector<16x32xf32> to vector<2x8x32xf32>
    %48 = vector.shape_cast %43 : vector<16x32xf32> to vector<2x8x32xf32>
    %49 = vector.shape_cast %46 : vector<16x32xf32> to vector<2x8x32xf32>
    %50 = vector.broadcast %12 : vector<1x32xf32> to vector<16x32xf32>
    %51 = arith.addf %13, %50 : vector<16x32xf32>
    %52 = vector.extract_strided_slice %47 {offsets = [0, 0, 0], sizes = [2, 8, 8], strides = [1, 1, 1]} : vector<2x8x32xf32> to vector<2x8x8xf32>
    %53 = vector.extract_strided_slice %48 {offsets = [0, 0, 0], sizes = [2, 8, 8], strides = [1, 1, 1]} : vector<2x8x32xf32> to vector<2x8x8xf32>
    %54 = vector.extract_strided_slice %49 {offsets = [0, 0, 0], sizes = [2, 8, 8], strides = [1, 1, 1]} : vector<2x8x32xf32> to vector<2x8x8xf32>
    "tpu.trace_start"() <{level = 10 : i32, message = "bqd,bkd->bqk"}> : () -> ()
    %cst_36 = arith.constant dense<0.000000e+00> : vector<2x8x8xf32>
    %55 = tpu.matmul %52, %53, %cst_36 {dimension_numbers = #tpu.dot_dimension_numbers<[2], [2], [1], [1], [0, 0, 0, 1, 1, 1], [0], [0]>} : vector<2x8x8xf32>, vector<2x8x8xf32>, vector<2x8x8xf32> -> vector<2x8x8xf32>
    "tpu.trace_stop"() : () -> ()
    %56 = arith.addf %55, %2 : vector<2x8x8xf32>
    %cst_37 = arith.constant dense<0xFF800000> : vector<2x8xf32>
    %57 = vector.multi_reduction <maximumf>, %56, %cst_37 [2] : vector<2x8x8xf32> to vector<2x8xf32>
    %58 = vector.shape_cast %57 : vector<2x8xf32> to vector<2x8x1xf32>
    %59 = vector.broadcast %58 : vector<2x8x1xf32> to vector<2x8x8xf32>
    %60 = arith.subf %56, %59 : vector<2x8x8xf32>
    %61 = math.exp %60 : vector<2x8x8xf32>
    %cst_38 = arith.constant dense<0.000000e+00> : vector<2x8xf32>
    %62 = vector.multi_reduction <add>, %61, %cst_38 [2] : vector<2x8x8xf32> to vector<2x8xf32>
    %63 = vector.shape_cast %62 : vector<2x8xf32> to vector<2x8x1xf32>
    %64 = tpu.reciprocal %63 {approx = true} : vector<2x8x1xf32> -> vector<2x8x1xf32>
    %65 = vector.broadcast %64 : vector<2x8x1xf32> to vector<2x8x8xf32>
    %66 = arith.mulf %61, %65 : vector<2x8x8xf32>
    "tpu.trace_start"() <{level = 10 : i32, message = "bqk,bkd->bqd"}> : () -> ()
    %cst_39 = arith.constant dense<0.000000e+00> : vector<2x8x8xf32>
    %67 = tpu.matmul %66, %54, %cst_39 {dimension_numbers = #tpu.dot_dimension_numbers<[2], [1], [1], [2], [0, 0, 0, 1, 1, 2], [0], [0]>} : vector<2x8x8xf32>, vector<2x8x8xf32>, vector<2x8x8xf32> -> vector<2x8x8xf32>
    "tpu.trace_stop"() : () -> ()
    %68 = vector.shape_cast %67 : vector<2x8x8xf32> to vector<16x8xf32>
    %69 = vector.extract_strided_slice %11 {offsets = [0, 0], sizes = [8, 32], strides = [1, 1]} : vector<32x32xf32> to vector<8x32xf32>
    %cst_40 = arith.constant dense<0.000000e+00> : vector<16x32xf32>
    %70 = tpu.matmul %68, %69, %cst_40 {dimension_numbers = #tpu.dot_dimension_numbers<[1], [0], [0], [1], [0, 0, 1, 1], [], []>} : vector<16x8xf32>, vector<8x32xf32>, vector<16x32xf32> -> vector<16x32xf32>
    %71 = arith.addf %51, %70 : vector<16x32xf32>
    %72 = vector.extract_strided_slice %47 {offsets = [0, 0, 8], sizes = [2, 8, 8], strides = [1, 1, 1]} : vector<2x8x32xf32> to vector<2x8x8xf32>
    %73 = vector.extract_strided_slice %48 {offsets = [0, 0, 8], sizes = [2, 8, 8], strides = [1, 1, 1]} : vector<2x8x32xf32> to vector<2x8x8xf32>
    %74 = vector.extract_strided_slice %49 {offsets = [0, 0, 8], sizes = [2, 8, 8], strides = [1, 1, 1]} : vector<2x8x32xf32> to vector<2x8x8xf32>
    "tpu.trace_start"() <{level = 10 : i32, message = "bqd,bkd->bqk"}> : () -> ()
    %cst_41 = arith.constant dense<0.000000e+00> : vector<2x8x8xf32>
    %75 = tpu.matmul %72, %73, %cst_41 {dimension_numbers = #tpu.dot_dimension_numbers<[2], [2], [1], [1], [0, 0, 0, 1, 1, 1], [0], [0]>} : vector<2x8x8xf32>, vector<2x8x8xf32>, vector<2x8x8xf32> -> vector<2x8x8xf32>
    "tpu.trace_stop"() : () -> ()
    %76 = arith.addf %75, %2 : vector<2x8x8xf32>
    %cst_42 = arith.constant dense<0xFF800000> : vector<2x8xf32>
    %77 = vector.multi_reduction <maximumf>, %76, %cst_42 [2] : vector<2x8x8xf32> to vector<2x8xf32>
    %78 = vector.shape_cast %77 : vector<2x8xf32> to vector<2x8x1xf32>
    %79 = vector.broadcast %78 : vector<2x8x1xf32> to vector<2x8x8xf32>
    %80 = arith.subf %76, %79 : vector<2x8x8xf32>
    %81 = math.exp %80 : vector<2x8x8xf32>
    %cst_43 = arith.constant dense<0.000000e+00> : vector<2x8xf32>
    %82 = vector.multi_reduction <add>, %81, %cst_43 [2] : vector<2x8x8xf32> to vector<2x8xf32>
    %83 = vector.shape_cast %82 : vector<2x8xf32> to vector<2x8x1xf32>
    %84 = tpu.reciprocal %83 {approx = true} : vector<2x8x1xf32> -> vector<2x8x1xf32>
    %85 = vector.broadcast %84 : vector<2x8x1xf32> to vector<2x8x8xf32>
    %86 = arith.mulf %81, %85 : vector<2x8x8xf32>
    "tpu.trace_start"() <{level = 10 : i32, message = "bqk,bkd->bqd"}> : () -> ()
    %cst_44 = arith.constant dense<0.000000e+00> : vector<2x8x8xf32>
    %87 = tpu.matmul %86, %74, %cst_44 {dimension_numbers = #tpu.dot_dimension_numbers<[2], [1], [1], [2], [0, 0, 0, 1, 1, 2], [0], [0]>} : vector<2x8x8xf32>, vector<2x8x8xf32>, vector<2x8x8xf32> -> vector<2x8x8xf32>
    "tpu.trace_stop"() : () -> ()
    %88 = vector.shape_cast %87 : vector<2x8x8xf32> to vector<16x8xf32>
    %89 = vector.extract_strided_slice %11 {offsets = [8, 0], sizes = [8, 32], strides = [1, 1]} : vector<32x32xf32> to vector<8x32xf32>
    %cst_45 = arith.constant dense<0.000000e+00> : vector<16x32xf32>
    %90 = tpu.matmul %88, %89, %cst_45 {dimension_numbers = #tpu.dot_dimension_numbers<[1], [0], [0], [1], [0, 0, 1, 1], [], []>} : vector<16x8xf32>, vector<8x32xf32>, vector<16x32xf32> -> vector<16x32xf32>
    %91 = arith.addf %71, %90 : vector<16x32xf32>
    %92 = vector.extract_strided_slice %47 {offsets = [0, 0, 16], sizes = [2, 8, 8], strides = [1, 1, 1]} : vector<2x8x32xf32> to vector<2x8x8xf32>
    %93 = vector.extract_strided_slice %48 {offsets = [0, 0, 16], sizes = [2, 8, 8], strides = [1, 1, 1]} : vector<2x8x32xf32> to vector<2x8x8xf32>
    %94 = vector.extract_strided_slice %49 {offsets = [0, 0, 16], sizes = [2, 8, 8], strides = [1, 1, 1]} : vector<2x8x32xf32> to vector<2x8x8xf32>
    "tpu.trace_start"() <{level = 10 : i32, message = "bqd,bkd->bqk"}> : () -> ()
    %cst_46 = arith.constant dense<0.000000e+00> : vector<2x8x8xf32>
    %95 = tpu.matmul %92, %93, %cst_46 {dimension_numbers = #tpu.dot_dimension_numbers<[2], [2], [1], [1], [0, 0, 0, 1, 1, 1], [0], [0]>} : vector<2x8x8xf32>, vector<2x8x8xf32>, vector<2x8x8xf32> -> vector<2x8x8xf32>
    "tpu.trace_stop"() : () -> ()
    %96 = arith.addf %95, %2 : vector<2x8x8xf32>
    %cst_47 = arith.constant dense<0xFF800000> : vector<2x8xf32>
    %97 = vector.multi_reduction <maximumf>, %96, %cst_47 [2] : vector<2x8x8xf32> to vector<2x8xf32>
    %98 = vector.shape_cast %97 : vector<2x8xf32> to vector<2x8x1xf32>
    %99 = vector.broadcast %98 : vector<2x8x1xf32> to vector<2x8x8xf32>
    %100 = arith.subf %96, %99 : vector<2x8x8xf32>
    %101 = math.exp %100 : vector<2x8x8xf32>
    %cst_48 = arith.constant dense<0.000000e+00> : vector<2x8xf32>
    %102 = vector.multi_reduction <add>, %101, %cst_48 [2] : vector<2x8x8xf32> to vector<2x8xf32>
    %103 = vector.shape_cast %102 : vector<2x8xf32> to vector<2x8x1xf32>
    %104 = tpu.reciprocal %103 {approx = true} : vector<2x8x1xf32> -> vector<2x8x1xf32>
    %105 = vector.broadcast %104 : vector<2x8x1xf32> to vector<2x8x8xf32>
    %106 = arith.mulf %101, %105 : vector<2x8x8xf32>
    "tpu.trace_start"() <{level = 10 : i32, message = "bqk,bkd->bqd"}> : () -> ()
    %cst_49 = arith.constant dense<0.000000e+00> : vector<2x8x8xf32>
    %107 = tpu.matmul %106, %94, %cst_49 {dimension_numbers = #tpu.dot_dimension_numbers<[2], [1], [1], [2], [0, 0, 0, 1, 1, 2], [0], [0]>} : vector<2x8x8xf32>, vector<2x8x8xf32>, vector<2x8x8xf32> -> vector<2x8x8xf32>
    "tpu.trace_stop"() : () -> ()
    %108 = vector.shape_cast %107 : vector<2x8x8xf32> to vector<16x8xf32>
    %109 = vector.extract_strided_slice %11 {offsets = [16, 0], sizes = [8, 32], strides = [1, 1]} : vector<32x32xf32> to vector<8x32xf32>
    %cst_50 = arith.constant dense<0.000000e+00> : vector<16x32xf32>
    %110 = tpu.matmul %108, %109, %cst_50 {dimension_numbers = #tpu.dot_dimension_numbers<[1], [0], [0], [1], [0, 0, 1, 1], [], []>} : vector<16x8xf32>, vector<8x32xf32>, vector<16x32xf32> -> vector<16x32xf32>
    %111 = arith.addf %91, %110 : vector<16x32xf32>
    %112 = vector.extract_strided_slice %47 {offsets = [0, 0, 24], sizes = [2, 8, 8], strides = [1, 1, 1]} : vector<2x8x32xf32> to vector<2x8x8xf32>
    %113 = vector.extract_strided_slice %48 {offsets = [0, 0, 24], sizes = [2, 8, 8], strides = [1, 1, 1]} : vector<2x8x32xf32> to vector<2x8x8xf32>
    %114 = vector.extract_strided_slice %49 {offsets = [0, 0, 24], sizes = [2, 8, 8], strides = [1, 1, 1]} : vector<2x8x32xf32> to vector<2x8x8xf32>
    "tpu.trace_start"() <{level = 10 : i32, message = "bqd,bkd->bqk"}> : () -> ()
    %cst_51 = arith.constant dense<0.000000e+00> : vector<2x8x8xf32>
    %115 = tpu.matmul %112, %113, %cst_51 {dimension_numbers = #tpu.dot_dimension_numbers<[2], [2], [1], [1], [0, 0, 0, 1, 1, 1], [0], [0]>} : vector<2x8x8xf32>, vector<2x8x8xf32>, vector<2x8x8xf32> -> vector<2x8x8xf32>
    "tpu.trace_stop"() : () -> ()
    %116 = arith.addf %115, %2 : vector<2x8x8xf32>
    %cst_52 = arith.constant dense<0xFF800000> : vector<2x8xf32>
    %117 = vector.multi_reduction <maximumf>, %116, %cst_52 [2] : vector<2x8x8xf32> to vector<2x8xf32>
    %118 = vector.shape_cast %117 : vector<2x8xf32> to vector<2x8x1xf32>
    %119 = vector.broadcast %118 : vector<2x8x1xf32> to vector<2x8x8xf32>
    %120 = arith.subf %116, %119 : vector<2x8x8xf32>
    %121 = math.exp %120 : vector<2x8x8xf32>
    %cst_53 = arith.constant dense<0.000000e+00> : vector<2x8xf32>
    %122 = vector.multi_reduction <add>, %121, %cst_53 [2] : vector<2x8x8xf32> to vector<2x8xf32>
    %123 = vector.shape_cast %122 : vector<2x8xf32> to vector<2x8x1xf32>
    %124 = tpu.reciprocal %123 {approx = true} : vector<2x8x1xf32> -> vector<2x8x1xf32>
    %125 = vector.broadcast %124 : vector<2x8x1xf32> to vector<2x8x8xf32>
    %126 = arith.mulf %121, %125 : vector<2x8x8xf32>
    "tpu.trace_start"() <{level = 10 : i32, message = "bqk,bkd->bqd"}> : () -> ()
    %cst_54 = arith.constant dense<0.000000e+00> : vector<2x8x8xf32>
    %127 = tpu.matmul %126, %114, %cst_54 {dimension_numbers = #tpu.dot_dimension_numbers<[2], [1], [1], [2], [0, 0, 0, 1, 1, 2], [0], [0]>} : vector<2x8x8xf32>, vector<2x8x8xf32>, vector<2x8x8xf32> -> vector<2x8x8xf32>
    "tpu.trace_stop"() : () -> ()
    %128 = vector.shape_cast %127 : vector<2x8x8xf32> to vector<16x8xf32>
    %129 = vector.extract_strided_slice %11 {offsets = [24, 0], sizes = [8, 32], strides = [1, 1]} : vector<32x32xf32> to vector<8x32xf32>
    %cst_55 = arith.constant dense<0.000000e+00> : vector<16x32xf32>
    %130 = tpu.matmul %128, %129, %cst_55 {dimension_numbers = #tpu.dot_dimension_numbers<[1], [0], [0], [1], [0, 0, 1, 1], [], []>} : vector<16x8xf32>, vector<8x32xf32>, vector<16x32xf32> -> vector<16x32xf32>
    %131 = arith.addf %111, %130 : vector<16x32xf32>
    %132 = vector.shape_cast %131 : vector<16x32xf32> to vector<2x8x32xf32>
    %c0_56 = arith.constant 0 : index
    %c0_57 = arith.constant 0 : index
    %c0_58 = arith.constant 0 : index
    %133 = vector.load %arg3[%c0_56, %c0_57, %c0_58] : memref<2x8x8xf32, #tpu.memory_space<vmem>>, vector<2x8x8xf32>
    %c0_59 = arith.constant 0 : index
    %c0_60 = arith.constant 0 : index
    %134 = vector.load %arg14[%c0_59, %c0_60] : memref<1x32xf32, #tpu.memory_space<vmem>>, vector<1x32xf32>
    %c0_61 = arith.constant 0 : index
    %c0_62 = arith.constant 0 : index
    %135 = vector.load %arg15[%c0_61, %c0_62] : memref<1x32xf32, #tpu.memory_space<vmem>>, vector<1x32xf32>
    %c0_63 = arith.constant 0 : index
    %c0_64 = arith.constant 0 : index
    %136 = vector.load %arg16[%c0_63, %c0_64] : memref<32x32xf32, #tpu.memory_space<vmem>>, vector<32x32xf32>
    %c0_65 = arith.constant 0 : index
    %c0_66 = arith.constant 0 : index
    %137 = vector.load %arg17[%c0_65, %c0_66] : memref<1x32xf32, #tpu.memory_space<vmem>>, vector<1x32xf32>
    %c0_67 = arith.constant 0 : index
    %c0_68 = arith.constant 0 : index
    %138 = vector.load %arg18[%c0_67, %c0_68] : memref<32x32xf32, #tpu.memory_space<vmem>>, vector<32x32xf32>
    %c0_69 = arith.constant 0 : index
    %c0_70 = arith.constant 0 : index
    %139 = vector.load %arg19[%c0_69, %c0_70] : memref<1x32xf32, #tpu.memory_space<vmem>>, vector<1x32xf32>
    %c0_71 = arith.constant 0 : index
    %c0_72 = arith.constant 0 : index
    %140 = vector.load %arg20[%c0_71, %c0_72] : memref<32x32xf32, #tpu.memory_space<vmem>>, vector<32x32xf32>
    %c0_73 = arith.constant 0 : index
    %c0_74 = arith.constant 0 : index
    %141 = vector.load %arg21[%c0_73, %c0_74] : memref<1x32xf32, #tpu.memory_space<vmem>>, vector<1x32xf32>
    %c0_75 = arith.constant 0 : index
    %c0_76 = arith.constant 0 : index
    %142 = vector.load %arg22[%c0_75, %c0_76] : memref<32x32xf32, #tpu.memory_space<vmem>>, vector<32x32xf32>
    %c0_77 = arith.constant 0 : index
    %c0_78 = arith.constant 0 : index
    %143 = vector.load %arg23[%c0_77, %c0_78] : memref<1x32xf32, #tpu.memory_space<vmem>>, vector<1x32xf32>
    %144 = vector.shape_cast %132 : vector<2x8x32xf32> to vector<16x32xf32>
    %cst_79 = arith.constant dense<0.000000e+00> : vector<16xf32>
    %145 = vector.multi_reduction <add>, %144, %cst_79 [1] : vector<16x32xf32> to vector<16xf32>
    %146 = vector.shape_cast %145 : vector<16xf32> to vector<16x1xf32>
    %cst_80 = arith.constant 3.200000e+01 : f32
    %147 = vector.broadcast %cst_80 : f32 to vector<16x1xf32>
    %148 = arith.divf %146, %147 : vector<16x1xf32>
    %149 = vector.broadcast %148 : vector<16x1xf32> to vector<16x32xf32>
    %150 = arith.subf %144, %149 : vector<16x32xf32>
    %151 = arith.mulf %150, %150 : vector<16x32xf32>
    %cst_81 = arith.constant dense<0.000000e+00> : vector<16xf32>
    %152 = vector.multi_reduction <add>, %151, %cst_81 [1] : vector<16x32xf32> to vector<16xf32>
    %153 = vector.shape_cast %152 : vector<16xf32> to vector<16x1xf32>
    %cst_82 = arith.constant 3.200000e+01 : f32
    %154 = vector.broadcast %cst_82 : f32 to vector<16x1xf32>
    %155 = arith.divf %153, %154 : vector<16x1xf32>
    %156 = vector.broadcast %148 : vector<16x1xf32> to vector<16x32xf32>
    %157 = arith.subf %144, %156 : vector<16x32xf32>
    %cst_83 = arith.constant 9.99999974E-6 : f32
    %158 = vector.broadcast %cst_83 : f32 to vector<16x1xf32>
    %159 = arith.addf %155, %158 : vector<16x1xf32>
    %160 = math.rsqrt %159 : vector<16x1xf32>
    %161 = vector.broadcast %160 : vector<16x1xf32> to vector<16x32xf32>
    %162 = arith.mulf %157, %161 : vector<16x32xf32>
    %163 = vector.broadcast %134 : vector<1x32xf32> to vector<16x32xf32>
    %164 = arith.mulf %162, %163 : vector<16x32xf32>
    %165 = vector.broadcast %135 : vector<1x32xf32> to vector<16x32xf32>
    %166 = arith.addf %164, %165 : vector<16x32xf32>
    %167 = vector.shape_cast %1 : vector<2x8x32xf32> to vector<16x32xf32>
    %cst_84 = arith.constant dense<0.000000e+00> : vector<16x32xf32>
    %168 = tpu.matmul %166, %136, %cst_84 {dimension_numbers = #tpu.dot_dimension_numbers<[1], [0], [0], [1], [0, 0, 1, 1], [], []>} : vector<16x32xf32>, vector<32x32xf32>, vector<16x32xf32> -> vector<16x32xf32>
    %169 = vector.broadcast %137 : vector<1x32xf32> to vector<16x32xf32>
    %170 = arith.addf %168, %169 : vector<16x32xf32>
    %cst_85 = arith.constant 0.353553385 : f32
    %171 = vector.broadcast %cst_85 : f32 to vector<16x32xf32>
    %172 = arith.mulf %170, %171 : vector<16x32xf32>
    %cst_86 = arith.constant dense<0.000000e+00> : vector<16x32xf32>
    %173 = tpu.matmul %167, %138, %cst_86 {dimension_numbers = #tpu.dot_dimension_numbers<[1], [0], [0], [1], [0, 0, 1, 1], [], []>} : vector<16x32xf32>, vector<32x32xf32>, vector<16x32xf32> -> vector<16x32xf32>
    %174 = vector.broadcast %139 : vector<1x32xf32> to vector<16x32xf32>
    %175 = arith.addf %173, %174 : vector<16x32xf32>
    %cst_87 = arith.constant dense<0.000000e+00> : vector<16x32xf32>
    %176 = tpu.matmul %167, %140, %cst_87 {dimension_numbers = #tpu.dot_dimension_numbers<[1], [0], [0], [1], [0, 0, 1, 1], [], []>} : vector<16x32xf32>, vector<32x32xf32>, vector<16x32xf32> -> vector<16x32xf32>
    %177 = vector.broadcast %141 : vector<1x32xf32> to vector<16x32xf32>
    %178 = arith.addf %176, %177 : vector<16x32xf32>
    %179 = vector.shape_cast %172 : vector<16x32xf32> to vector<2x8x32xf32>
    %180 = vector.shape_cast %175 : vector<16x32xf32> to vector<2x8x32xf32>
    %181 = vector.shape_cast %178 : vector<16x32xf32> to vector<2x8x32xf32>
    %182 = vector.broadcast %143 : vector<1x32xf32> to vector<16x32xf32>
    %183 = arith.addf %144, %182 : vector<16x32xf32>
    %184 = vector.extract_strided_slice %179 {offsets = [0, 0, 0], sizes = [2, 8, 8], strides = [1, 1, 1]} : vector<2x8x32xf32> to vector<2x8x8xf32>
    %185 = vector.extract_strided_slice %180 {offsets = [0, 0, 0], sizes = [2, 8, 8], strides = [1, 1, 1]} : vector<2x8x32xf32> to vector<2x8x8xf32>
    %186 = vector.extract_strided_slice %181 {offsets = [0, 0, 0], sizes = [2, 8, 8], strides = [1, 1, 1]} : vector<2x8x32xf32> to vector<2x8x8xf32>
    "tpu.trace_start"() <{level = 10 : i32, message = "bqd,bkd->bqk"}> : () -> ()
    %cst_88 = arith.constant dense<0.000000e+00> : vector<2x8x8xf32>
    %187 = tpu.matmul %184, %185, %cst_88 {dimension_numbers = #tpu.dot_dimension_numbers<[2], [2], [1], [1], [0, 0, 0, 1, 1, 1], [0], [0]>} : vector<2x8x8xf32>, vector<2x8x8xf32>, vector<2x8x8xf32> -> vector<2x8x8xf32>
    "tpu.trace_stop"() : () -> ()
    %188 = arith.addf %187, %133 : vector<2x8x8xf32>
    %cst_89 = arith.constant dense<0xFF800000> : vector<2x8xf32>
    %189 = vector.multi_reduction <maximumf>, %188, %cst_89 [2] : vector<2x8x8xf32> to vector<2x8xf32>
    %190 = vector.shape_cast %189 : vector<2x8xf32> to vector<2x8x1xf32>
    %191 = vector.broadcast %190 : vector<2x8x1xf32> to vector<2x8x8xf32>
    %192 = arith.subf %188, %191 : vector<2x8x8xf32>
    %193 = math.exp %192 : vector<2x8x8xf32>
    %cst_90 = arith.constant dense<0.000000e+00> : vector<2x8xf32>
    %194 = vector.multi_reduction <add>, %193, %cst_90 [2] : vector<2x8x8xf32> to vector<2x8xf32>
    %195 = vector.shape_cast %194 : vector<2x8xf32> to vector<2x8x1xf32>
    %196 = tpu.reciprocal %195 {approx = true} : vector<2x8x1xf32> -> vector<2x8x1xf32>
    %197 = vector.broadcast %196 : vector<2x8x1xf32> to vector<2x8x8xf32>
    %198 = arith.mulf %193, %197 : vector<2x8x8xf32>
    "tpu.trace_start"() <{level = 10 : i32, message = "bqk,bkd->bqd"}> : () -> ()
    %cst_91 = arith.constant dense<0.000000e+00> : vector<2x8x8xf32>
    %199 = tpu.matmul %198, %186, %cst_91 {dimension_numbers = #tpu.dot_dimension_numbers<[2], [1], [1], [2], [0, 0, 0, 1, 1, 2], [0], [0]>} : vector<2x8x8xf32>, vector<2x8x8xf32>, vector<2x8x8xf32> -> vector<2x8x8xf32>
    "tpu.trace_stop"() : () -> ()
    %200 = vector.shape_cast %199 : vector<2x8x8xf32> to vector<16x8xf32>
    %201 = vector.extract_strided_slice %142 {offsets = [0, 0], sizes = [8, 32], strides = [1, 1]} : vector<32x32xf32> to vector<8x32xf32>
    %cst_92 = arith.constant dense<0.000000e+00> : vector<16x32xf32>
    %202 = tpu.matmul %200, %201, %cst_92 {dimension_numbers = #tpu.dot_dimension_numbers<[1], [0], [0], [1], [0, 0, 1, 1], [], []>} : vector<16x8xf32>, vector<8x32xf32>, vector<16x32xf32> -> vector<16x32xf32>
    %203 = arith.addf %183, %202 : vector<16x32xf32>
    %204 = vector.extract_strided_slice %179 {offsets = [0, 0, 8], sizes = [2, 8, 8], strides = [1, 1, 1]} : vector<2x8x32xf32> to vector<2x8x8xf32>
    %205 = vector.extract_strided_slice %180 {offsets = [0, 0, 8], sizes = [2, 8, 8], strides = [1, 1, 1]} : vector<2x8x32xf32> to vector<2x8x8xf32>
    %206 = vector.extract_strided_slice %181 {offsets = [0, 0, 8], sizes = [2, 8, 8], strides = [1, 1, 1]} : vector<2x8x32xf32> to vector<2x8x8xf32>
    "tpu.trace_start"() <{level = 10 : i32, message = "bqd,bkd->bqk"}> : () -> ()
    %cst_93 = arith.constant dense<0.000000e+00> : vector<2x8x8xf32>
    %207 = tpu.matmul %204, %205, %cst_93 {dimension_numbers = #tpu.dot_dimension_numbers<[2], [2], [1], [1], [0, 0, 0, 1, 1, 1], [0], [0]>} : vector<2x8x8xf32>, vector<2x8x8xf32>, vector<2x8x8xf32> -> vector<2x8x8xf32>
    "tpu.trace_stop"() : () -> ()
    %208 = arith.addf %207, %133 : vector<2x8x8xf32>
    %cst_94 = arith.constant dense<0xFF800000> : vector<2x8xf32>
    %209 = vector.multi_reduction <maximumf>, %208, %cst_94 [2] : vector<2x8x8xf32> to vector<2x8xf32>
    %210 = vector.shape_cast %209 : vector<2x8xf32> to vector<2x8x1xf32>
    %211 = vector.broadcast %210 : vector<2x8x1xf32> to vector<2x8x8xf32>
    %212 = arith.subf %208, %211 : vector<2x8x8xf32>
    %213 = math.exp %212 : vector<2x8x8xf32>
    %cst_95 = arith.constant dense<0.000000e+00> : vector<2x8xf32>
    %214 = vector.multi_reduction <add>, %213, %cst_95 [2] : vector<2x8x8xf32> to vector<2x8xf32>
    %215 = vector.shape_cast %214 : vector<2x8xf32> to vector<2x8x1xf32>
    %216 = tpu.reciprocal %215 {approx = true} : vector<2x8x1xf32> -> vector<2x8x1xf32>
    %217 = vector.broadcast %216 : vector<2x8x1xf32> to vector<2x8x8xf32>
    %218 = arith.mulf %213, %217 : vector<2x8x8xf32>
    "tpu.trace_start"() <{level = 10 : i32, message = "bqk,bkd->bqd"}> : () -> ()
    %cst_96 = arith.constant dense<0.000000e+00> : vector<2x8x8xf32>
    %219 = tpu.matmul %218, %206, %cst_96 {dimension_numbers = #tpu.dot_dimension_numbers<[2], [1], [1], [2], [0, 0, 0, 1, 1, 2], [0], [0]>} : vector<2x8x8xf32>, vector<2x8x8xf32>, vector<2x8x8xf32> -> vector<2x8x8xf32>
    "tpu.trace_stop"() : () -> ()
    %220 = vector.shape_cast %219 : vector<2x8x8xf32> to vector<16x8xf32>
    %221 = vector.extract_strided_slice %142 {offsets = [8, 0], sizes = [8, 32], strides = [1, 1]} : vector<32x32xf32> to vector<8x32xf32>
    %cst_97 = arith.constant dense<0.000000e+00> : vector<16x32xf32>
    %222 = tpu.matmul %220, %221, %cst_97 {dimension_numbers = #tpu.dot_dimension_numbers<[1], [0], [0], [1], [0, 0, 1, 1], [], []>} : vector<16x8xf32>, vector<8x32xf32>, vector<16x32xf32> -> vector<16x32xf32>
    %223 = arith.addf %203, %222 : vector<16x32xf32>
    %224 = vector.extract_strided_slice %179 {offsets = [0, 0, 16], sizes = [2, 8, 8], strides = [1, 1, 1]} : vector<2x8x32xf32> to vector<2x8x8xf32>
    %225 = vector.extract_strided_slice %180 {offsets = [0, 0, 16], sizes = [2, 8, 8], strides = [1, 1, 1]} : vector<2x8x32xf32> to vector<2x8x8xf32>
    %226 = vector.extract_strided_slice %181 {offsets = [0, 0, 16], sizes = [2, 8, 8], strides = [1, 1, 1]} : vector<2x8x32xf32> to vector<2x8x8xf32>
    "tpu.trace_start"() <{level = 10 : i32, message = "bqd,bkd->bqk"}> : () -> ()
    %cst_98 = arith.constant dense<0.000000e+00> : vector<2x8x8xf32>
    %227 = tpu.matmul %224, %225, %cst_98 {dimension_numbers = #tpu.dot_dimension_numbers<[2], [2], [1], [1], [0, 0, 0, 1, 1, 1], [0], [0]>} : vector<2x8x8xf32>, vector<2x8x8xf32>, vector<2x8x8xf32> -> vector<2x8x8xf32>
    "tpu.trace_stop"() : () -> ()
    %228 = arith.addf %227, %133 : vector<2x8x8xf32>
    %cst_99 = arith.constant dense<0xFF800000> : vector<2x8xf32>
    %229 = vector.multi_reduction <maximumf>, %228, %cst_99 [2] : vector<2x8x8xf32> to vector<2x8xf32>
    %230 = vector.shape_cast %229 : vector<2x8xf32> to vector<2x8x1xf32>
    %231 = vector.broadcast %230 : vector<2x8x1xf32> to vector<2x8x8xf32>
    %232 = arith.subf %228, %231 : vector<2x8x8xf32>
    %233 = math.exp %232 : vector<2x8x8xf32>
    %cst_100 = arith.constant dense<0.000000e+00> : vector<2x8xf32>
    %234 = vector.multi_reduction <add>, %233, %cst_100 [2] : vector<2x8x8xf32> to vector<2x8xf32>
    %235 = vector.shape_cast %234 : vector<2x8xf32> to vector<2x8x1xf32>
    %236 = tpu.reciprocal %235 {approx = true} : vector<2x8x1xf32> -> vector<2x8x1xf32>
    %237 = vector.broadcast %236 : vector<2x8x1xf32> to vector<2x8x8xf32>
    %238 = arith.mulf %233, %237 : vector<2x8x8xf32>
    "tpu.trace_start"() <{level = 10 : i32, message = "bqk,bkd->bqd"}> : () -> ()
    %cst_101 = arith.constant dense<0.000000e+00> : vector<2x8x8xf32>
    %239 = tpu.matmul %238, %226, %cst_101 {dimension_numbers = #tpu.dot_dimension_numbers<[2], [1], [1], [2], [0, 0, 0, 1, 1, 2], [0], [0]>} : vector<2x8x8xf32>, vector<2x8x8xf32>, vector<2x8x8xf32> -> vector<2x8x8xf32>
    "tpu.trace_stop"() : () -> ()
    %240 = vector.shape_cast %239 : vector<2x8x8xf32> to vector<16x8xf32>
    %241 = vector.extract_strided_slice %142 {offsets = [16, 0], sizes = [8, 32], strides = [1, 1]} : vector<32x32xf32> to vector<8x32xf32>
    %cst_102 = arith.constant dense<0.000000e+00> : vector<16x32xf32>
    %242 = tpu.matmul %240, %241, %cst_102 {dimension_numbers = #tpu.dot_dimension_numbers<[1], [0], [0], [1], [0, 0, 1, 1], [], []>} : vector<16x8xf32>, vector<8x32xf32>, vector<16x32xf32> -> vector<16x32xf32>
    %243 = arith.addf %223, %242 : vector<16x32xf32>
    %244 = vector.extract_strided_slice %179 {offsets = [0, 0, 24], sizes = [2, 8, 8], strides = [1, 1, 1]} : vector<2x8x32xf32> to vector<2x8x8xf32>
    %245 = vector.extract_strided_slice %180 {offsets = [0, 0, 24], sizes = [2, 8, 8], strides = [1, 1, 1]} : vector<2x8x32xf32> to vector<2x8x8xf32>
    %246 = vector.extract_strided_slice %181 {offsets = [0, 0, 24], sizes = [2, 8, 8], strides = [1, 1, 1]} : vector<2x8x32xf32> to vector<2x8x8xf32>
    "tpu.trace_start"() <{level = 10 : i32, message = "bqd,bkd->bqk"}> : () -> ()
    %cst_103 = arith.constant dense<0.000000e+00> : vector<2x8x8xf32>
    %247 = tpu.matmul %244, %245, %cst_103 {dimension_numbers = #tpu.dot_dimension_numbers<[2], [2], [1], [1], [0, 0, 0, 1, 1, 1], [0], [0]>} : vector<2x8x8xf32>, vector<2x8x8xf32>, vector<2x8x8xf32> -> vector<2x8x8xf32>
    "tpu.trace_stop"() : () -> ()
    %248 = arith.addf %247, %133 : vector<2x8x8xf32>
    %cst_104 = arith.constant dense<0xFF800000> : vector<2x8xf32>
    %249 = vector.multi_reduction <maximumf>, %248, %cst_104 [2] : vector<2x8x8xf32> to vector<2x8xf32>
    %250 = vector.shape_cast %249 : vector<2x8xf32> to vector<2x8x1xf32>
    %251 = vector.broadcast %250 : vector<2x8x1xf32> to vector<2x8x8xf32>
    %252 = arith.subf %248, %251 : vector<2x8x8xf32>
    %253 = math.exp %252 : vector<2x8x8xf32>
    %cst_105 = arith.constant dense<0.000000e+00> : vector<2x8xf32>
    %254 = vector.multi_reduction <add>, %253, %cst_105 [2] : vector<2x8x8xf32> to vector<2x8xf32>
    %255 = vector.shape_cast %254 : vector<2x8xf32> to vector<2x8x1xf32>
    %256 = tpu.reciprocal %255 {approx = true} : vector<2x8x1xf32> -> vector<2x8x1xf32>
    %257 = vector.broadcast %256 : vector<2x8x1xf32> to vector<2x8x8xf32>
    %258 = arith.mulf %253, %257 : vector<2x8x8xf32>
    "tpu.trace_start"() <{level = 10 : i32, message = "bqk,bkd->bqd"}> : () -> ()
    %cst_106 = arith.constant dense<0.000000e+00> : vector<2x8x8xf32>
    %259 = tpu.matmul %258, %246, %cst_106 {dimension_numbers = #tpu.dot_dimension_numbers<[2], [1], [1], [2], [0, 0, 0, 1, 1, 2], [0], [0]>} : vector<2x8x8xf32>, vector<2x8x8xf32>, vector<2x8x8xf32> -> vector<2x8x8xf32>
    "tpu.trace_stop"() : () -> ()
    %260 = vector.shape_cast %259 : vector<2x8x8xf32> to vector<16x8xf32>
    %261 = vector.extract_strided_slice %142 {offsets = [24, 0], sizes = [8, 32], strides = [1, 1]} : vector<32x32xf32> to vector<8x32xf32>
    %cst_107 = arith.constant dense<0.000000e+00> : vector<16x32xf32>
    %262 = tpu.matmul %260, %261, %cst_107 {dimension_numbers = #tpu.dot_dimension_numbers<[1], [0], [0], [1], [0, 0, 1, 1], [], []>} : vector<16x8xf32>, vector<8x32xf32>, vector<16x32xf32> -> vector<16x32xf32>
    %263 = arith.addf %243, %262 : vector<16x32xf32>
    %264 = vector.shape_cast %263 : vector<16x32xf32> to vector<2x8x32xf32>
    %265 = vector.shape_cast %264 : vector<2x8x32xf32> to vector<16x32xf32>
    %c0_108 = arith.constant 0 : index
    %c0_109 = arith.constant 0 : index
    %266 = vector.load %arg24[%c0_108, %c0_109] : memref<1x32xf32, #tpu.memory_space<vmem>>, vector<1x32xf32>
    %c0_110 = arith.constant 0 : index
    %c0_111 = arith.constant 0 : index
    %267 = vector.load %arg25[%c0_110, %c0_111] : memref<1x32xf32, #tpu.memory_space<vmem>>, vector<1x32xf32>
    %cst_112 = arith.constant dense<0.000000e+00> : vector<16xf32>
    %268 = vector.multi_reduction <add>, %265, %cst_112 [1] : vector<16x32xf32> to vector<16xf32>
    %269 = vector.shape_cast %268 : vector<16xf32> to vector<16x1xf32>
    %cst_113 = arith.constant 3.200000e+01 : f32
    %270 = vector.broadcast %cst_113 : f32 to vector<16x1xf32>
    %271 = arith.divf %269, %270 : vector<16x1xf32>
    %272 = vector.broadcast %271 : vector<16x1xf32> to vector<16x32xf32>
    %273 = arith.subf %265, %272 : vector<16x32xf32>
    %274 = arith.mulf %273, %273 : vector<16x32xf32>
    %cst_114 = arith.constant dense<0.000000e+00> : vector<16xf32>
    %275 = vector.multi_reduction <add>, %274, %cst_114 [1] : vector<16x32xf32> to vector<16xf32>
    %276 = vector.shape_cast %275 : vector<16xf32> to vector<16x1xf32>
    %cst_115 = arith.constant 3.200000e+01 : f32
    %277 = vector.broadcast %cst_115 : f32 to vector<16x1xf32>
    %278 = arith.divf %276, %277 : vector<16x1xf32>
    %279 = vector.broadcast %271 : vector<16x1xf32> to vector<16x32xf32>
    %280 = arith.subf %265, %279 : vector<16x32xf32>
    %cst_116 = arith.constant 9.99999974E-6 : f32
    %281 = vector.broadcast %cst_116 : f32 to vector<16x1xf32>
    %282 = arith.addf %278, %281 : vector<16x1xf32>
    %283 = math.rsqrt %282 : vector<16x1xf32>
    %284 = vector.broadcast %283 : vector<16x1xf32> to vector<16x32xf32>
    %285 = arith.mulf %280, %284 : vector<16x32xf32>
    %286 = vector.broadcast %266 : vector<1x32xf32> to vector<16x32xf32>
    %287 = arith.mulf %285, %286 : vector<16x32xf32>
    %288 = vector.broadcast %267 : vector<1x32xf32> to vector<16x32xf32>
    %289 = arith.addf %287, %288 : vector<16x32xf32>
    %c0_117 = arith.constant 0 : index
    %c0_118 = arith.constant 0 : index
    %290 = vector.load %arg26[%c0_117, %c0_118] : memref<32x64xf32, #tpu.memory_space<vmem>>, vector<32x64xf32>
    %cst_119 = arith.constant dense<0.000000e+00> : vector<16x64xf32>
    %291 = tpu.matmul %289, %290, %cst_119 {dimension_numbers = #tpu.dot_dimension_numbers<[1], [0], [0], [1], [0, 0, 1, 1], [], []>} : vector<16x32xf32>, vector<32x64xf32>, vector<16x64xf32> -> vector<16x64xf32>
    %c0_120 = arith.constant 0 : index
    %c0_121 = arith.constant 0 : index
    %292 = vector.load %arg27[%c0_120, %c0_121] : memref<1x64xf32, #tpu.memory_space<vmem>>, vector<1x64xf32>
    %293 = vector.broadcast %292 : vector<1x64xf32> to vector<16x64xf32>
    %294 = arith.addf %291, %293 : vector<16x64xf32>
    %cst_122 = arith.constant 0.000000e+00 : f32
    %295 = vector.broadcast %cst_122 : f32 to vector<16x64xf32>
    %296 = arith.maximumf %294, %295 : vector<16x64xf32>
    %c0_123 = arith.constant 0 : index
    %c0_124 = arith.constant 0 : index
    %297 = vector.load %arg28[%c0_123, %c0_124] : memref<64x32xf32, #tpu.memory_space<vmem>>, vector<64x32xf32>
    %cst_125 = arith.constant dense<0.000000e+00> : vector<16x32xf32>
    %298 = tpu.matmul %296, %297, %cst_125 {dimension_numbers = #tpu.dot_dimension_numbers<[1], [0], [0], [1], [0, 0, 1, 1], [], []>} : vector<16x64xf32>, vector<64x32xf32>, vector<16x32xf32> -> vector<16x32xf32>
    %c0_126 = arith.constant 0 : index
    %c0_127 = arith.constant 0 : index
    %299 = vector.load %arg29[%c0_126, %c0_127] : memref<1x32xf32, #tpu.memory_space<vmem>>, vector<1x32xf32>
    %300 = vector.broadcast %299 : vector<1x32xf32> to vector<16x32xf32>
    %301 = arith.addf %298, %300 : vector<16x32xf32>
    %302 = arith.addf %301, %265 : vector<16x32xf32>
    %303 = vector.shape_cast %302 : vector<16x32xf32> to vector<2x8x32xf32>
    %c0_128 = arith.constant 0 : index
    %c0_129 = arith.constant 0 : index
    %c0_130 = arith.constant 0 : index
    %304 = vector.load %arg30[%c0_128, %c0_129, %c0_130] : memref<2x8x32xf32, #tpu.memory_space<vmem>>, vector<2x8x32xf32>
    tpu.vector_store %arg30[%c0_128, %c0_129, %c0_130], %303 {strides = array<i32>} : memref<2x8x32xf32, #tpu.memory_space<vmem>>, vector<2x8x32xf32>,
    return
  }
}

module attributes {stable_mosaic.version = 11 : i64} {
  func.func @_final_kernel(%arg0: memref<16x32xf32, #tpu.memory_space<vmem>>, %arg1: memref<1x32xf32, #tpu.memory_space<vmem>>, %arg2: memref<1x32xf32, #tpu.memory_space<vmem>>, %arg3: memref<32x128xf32, #tpu.memory_space<vmem>>, %arg4: memref<1x128xf32, #tpu.memory_space<vmem>>, %arg5: memref<16x128xf32, #tpu.memory_space<vmem>>) attributes {dimension_semantics = [], scalar_prefetch = 0 : i64, scratch_operands = 0 : i64, tpu.core_type = #tpu.core_type<tc>} {
    %c0 = arith.constant 0 : index
    %c0_0 = arith.constant 0 : index
    %0 = vector.load %arg0[%c0, %c0_0] : memref<16x32xf32, #tpu.memory_space<vmem>>, vector<16x32xf32>
    %c0_1 = arith.constant 0 : index
    %c0_2 = arith.constant 0 : index
    %1 = vector.load %arg1[%c0_1, %c0_2] : memref<1x32xf32, #tpu.memory_space<vmem>>, vector<1x32xf32>
    %c0_3 = arith.constant 0 : index
    %c0_4 = arith.constant 0 : index
    %2 = vector.load %arg2[%c0_3, %c0_4] : memref<1x32xf32, #tpu.memory_space<vmem>>, vector<1x32xf32>
    %cst = arith.constant dense<0.000000e+00> : vector<16xf32>
    %3 = vector.multi_reduction <add>, %0, %cst [1] : vector<16x32xf32> to vector<16xf32>
    %4 = vector.shape_cast %3 : vector<16xf32> to vector<16x1xf32>
    %cst_5 = arith.constant 3.200000e+01 : f32
    %5 = vector.broadcast %cst_5 : f32 to vector<16x1xf32>
    %6 = arith.divf %4, %5 : vector<16x1xf32>
    %7 = vector.broadcast %6 : vector<16x1xf32> to vector<16x32xf32>
    %8 = arith.subf %0, %7 : vector<16x32xf32>
    %9 = arith.mulf %8, %8 : vector<16x32xf32>
    %cst_6 = arith.constant dense<0.000000e+00> : vector<16xf32>
    %10 = vector.multi_reduction <add>, %9, %cst_6 [1] : vector<16x32xf32> to vector<16xf32>
    %11 = vector.shape_cast %10 : vector<16xf32> to vector<16x1xf32>
    %cst_7 = arith.constant 3.200000e+01 : f32
    %12 = vector.broadcast %cst_7 : f32 to vector<16x1xf32>
    %13 = arith.divf %11, %12 : vector<16x1xf32>
    %14 = vector.broadcast %6 : vector<16x1xf32> to vector<16x32xf32>
    %15 = arith.subf %0, %14 : vector<16x32xf32>
    %cst_8 = arith.constant 9.99999974E-6 : f32
    %16 = vector.broadcast %cst_8 : f32 to vector<16x1xf32>
    %17 = arith.addf %13, %16 : vector<16x1xf32>
    %18 = math.rsqrt %17 : vector<16x1xf32>
    %19 = vector.broadcast %18 : vector<16x1xf32> to vector<16x32xf32>
    %20 = arith.mulf %15, %19 : vector<16x32xf32>
    %21 = vector.broadcast %1 : vector<1x32xf32> to vector<16x32xf32>
    %22 = arith.mulf %20, %21 : vector<16x32xf32>
    %23 = vector.broadcast %2 : vector<1x32xf32> to vector<16x32xf32>
    %24 = arith.addf %22, %23 : vector<16x32xf32>
    %c0_9 = arith.constant 0 : index
    %c0_10 = arith.constant 0 : index
    %25 = vector.load %arg3[%c0_9, %c0_10] : memref<32x128xf32, #tpu.memory_space<vmem>>, vector<32x128xf32>
    %cst_11 = arith.constant dense<0.000000e+00> : vector<16x128xf32>
    %26 = tpu.matmul %24, %25, %cst_11 {dimension_numbers = #tpu.dot_dimension_numbers<[1], [0], [0], [1], [0, 0, 1, 1], [], []>} : vector<16x32xf32>, vector<32x128xf32>, vector<16x128xf32> -> vector<16x128xf32>
    %c0_12 = arith.constant 0 : index
    %c0_13 = arith.constant 0 : index
    %27 = vector.load %arg4[%c0_12, %c0_13] : memref<1x128xf32, #tpu.memory_space<vmem>>, vector<1x128xf32>
    %28 = vector.broadcast %27 : vector<1x128xf32> to vector<16x128xf32>
    %29 = arith.addf %26, %28 : vector<16x128xf32>
    %c0_14 = arith.constant 0 : index
    %c0_15 = arith.constant 0 : index
    %30 = vector.load %arg5[%c0_14, %c0_15] : memref<16x128xf32, #tpu.memory_space<vmem>>, vector<16x128xf32>
    tpu.vector_store %arg5[%c0_14, %c0_15], %29 {strides = array<i32>} : memref<16x128xf32, #tpu.memory_space<vmem>>, vector<16x128xf32>,
    return
  }
}

module attributes {stable_mosaic.version = 11 : i64} {
  func.func @_decoder_layer_kernel(%arg0: memref<2x8x32xf32, #tpu.memory_space<vmem>>, %arg1: memref<2x8x32xf32, #tpu.memory_space<vmem>>, %arg2: memref<2x8x8xf32, #tpu.memory_space<vmem>>, %arg3: memref<2x8x8xf32, #tpu.memory_space<vmem>>, %arg4: memref<1x32xf32, #tpu.memory_space<vmem>>, %arg5: memref<1x32xf32, #tpu.memory_space<vmem>>, %arg6: memref<32x32xf32, #tpu.memory_space<vmem>>, %arg7: memref<1x32xf32, #tpu.memory_space<vmem>>, %arg8: memref<32x32xf32, #tpu.memory_space<vmem>>, %arg9: memref<1x32xf32, #tpu.memory_space<vmem>>, %arg10: memref<32x32xf32, #tpu.memory_space<vmem>>, %arg11: memref<1x32xf32, #tpu.memory_space<vmem>>, %arg12: memref<32x32xf32, #tpu.memory_space<vmem>>, %arg13: memref<1x32xf32, #tpu.memory_space<vmem>>, %arg14: memref<1x32xf32, #tpu.memory_space<vmem>>, %arg15: memref<1x32xf32, #tpu.memory_space<vmem>>, %arg16: memref<32x32xf32, #tpu.memory_space<vmem>>, %arg17: memref<1x32xf32, #tpu.memory_space<vmem>>, %arg18: memref<32x32xf32, #tpu.memory_space<vmem>>, %arg19: memref<1x32xf32, #tpu.memory_space<vmem>>, %arg20: memref<32x32xf32, #tpu.memory_space<vmem>>, %arg21: memref<1x32xf32, #tpu.memory_space<vmem>>, %arg22: memref<32x32xf32, #tpu.memory_space<vmem>>, %arg23: memref<1x32xf32, #tpu.memory_space<vmem>>, %arg24: memref<1x32xf32, #tpu.memory_space<vmem>>, %arg25: memref<1x32xf32, #tpu.memory_space<vmem>>, %arg26: memref<32x64xf32, #tpu.memory_space<vmem>>, %arg27: memref<1x64xf32, #tpu.memory_space<vmem>>, %arg28: memref<64x32xf32, #tpu.memory_space<vmem>>, %arg29: memref<1x32xf32, #tpu.memory_space<vmem>>, %arg30: memref<2x8x32xf32, #tpu.memory_space<vmem>>) attributes {dimension_semantics = [], scalar_prefetch = 0 : i64, scratch_operands = 0 : i64, tpu.core_type = #tpu.core_type<tc>} {
    %c0 = arith.constant 0 : index
    %c0_0 = arith.constant 0 : index
    %c0_1 = arith.constant 0 : index
    %0 = vector.load %arg0[%c0, %c0_0, %c0_1] : memref<2x8x32xf32, #tpu.memory_space<vmem>>, vector<2x8x32xf32>
    %c0_2 = arith.constant 0 : index
    %c0_3 = arith.constant 0 : index
    %c0_4 = arith.constant 0 : index
    %1 = vector.load %arg1[%c0_2, %c0_3, %c0_4] : memref<2x8x32xf32, #tpu.memory_space<vmem>>, vector<2x8x32xf32>
    %c0_5 = arith.constant 0 : index
    %c0_6 = arith.constant 0 : index
    %c0_7 = arith.constant 0 : index
    %2 = vector.load %arg2[%c0_5, %c0_6, %c0_7] : memref<2x8x8xf32, #tpu.memory_space<vmem>>, vector<2x8x8xf32>
    %c0_8 = arith.constant 0 : index
    %c0_9 = arith.constant 0 : index
    %3 = vector.load %arg4[%c0_8, %c0_9] : memref<1x32xf32, #tpu.memory_space<vmem>>, vector<1x32xf32>
    %c0_10 = arith.constant 0 : index
    %c0_11 = arith.constant 0 : index
    %4 = vector.load %arg5[%c0_10, %c0_11] : memref<1x32xf32, #tpu.memory_space<vmem>>, vector<1x32xf32>
    %c0_12 = arith.constant 0 : index
    %c0_13 = arith.constant 0 : index
    %5 = vector.load %arg6[%c0_12, %c0_13] : memref<32x32xf32, #tpu.memory_space<vmem>>, vector<32x32xf32>
    %c0_14 = arith.constant 0 : index
    %c0_15 = arith.constant 0 : index
    %6 = vector.load %arg7[%c0_14, %c0_15] : memref<1x32xf32, #tpu.memory_space<vmem>>, vector<1x32xf32>
    %c0_16 = arith.constant 0 : index
    %c0_17 = arith.constant 0 : index
    %7 = vector.load %arg8[%c0_16, %c0_17] : memref<32x32xf32, #tpu.memory_space<vmem>>, vector<32x32xf32>
    %c0_18 = arith.constant 0 : index
    %c0_19 = arith.constant 0 : index
    %8 = vector.load %arg9[%c0_18, %c0_19] : memref<1x32xf32, #tpu.memory_space<vmem>>, vector<1x32xf32>
    %c0_20 = arith.constant 0 : index
    %c0_21 = arith.constant 0 : index
    %9 = vector.load %arg10[%c0_20, %c0_21] : memref<32x32xf32, #tpu.memory_space<vmem>>, vector<32x32xf32>
    %c0_22 = arith.constant 0 : index
    %c0_23 = arith.constant 0 : index
    %10 = vector.load %arg11[%c0_22, %c0_23] : memref<1x32xf32, #tpu.memory_space<vmem>>, vector<1x32xf32>
    %c0_24 = arith.constant 0 : index
    %c0_25 = arith.constant 0 : index
    %11 = vector.load %arg12[%c0_24, %c0_25] : memref<32x32xf32, #tpu.memory_space<vmem>>, vector<32x32xf32>
    %c0_26 = arith.constant 0 : index
    %c0_27 = arith.constant 0 : index
    %12 = vector.load %arg13[%c0_26, %c0_27] : memref<1x32xf32, #tpu.memory_space<vmem>>, vector<1x32xf32>
    %13 = vector.shape_cast %0 : vector<2x8x32xf32> to vector<16x32xf32>
    %cst = arith.constant dense<0.000000e+00> : vector<16xf32>
    %14 = vector.multi_reduction <add>, %13, %cst [1] : vector<16x32xf32> to vector<16xf32>
    %15 = vector.shape_cast %14 : vector<16xf32> to vector<16x1xf32>
    %cst_28 = arith.constant 3.200000e+01 : f32
    %16 = vector.broadcast %cst_28 : f32 to vector<16x1xf32>
    %17 = arith.divf %15, %16 : vector<16x1xf32>
    %18 = vector.broadcast %17 : vector<16x1xf32> to vector<16x32xf32>
    %19 = arith.subf %13, %18 : vector<16x32xf32>
    %20 = arith.mulf %19, %19 : vector<16x32xf32>
    %cst_29 = arith.constant dense<0.000000e+00> : vector<16xf32>
    %21 = vector.multi_reduction <add>, %20, %cst_29 [1] : vector<16x32xf32> to vector<16xf32>
    %22 = vector.shape_cast %21 : vector<16xf32> to vector<16x1xf32>
    %cst_30 = arith.constant 3.200000e+01 : f32
    %23 = vector.broadcast %cst_30 : f32 to vector<16x1xf32>
    %24 = arith.divf %22, %23 : vector<16x1xf32>
    %25 = vector.broadcast %17 : vector<16x1xf32> to vector<16x32xf32>
    %26 = arith.subf %13, %25 : vector<16x32xf32>
    %cst_31 = arith.constant 9.99999974E-6 : f32
    %27 = vector.broadcast %cst_31 : f32 to vector<16x1xf32>
    %28 = arith.addf %24, %27 : vector<16x1xf32>
    %29 = math.rsqrt %28 : vector<16x1xf32>
    %30 = vector.broadcast %29 : vector<16x1xf32> to vector<16x32xf32>
    %31 = arith.mulf %26, %30 : vector<16x32xf32>
    %32 = vector.broadcast %3 : vector<1x32xf32> to vector<16x32xf32>
    %33 = arith.mulf %31, %32 : vector<16x32xf32>
    %34 = vector.broadcast %4 : vector<1x32xf32> to vector<16x32xf32>
    %35 = arith.addf %33, %34 : vector<16x32xf32>
    %cst_32 = arith.constant dense<0.000000e+00> : vector<16x32xf32>
    %36 = tpu.matmul %35, %5, %cst_32 {dimension_numbers = #tpu.dot_dimension_numbers<[1], [0], [0], [1], [0, 0, 1, 1], [], []>} : vector<16x32xf32>, vector<32x32xf32>, vector<16x32xf32> -> vector<16x32xf32>
    %37 = vector.broadcast %6 : vector<1x32xf32> to vector<16x32xf32>
    %38 = arith.addf %36, %37 : vector<16x32xf32>
    %cst_33 = arith.constant 0.353553385 : f32
    %39 = vector.broadcast %cst_33 : f32 to vector<16x32xf32>
    %40 = arith.mulf %38, %39 : vector<16x32xf32>
    %cst_34 = arith.constant dense<0.000000e+00> : vector<16x32xf32>
    %41 = tpu.matmul %35, %7, %cst_34 {dimension_numbers = #tpu.dot_dimension_numbers<[1], [0], [0], [1], [0, 0, 1, 1], [], []>} : vector<16x32xf32>, vector<32x32xf32>, vector<16x32xf32> -> vector<16x32xf32>
    %42 = vector.broadcast %8 : vector<1x32xf32> to vector<16x32xf32>
    %43 = arith.addf %41, %42 : vector<16x32xf32>
    %cst_35 = arith.constant dense<0.000000e+00> : vector<16x32xf32>
    %44 = tpu.matmul %35, %9, %cst_35 {dimension_numbers = #tpu.dot_dimension_numbers<[1], [0], [0], [1], [0, 0, 1, 1], [], []>} : vector<16x32xf32>, vector<32x32xf32>, vector<16x32xf32> -> vector<16x32xf32>
    %45 = vector.broadcast %10 : vector<1x32xf32> to vector<16x32xf32>
    %46 = arith.addf %44, %45 : vector<16x32xf32>
    %47 = vector.shape_cast %40 : vector<16x32xf32> to vector<2x8x32xf32>
    %48 = vector.shape_cast %43 : vector<16x32xf32> to vector<2x8x32xf32>
    %49 = vector.shape_cast %46 : vector<16x32xf32> to vector<2x8x32xf32>
    %50 = vector.broadcast %12 : vector<1x32xf32> to vector<16x32xf32>
    %51 = arith.addf %13, %50 : vector<16x32xf32>
    %52 = vector.extract_strided_slice %47 {offsets = [0, 0, 0], sizes = [2, 8, 8], strides = [1, 1, 1]} : vector<2x8x32xf32> to vector<2x8x8xf32>
    %53 = vector.extract_strided_slice %48 {offsets = [0, 0, 0], sizes = [2, 8, 8], strides = [1, 1, 1]} : vector<2x8x32xf32> to vector<2x8x8xf32>
    %54 = vector.extract_strided_slice %49 {offsets = [0, 0, 0], sizes = [2, 8, 8], strides = [1, 1, 1]} : vector<2x8x32xf32> to vector<2x8x8xf32>
    "tpu.trace_start"() <{level = 10 : i32, message = "bqd,bkd->bqk"}> : () -> ()
    %cst_36 = arith.constant dense<0.000000e+00> : vector<2x8x8xf32>
    %55 = tpu.matmul %52, %53, %cst_36 {dimension_numbers = #tpu.dot_dimension_numbers<[2], [2], [1], [1], [0, 0, 0, 1, 1, 1], [0], [0]>} : vector<2x8x8xf32>, vector<2x8x8xf32>, vector<2x8x8xf32> -> vector<2x8x8xf32>
    "tpu.trace_stop"() : () -> ()
    %56 = arith.addf %55, %2 : vector<2x8x8xf32>
    %cst_37 = arith.constant dense<0xFF800000> : vector<2x8xf32>
    %57 = vector.multi_reduction <maximumf>, %56, %cst_37 [2] : vector<2x8x8xf32> to vector<2x8xf32>
    %58 = vector.shape_cast %57 : vector<2x8xf32> to vector<2x8x1xf32>
    %59 = vector.broadcast %58 : vector<2x8x1xf32> to vector<2x8x8xf32>
    %60 = arith.subf %56, %59 : vector<2x8x8xf32>
    %61 = math.exp %60 : vector<2x8x8xf32>
    %cst_38 = arith.constant dense<0.000000e+00> : vector<2x8xf32>
    %62 = vector.multi_reduction <add>, %61, %cst_38 [2] : vector<2x8x8xf32> to vector<2x8xf32>
    %63 = vector.shape_cast %62 : vector<2x8xf32> to vector<2x8x1xf32>
    %64 = tpu.reciprocal %63 {approx = true} : vector<2x8x1xf32> -> vector<2x8x1xf32>
    %65 = vector.broadcast %64 : vector<2x8x1xf32> to vector<2x8x8xf32>
    %66 = arith.mulf %61, %65 : vector<2x8x8xf32>
    "tpu.trace_start"() <{level = 10 : i32, message = "bqk,bkd->bqd"}> : () -> ()
    %cst_39 = arith.constant dense<0.000000e+00> : vector<2x8x8xf32>
    %67 = tpu.matmul %66, %54, %cst_39 {dimension_numbers = #tpu.dot_dimension_numbers<[2], [1], [1], [2], [0, 0, 0, 1, 1, 2], [0], [0]>} : vector<2x8x8xf32>, vector<2x8x8xf32>, vector<2x8x8xf32> -> vector<2x8x8xf32>
    "tpu.trace_stop"() : () -> ()
    %68 = vector.shape_cast %67 : vector<2x8x8xf32> to vector<16x8xf32>
    %69 = vector.extract_strided_slice %11 {offsets = [0, 0], sizes = [8, 32], strides = [1, 1]} : vector<32x32xf32> to vector<8x32xf32>
    %cst_40 = arith.constant dense<0.000000e+00> : vector<16x32xf32>
    %70 = tpu.matmul %68, %69, %cst_40 {dimension_numbers = #tpu.dot_dimension_numbers<[1], [0], [0], [1], [0, 0, 1, 1], [], []>} : vector<16x8xf32>, vector<8x32xf32>, vector<16x32xf32> -> vector<16x32xf32>
    %71 = arith.addf %51, %70 : vector<16x32xf32>
    %72 = vector.extract_strided_slice %47 {offsets = [0, 0, 8], sizes = [2, 8, 8], strides = [1, 1, 1]} : vector<2x8x32xf32> to vector<2x8x8xf32>
    %73 = vector.extract_strided_slice %48 {offsets = [0, 0, 8], sizes = [2, 8, 8], strides = [1, 1, 1]} : vector<2x8x32xf32> to vector<2x8x8xf32>
    %74 = vector.extract_strided_slice %49 {offsets = [0, 0, 8], sizes = [2, 8, 8], strides = [1, 1, 1]} : vector<2x8x32xf32> to vector<2x8x8xf32>
    "tpu.trace_start"() <{level = 10 : i32, message = "bqd,bkd->bqk"}> : () -> ()
    %cst_41 = arith.constant dense<0.000000e+00> : vector<2x8x8xf32>
    %75 = tpu.matmul %72, %73, %cst_41 {dimension_numbers = #tpu.dot_dimension_numbers<[2], [2], [1], [1], [0, 0, 0, 1, 1, 1], [0], [0]>} : vector<2x8x8xf32>, vector<2x8x8xf32>, vector<2x8x8xf32> -> vector<2x8x8xf32>
    "tpu.trace_stop"() : () -> ()
    %76 = arith.addf %75, %2 : vector<2x8x8xf32>
    %cst_42 = arith.constant dense<0xFF800000> : vector<2x8xf32>
    %77 = vector.multi_reduction <maximumf>, %76, %cst_42 [2] : vector<2x8x8xf32> to vector<2x8xf32>
    %78 = vector.shape_cast %77 : vector<2x8xf32> to vector<2x8x1xf32>
    %79 = vector.broadcast %78 : vector<2x8x1xf32> to vector<2x8x8xf32>
    %80 = arith.subf %76, %79 : vector<2x8x8xf32>
    %81 = math.exp %80 : vector<2x8x8xf32>
    %cst_43 = arith.constant dense<0.000000e+00> : vector<2x8xf32>
    %82 = vector.multi_reduction <add>, %81, %cst_43 [2] : vector<2x8x8xf32> to vector<2x8xf32>
    %83 = vector.shape_cast %82 : vector<2x8xf32> to vector<2x8x1xf32>
    %84 = tpu.reciprocal %83 {approx = true} : vector<2x8x1xf32> -> vector<2x8x1xf32>
    %85 = vector.broadcast %84 : vector<2x8x1xf32> to vector<2x8x8xf32>
    %86 = arith.mulf %81, %85 : vector<2x8x8xf32>
    "tpu.trace_start"() <{level = 10 : i32, message = "bqk,bkd->bqd"}> : () -> ()
    %cst_44 = arith.constant dense<0.000000e+00> : vector<2x8x8xf32>
    %87 = tpu.matmul %86, %74, %cst_44 {dimension_numbers = #tpu.dot_dimension_numbers<[2], [1], [1], [2], [0, 0, 0, 1, 1, 2], [0], [0]>} : vector<2x8x8xf32>, vector<2x8x8xf32>, vector<2x8x8xf32> -> vector<2x8x8xf32>
    "tpu.trace_stop"() : () -> ()
    %88 = vector.shape_cast %87 : vector<2x8x8xf32> to vector<16x8xf32>
    %89 = vector.extract_strided_slice %11 {offsets = [8, 0], sizes = [8, 32], strides = [1, 1]} : vector<32x32xf32> to vector<8x32xf32>
    %cst_45 = arith.constant dense<0.000000e+00> : vector<16x32xf32>
    %90 = tpu.matmul %88, %89, %cst_45 {dimension_numbers = #tpu.dot_dimension_numbers<[1], [0], [0], [1], [0, 0, 1, 1], [], []>} : vector<16x8xf32>, vector<8x32xf32>, vector<16x32xf32> -> vector<16x32xf32>
    %91 = arith.addf %71, %90 : vector<16x32xf32>
    %92 = vector.extract_strided_slice %47 {offsets = [0, 0, 16], sizes = [2, 8, 8], strides = [1, 1, 1]} : vector<2x8x32xf32> to vector<2x8x8xf32>
    %93 = vector.extract_strided_slice %48 {offsets = [0, 0, 16], sizes = [2, 8, 8], strides = [1, 1, 1]} : vector<2x8x32xf32> to vector<2x8x8xf32>
    %94 = vector.extract_strided_slice %49 {offsets = [0, 0, 16], sizes = [2, 8, 8], strides = [1, 1, 1]} : vector<2x8x32xf32> to vector<2x8x8xf32>
    "tpu.trace_start"() <{level = 10 : i32, message = "bqd,bkd->bqk"}> : () -> ()
    %cst_46 = arith.constant dense<0.000000e+00> : vector<2x8x8xf32>
    %95 = tpu.matmul %92, %93, %cst_46 {dimension_numbers = #tpu.dot_dimension_numbers<[2], [2], [1], [1], [0, 0, 0, 1, 1, 1], [0], [0]>} : vector<2x8x8xf32>, vector<2x8x8xf32>, vector<2x8x8xf32> -> vector<2x8x8xf32>
    "tpu.trace_stop"() : () -> ()
    %96 = arith.addf %95, %2 : vector<2x8x8xf32>
    %cst_47 = arith.constant dense<0xFF800000> : vector<2x8xf32>
    %97 = vector.multi_reduction <maximumf>, %96, %cst_47 [2] : vector<2x8x8xf32> to vector<2x8xf32>
    %98 = vector.shape_cast %97 : vector<2x8xf32> to vector<2x8x1xf32>
    %99 = vector.broadcast %98 : vector<2x8x1xf32> to vector<2x8x8xf32>
    %100 = arith.subf %96, %99 : vector<2x8x8xf32>
    %101 = math.exp %100 : vector<2x8x8xf32>
    %cst_48 = arith.constant dense<0.000000e+00> : vector<2x8xf32>
    %102 = vector.multi_reduction <add>, %101, %cst_48 [2] : vector<2x8x8xf32> to vector<2x8xf32>
    %103 = vector.shape_cast %102 : vector<2x8xf32> to vector<2x8x1xf32>
    %104 = tpu.reciprocal %103 {approx = true} : vector<2x8x1xf32> -> vector<2x8x1xf32>
    %105 = vector.broadcast %104 : vector<2x8x1xf32> to vector<2x8x8xf32>
    %106 = arith.mulf %101, %105 : vector<2x8x8xf32>
    "tpu.trace_start"() <{level = 10 : i32, message = "bqk,bkd->bqd"}> : () -> ()
    %cst_49 = arith.constant dense<0.000000e+00> : vector<2x8x8xf32>
    %107 = tpu.matmul %106, %94, %cst_49 {dimension_numbers = #tpu.dot_dimension_numbers<[2], [1], [1], [2], [0, 0, 0, 1, 1, 2], [0], [0]>} : vector<2x8x8xf32>, vector<2x8x8xf32>, vector<2x8x8xf32> -> vector<2x8x8xf32>
    "tpu.trace_stop"() : () -> ()
    %108 = vector.shape_cast %107 : vector<2x8x8xf32> to vector<16x8xf32>
    %109 = vector.extract_strided_slice %11 {offsets = [16, 0], sizes = [8, 32], strides = [1, 1]} : vector<32x32xf32> to vector<8x32xf32>
    %cst_50 = arith.constant dense<0.000000e+00> : vector<16x32xf32>
    %110 = tpu.matmul %108, %109, %cst_50 {dimension_numbers = #tpu.dot_dimension_numbers<[1], [0], [0], [1], [0, 0, 1, 1], [], []>} : vector<16x8xf32>, vector<8x32xf32>, vector<16x32xf32> -> vector<16x32xf32>
    %111 = arith.addf %91, %110 : vector<16x32xf32>
    %112 = vector.extract_strided_slice %47 {offsets = [0, 0, 24], sizes = [2, 8, 8], strides = [1, 1, 1]} : vector<2x8x32xf32> to vector<2x8x8xf32>
    %113 = vector.extract_strided_slice %48 {offsets = [0, 0, 24], sizes = [2, 8, 8], strides = [1, 1, 1]} : vector<2x8x32xf32> to vector<2x8x8xf32>
    %114 = vector.extract_strided_slice %49 {offsets = [0, 0, 24], sizes = [2, 8, 8], strides = [1, 1, 1]} : vector<2x8x32xf32> to vector<2x8x8xf32>
    "tpu.trace_start"() <{level = 10 : i32, message = "bqd,bkd->bqk"}> : () -> ()
    %cst_51 = arith.constant dense<0.000000e+00> : vector<2x8x8xf32>
    %115 = tpu.matmul %112, %113, %cst_51 {dimension_numbers = #tpu.dot_dimension_numbers<[2], [2], [1], [1], [0, 0, 0, 1, 1, 1], [0], [0]>} : vector<2x8x8xf32>, vector<2x8x8xf32>, vector<2x8x8xf32> -> vector<2x8x8xf32>
    "tpu.trace_stop"() : () -> ()
    %116 = arith.addf %115, %2 : vector<2x8x8xf32>
    %cst_52 = arith.constant dense<0xFF800000> : vector<2x8xf32>
    %117 = vector.multi_reduction <maximumf>, %116, %cst_52 [2] : vector<2x8x8xf32> to vector<2x8xf32>
    %118 = vector.shape_cast %117 : vector<2x8xf32> to vector<2x8x1xf32>
    %119 = vector.broadcast %118 : vector<2x8x1xf32> to vector<2x8x8xf32>
    %120 = arith.subf %116, %119 : vector<2x8x8xf32>
    %121 = math.exp %120 : vector<2x8x8xf32>
    %cst_53 = arith.constant dense<0.000000e+00> : vector<2x8xf32>
    %122 = vector.multi_reduction <add>, %121, %cst_53 [2] : vector<2x8x8xf32> to vector<2x8xf32>
    %123 = vector.shape_cast %122 : vector<2x8xf32> to vector<2x8x1xf32>
    %124 = tpu.reciprocal %123 {approx = true} : vector<2x8x1xf32> -> vector<2x8x1xf32>
    %125 = vector.broadcast %124 : vector<2x8x1xf32> to vector<2x8x8xf32>
    %126 = arith.mulf %121, %125 : vector<2x8x8xf32>
    "tpu.trace_start"() <{level = 10 : i32, message = "bqk,bkd->bqd"}> : () -> ()
    %cst_54 = arith.constant dense<0.000000e+00> : vector<2x8x8xf32>
    %127 = tpu.matmul %126, %114, %cst_54 {dimension_numbers = #tpu.dot_dimension_numbers<[2], [1], [1], [2], [0, 0, 0, 1, 1, 2], [0], [0]>} : vector<2x8x8xf32>, vector<2x8x8xf32>, vector<2x8x8xf32> -> vector<2x8x8xf32>
    "tpu.trace_stop"() : () -> ()
    %128 = vector.shape_cast %127 : vector<2x8x8xf32> to vector<16x8xf32>
    %129 = vector.extract_strided_slice %11 {offsets = [24, 0], sizes = [8, 32], strides = [1, 1]} : vector<32x32xf32> to vector<8x32xf32>
    %cst_55 = arith.constant dense<0.000000e+00> : vector<16x32xf32>
    %130 = tpu.matmul %128, %129, %cst_55 {dimension_numbers = #tpu.dot_dimension_numbers<[1], [0], [0], [1], [0, 0, 1, 1], [], []>} : vector<16x8xf32>, vector<8x32xf32>, vector<16x32xf32> -> vector<16x32xf32>
    %131 = arith.addf %111, %130 : vector<16x32xf32>
    %132 = vector.shape_cast %131 : vector<16x32xf32> to vector<2x8x32xf32>
    %c0_56 = arith.constant 0 : index
    %c0_57 = arith.constant 0 : index
    %c0_58 = arith.constant 0 : index
    %133 = vector.load %arg3[%c0_56, %c0_57, %c0_58] : memref<2x8x8xf32, #tpu.memory_space<vmem>>, vector<2x8x8xf32>
    %c0_59 = arith.constant 0 : index
    %c0_60 = arith.constant 0 : index
    %134 = vector.load %arg14[%c0_59, %c0_60] : memref<1x32xf32, #tpu.memory_space<vmem>>, vector<1x32xf32>
    %c0_61 = arith.constant 0 : index
    %c0_62 = arith.constant 0 : index
    %135 = vector.load %arg15[%c0_61, %c0_62] : memref<1x32xf32, #tpu.memory_space<vmem>>, vector<1x32xf32>
    %c0_63 = arith.constant 0 : index
    %c0_64 = arith.constant 0 : index
    %136 = vector.load %arg16[%c0_63, %c0_64] : memref<32x32xf32, #tpu.memory_space<vmem>>, vector<32x32xf32>
    %c0_65 = arith.constant 0 : index
    %c0_66 = arith.constant 0 : index
    %137 = vector.load %arg17[%c0_65, %c0_66] : memref<1x32xf32, #tpu.memory_space<vmem>>, vector<1x32xf32>
    %c0_67 = arith.constant 0 : index
    %c0_68 = arith.constant 0 : index
    %138 = vector.load %arg18[%c0_67, %c0_68] : memref<32x32xf32, #tpu.memory_space<vmem>>, vector<32x32xf32>
    %c0_69 = arith.constant 0 : index
    %c0_70 = arith.constant 0 : index
    %139 = vector.load %arg19[%c0_69, %c0_70] : memref<1x32xf32, #tpu.memory_space<vmem>>, vector<1x32xf32>
    %c0_71 = arith.constant 0 : index
    %c0_72 = arith.constant 0 : index
    %140 = vector.load %arg20[%c0_71, %c0_72] : memref<32x32xf32, #tpu.memory_space<vmem>>, vector<32x32xf32>
    %c0_73 = arith.constant 0 : index
    %c0_74 = arith.constant 0 : index
    %141 = vector.load %arg21[%c0_73, %c0_74] : memref<1x32xf32, #tpu.memory_space<vmem>>, vector<1x32xf32>
    %c0_75 = arith.constant 0 : index
    %c0_76 = arith.constant 0 : index
    %142 = vector.load %arg22[%c0_75, %c0_76] : memref<32x32xf32, #tpu.memory_space<vmem>>, vector<32x32xf32>
    %c0_77 = arith.constant 0 : index
    %c0_78 = arith.constant 0 : index
    %143 = vector.load %arg23[%c0_77, %c0_78] : memref<1x32xf32, #tpu.memory_space<vmem>>, vector<1x32xf32>
    %144 = vector.shape_cast %132 : vector<2x8x32xf32> to vector<16x32xf32>
    %cst_79 = arith.constant dense<0.000000e+00> : vector<16xf32>
    %145 = vector.multi_reduction <add>, %144, %cst_79 [1] : vector<16x32xf32> to vector<16xf32>
    %146 = vector.shape_cast %145 : vector<16xf32> to vector<16x1xf32>
    %cst_80 = arith.constant 3.200000e+01 : f32
    %147 = vector.broadcast %cst_80 : f32 to vector<16x1xf32>
    %148 = arith.divf %146, %147 : vector<16x1xf32>
    %149 = vector.broadcast %148 : vector<16x1xf32> to vector<16x32xf32>
    %150 = arith.subf %144, %149 : vector<16x32xf32>
    %151 = arith.mulf %150, %150 : vector<16x32xf32>
    %cst_81 = arith.constant dense<0.000000e+00> : vector<16xf32>
    %152 = vector.multi_reduction <add>, %151, %cst_81 [1] : vector<16x32xf32> to vector<16xf32>
    %153 = vector.shape_cast %152 : vector<16xf32> to vector<16x1xf32>
    %cst_82 = arith.constant 3.200000e+01 : f32
    %154 = vector.broadcast %cst_82 : f32 to vector<16x1xf32>
    %155 = arith.divf %153, %154 : vector<16x1xf32>
    %156 = vector.broadcast %148 : vector<16x1xf32> to vector<16x32xf32>
    %157 = arith.subf %144, %156 : vector<16x32xf32>
    %cst_83 = arith.constant 9.99999974E-6 : f32
    %158 = vector.broadcast %cst_83 : f32 to vector<16x1xf32>
    %159 = arith.addf %155, %158 : vector<16x1xf32>
    %160 = math.rsqrt %159 : vector<16x1xf32>
    %161 = vector.broadcast %160 : vector<16x1xf32> to vector<16x32xf32>
    %162 = arith.mulf %157, %161 : vector<16x32xf32>
    %163 = vector.broadcast %134 : vector<1x32xf32> to vector<16x32xf32>
    %164 = arith.mulf %162, %163 : vector<16x32xf32>
    %165 = vector.broadcast %135 : vector<1x32xf32> to vector<16x32xf32>
    %166 = arith.addf %164, %165 : vector<16x32xf32>
    %167 = vector.shape_cast %1 : vector<2x8x32xf32> to vector<16x32xf32>
    %cst_84 = arith.constant dense<0.000000e+00> : vector<16x32xf32>
    %168 = tpu.matmul %166, %136, %cst_84 {dimension_numbers = #tpu.dot_dimension_numbers<[1], [0], [0], [1], [0, 0, 1, 1], [], []>} : vector<16x32xf32>, vector<32x32xf32>, vector<16x32xf32> -> vector<16x32xf32>
    %169 = vector.broadcast %137 : vector<1x32xf32> to vector<16x32xf32>
    %170 = arith.addf %168, %169 : vector<16x32xf32>
    %cst_85 = arith.constant 0.353553385 : f32
    %171 = vector.broadcast %cst_85 : f32 to vector<16x32xf32>
    %172 = arith.mulf %170, %171 : vector<16x32xf32>
    %cst_86 = arith.constant dense<0.000000e+00> : vector<16x32xf32>
    %173 = tpu.matmul %167, %138, %cst_86 {dimension_numbers = #tpu.dot_dimension_numbers<[1], [0], [0], [1], [0, 0, 1, 1], [], []>} : vector<16x32xf32>, vector<32x32xf32>, vector<16x32xf32> -> vector<16x32xf32>
    %174 = vector.broadcast %139 : vector<1x32xf32> to vector<16x32xf32>
    %175 = arith.addf %173, %174 : vector<16x32xf32>
    %cst_87 = arith.constant dense<0.000000e+00> : vector<16x32xf32>
    %176 = tpu.matmul %167, %140, %cst_87 {dimension_numbers = #tpu.dot_dimension_numbers<[1], [0], [0], [1], [0, 0, 1, 1], [], []>} : vector<16x32xf32>, vector<32x32xf32>, vector<16x32xf32> -> vector<16x32xf32>
    %177 = vector.broadcast %141 : vector<1x32xf32> to vector<16x32xf32>
    %178 = arith.addf %176, %177 : vector<16x32xf32>
    %179 = vector.shape_cast %172 : vector<16x32xf32> to vector<2x8x32xf32>
    %180 = vector.shape_cast %175 : vector<16x32xf32> to vector<2x8x32xf32>
    %181 = vector.shape_cast %178 : vector<16x32xf32> to vector<2x8x32xf32>
    %182 = vector.broadcast %143 : vector<1x32xf32> to vector<16x32xf32>
    %183 = arith.addf %144, %182 : vector<16x32xf32>
    %184 = vector.extract_strided_slice %179 {offsets = [0, 0, 0], sizes = [2, 8, 8], strides = [1, 1, 1]} : vector<2x8x32xf32> to vector<2x8x8xf32>
    %185 = vector.extract_strided_slice %180 {offsets = [0, 0, 0], sizes = [2, 8, 8], strides = [1, 1, 1]} : vector<2x8x32xf32> to vector<2x8x8xf32>
    %186 = vector.extract_strided_slice %181 {offsets = [0, 0, 0], sizes = [2, 8, 8], strides = [1, 1, 1]} : vector<2x8x32xf32> to vector<2x8x8xf32>
    "tpu.trace_start"() <{level = 10 : i32, message = "bqd,bkd->bqk"}> : () -> ()
    %cst_88 = arith.constant dense<0.000000e+00> : vector<2x8x8xf32>
    %187 = tpu.matmul %184, %185, %cst_88 {dimension_numbers = #tpu.dot_dimension_numbers<[2], [2], [1], [1], [0, 0, 0, 1, 1, 1], [0], [0]>} : vector<2x8x8xf32>, vector<2x8x8xf32>, vector<2x8x8xf32> -> vector<2x8x8xf32>
    "tpu.trace_stop"() : () -> ()
    %188 = arith.addf %187, %133 : vector<2x8x8xf32>
    %cst_89 = arith.constant dense<0xFF800000> : vector<2x8xf32>
    %189 = vector.multi_reduction <maximumf>, %188, %cst_89 [2] : vector<2x8x8xf32> to vector<2x8xf32>
    %190 = vector.shape_cast %189 : vector<2x8xf32> to vector<2x8x1xf32>
    %191 = vector.broadcast %190 : vector<2x8x1xf32> to vector<2x8x8xf32>
    %192 = arith.subf %188, %191 : vector<2x8x8xf32>
    %193 = math.exp %192 : vector<2x8x8xf32>
    %cst_90 = arith.constant dense<0.000000e+00> : vector<2x8xf32>
    %194 = vector.multi_reduction <add>, %193, %cst_90 [2] : vector<2x8x8xf32> to vector<2x8xf32>
    %195 = vector.shape_cast %194 : vector<2x8xf32> to vector<2x8x1xf32>
    %196 = tpu.reciprocal %195 {approx = true} : vector<2x8x1xf32> -> vector<2x8x1xf32>
    %197 = vector.broadcast %196 : vector<2x8x1xf32> to vector<2x8x8xf32>
    %198 = arith.mulf %193, %197 : vector<2x8x8xf32>
    "tpu.trace_start"() <{level = 10 : i32, message = "bqk,bkd->bqd"}> : () -> ()
    %cst_91 = arith.constant dense<0.000000e+00> : vector<2x8x8xf32>
    %199 = tpu.matmul %198, %186, %cst_91 {dimension_numbers = #tpu.dot_dimension_numbers<[2], [1], [1], [2], [0, 0, 0, 1, 1, 2], [0], [0]>} : vector<2x8x8xf32>, vector<2x8x8xf32>, vector<2x8x8xf32> -> vector<2x8x8xf32>
    "tpu.trace_stop"() : () -> ()
    %200 = vector.shape_cast %199 : vector<2x8x8xf32> to vector<16x8xf32>
    %201 = vector.extract_strided_slice %142 {offsets = [0, 0], sizes = [8, 32], strides = [1, 1]} : vector<32x32xf32> to vector<8x32xf32>
    %cst_92 = arith.constant dense<0.000000e+00> : vector<16x32xf32>
    %202 = tpu.matmul %200, %201, %cst_92 {dimension_numbers = #tpu.dot_dimension_numbers<[1], [0], [0], [1], [0, 0, 1, 1], [], []>} : vector<16x8xf32>, vector<8x32xf32>, vector<16x32xf32> -> vector<16x32xf32>
    %203 = arith.addf %183, %202 : vector<16x32xf32>
    %204 = vector.extract_strided_slice %179 {offsets = [0, 0, 8], sizes = [2, 8, 8], strides = [1, 1, 1]} : vector<2x8x32xf32> to vector<2x8x8xf32>
    %205 = vector.extract_strided_slice %180 {offsets = [0, 0, 8], sizes = [2, 8, 8], strides = [1, 1, 1]} : vector<2x8x32xf32> to vector<2x8x8xf32>
    %206 = vector.extract_strided_slice %181 {offsets = [0, 0, 8], sizes = [2, 8, 8], strides = [1, 1, 1]} : vector<2x8x32xf32> to vector<2x8x8xf32>
    "tpu.trace_start"() <{level = 10 : i32, message = "bqd,bkd->bqk"}> : () -> ()
    %cst_93 = arith.constant dense<0.000000e+00> : vector<2x8x8xf32>
    %207 = tpu.matmul %204, %205, %cst_93 {dimension_numbers = #tpu.dot_dimension_numbers<[2], [2], [1], [1], [0, 0, 0, 1, 1, 1], [0], [0]>} : vector<2x8x8xf32>, vector<2x8x8xf32>, vector<2x8x8xf32> -> vector<2x8x8xf32>
    "tpu.trace_stop"() : () -> ()
    %208 = arith.addf %207, %133 : vector<2x8x8xf32>
    %cst_94 = arith.constant dense<0xFF800000> : vector<2x8xf32>
    %209 = vector.multi_reduction <maximumf>, %208, %cst_94 [2] : vector<2x8x8xf32> to vector<2x8xf32>
    %210 = vector.shape_cast %209 : vector<2x8xf32> to vector<2x8x1xf32>
    %211 = vector.broadcast %210 : vector<2x8x1xf32> to vector<2x8x8xf32>
    %212 = arith.subf %208, %211 : vector<2x8x8xf32>
    %213 = math.exp %212 : vector<2x8x8xf32>
    %cst_95 = arith.constant dense<0.000000e+00> : vector<2x8xf32>
    %214 = vector.multi_reduction <add>, %213, %cst_95 [2] : vector<2x8x8xf32> to vector<2x8xf32>
    %215 = vector.shape_cast %214 : vector<2x8xf32> to vector<2x8x1xf32>
    %216 = tpu.reciprocal %215 {approx = true} : vector<2x8x1xf32> -> vector<2x8x1xf32>
    %217 = vector.broadcast %216 : vector<2x8x1xf32> to vector<2x8x8xf32>
    %218 = arith.mulf %213, %217 : vector<2x8x8xf32>
    "tpu.trace_start"() <{level = 10 : i32, message = "bqk,bkd->bqd"}> : () -> ()
    %cst_96 = arith.constant dense<0.000000e+00> : vector<2x8x8xf32>
    %219 = tpu.matmul %218, %206, %cst_96 {dimension_numbers = #tpu.dot_dimension_numbers<[2], [1], [1], [2], [0, 0, 0, 1, 1, 2], [0], [0]>} : vector<2x8x8xf32>, vector<2x8x8xf32>, vector<2x8x8xf32> -> vector<2x8x8xf32>
    "tpu.trace_stop"() : () -> ()
    %220 = vector.shape_cast %219 : vector<2x8x8xf32> to vector<16x8xf32>
    %221 = vector.extract_strided_slice %142 {offsets = [8, 0], sizes = [8, 32], strides = [1, 1]} : vector<32x32xf32> to vector<8x32xf32>
    %cst_97 = arith.constant dense<0.000000e+00> : vector<16x32xf32>
    %222 = tpu.matmul %220, %221, %cst_97 {dimension_numbers = #tpu.dot_dimension_numbers<[1], [0], [0], [1], [0, 0, 1, 1], [], []>} : vector<16x8xf32>, vector<8x32xf32>, vector<16x32xf32> -> vector<16x32xf32>
    %223 = arith.addf %203, %222 : vector<16x32xf32>
    %224 = vector.extract_strided_slice %179 {offsets = [0, 0, 16], sizes = [2, 8, 8], strides = [1, 1, 1]} : vector<2x8x32xf32> to vector<2x8x8xf32>
    %225 = vector.extract_strided_slice %180 {offsets = [0, 0, 16], sizes = [2, 8, 8], strides = [1, 1, 1]} : vector<2x8x32xf32> to vector<2x8x8xf32>
    %226 = vector.extract_strided_slice %181 {offsets = [0, 0, 16], sizes = [2, 8, 8], strides = [1, 1, 1]} : vector<2x8x32xf32> to vector<2x8x8xf32>
    "tpu.trace_start"() <{level = 10 : i32, message = "bqd,bkd->bqk"}> : () -> ()
    %cst_98 = arith.constant dense<0.000000e+00> : vector<2x8x8xf32>
    %227 = tpu.matmul %224, %225, %cst_98 {dimension_numbers = #tpu.dot_dimension_numbers<[2], [2], [1], [1], [0, 0, 0, 1, 1, 1], [0], [0]>} : vector<2x8x8xf32>, vector<2x8x8xf32>, vector<2x8x8xf32> -> vector<2x8x8xf32>
    "tpu.trace_stop"() : () -> ()
    %228 = arith.addf %227, %133 : vector<2x8x8xf32>
    %cst_99 = arith.constant dense<0xFF800000> : vector<2x8xf32>
    %229 = vector.multi_reduction <maximumf>, %228, %cst_99 [2] : vector<2x8x8xf32> to vector<2x8xf32>
    %230 = vector.shape_cast %229 : vector<2x8xf32> to vector<2x8x1xf32>
    %231 = vector.broadcast %230 : vector<2x8x1xf32> to vector<2x8x8xf32>
    %232 = arith.subf %228, %231 : vector<2x8x8xf32>
    %233 = math.exp %232 : vector<2x8x8xf32>
    %cst_100 = arith.constant dense<0.000000e+00> : vector<2x8xf32>
    %234 = vector.multi_reduction <add>, %233, %cst_100 [2] : vector<2x8x8xf32> to vector<2x8xf32>
    %235 = vector.shape_cast %234 : vector<2x8xf32> to vector<2x8x1xf32>
    %236 = tpu.reciprocal %235 {approx = true} : vector<2x8x1xf32> -> vector<2x8x1xf32>
    %237 = vector.broadcast %236 : vector<2x8x1xf32> to vector<2x8x8xf32>
    %238 = arith.mulf %233, %237 : vector<2x8x8xf32>
    "tpu.trace_start"() <{level = 10 : i32, message = "bqk,bkd->bqd"}> : () -> ()
    %cst_101 = arith.constant dense<0.000000e+00> : vector<2x8x8xf32>
    %239 = tpu.matmul %238, %226, %cst_101 {dimension_numbers = #tpu.dot_dimension_numbers<[2], [1], [1], [2], [0, 0, 0, 1, 1, 2], [0], [0]>} : vector<2x8x8xf32>, vector<2x8x8xf32>, vector<2x8x8xf32> -> vector<2x8x8xf32>
    "tpu.trace_stop"() : () -> ()
    %240 = vector.shape_cast %239 : vector<2x8x8xf32> to vector<16x8xf32>
    %241 = vector.extract_strided_slice %142 {offsets = [16, 0], sizes = [8, 32], strides = [1, 1]} : vector<32x32xf32> to vector<8x32xf32>
    %cst_102 = arith.constant dense<0.000000e+00> : vector<16x32xf32>
    %242 = tpu.matmul %240, %241, %cst_102 {dimension_numbers = #tpu.dot_dimension_numbers<[1], [0], [0], [1], [0, 0, 1, 1], [], []>} : vector<16x8xf32>, vector<8x32xf32>, vector<16x32xf32> -> vector<16x32xf32>
    %243 = arith.addf %223, %242 : vector<16x32xf32>
    %244 = vector.extract_strided_slice %179 {offsets = [0, 0, 24], sizes = [2, 8, 8], strides = [1, 1, 1]} : vector<2x8x32xf32> to vector<2x8x8xf32>
    %245 = vector.extract_strided_slice %180 {offsets = [0, 0, 24], sizes = [2, 8, 8], strides = [1, 1, 1]} : vector<2x8x32xf32> to vector<2x8x8xf32>
    %246 = vector.extract_strided_slice %181 {offsets = [0, 0, 24], sizes = [2, 8, 8], strides = [1, 1, 1]} : vector<2x8x32xf32> to vector<2x8x8xf32>
    "tpu.trace_start"() <{level = 10 : i32, message = "bqd,bkd->bqk"}> : () -> ()
    %cst_103 = arith.constant dense<0.000000e+00> : vector<2x8x8xf32>
    %247 = tpu.matmul %244, %245, %cst_103 {dimension_numbers = #tpu.dot_dimension_numbers<[2], [2], [1], [1], [0, 0, 0, 1, 1, 1], [0], [0]>} : vector<2x8x8xf32>, vector<2x8x8xf32>, vector<2x8x8xf32> -> vector<2x8x8xf32>
    "tpu.trace_stop"() : () -> ()
    %248 = arith.addf %247, %133 : vector<2x8x8xf32>
    %cst_104 = arith.constant dense<0xFF800000> : vector<2x8xf32>
    %249 = vector.multi_reduction <maximumf>, %248, %cst_104 [2] : vector<2x8x8xf32> to vector<2x8xf32>
    %250 = vector.shape_cast %249 : vector<2x8xf32> to vector<2x8x1xf32>
    %251 = vector.broadcast %250 : vector<2x8x1xf32> to vector<2x8x8xf32>
    %252 = arith.subf %248, %251 : vector<2x8x8xf32>
    %253 = math.exp %252 : vector<2x8x8xf32>
    %cst_105 = arith.constant dense<0.000000e+00> : vector<2x8xf32>
    %254 = vector.multi_reduction <add>, %253, %cst_105 [2] : vector<2x8x8xf32> to vector<2x8xf32>
    %255 = vector.shape_cast %254 : vector<2x8xf32> to vector<2x8x1xf32>
    %256 = tpu.reciprocal %255 {approx = true} : vector<2x8x1xf32> -> vector<2x8x1xf32>
    %257 = vector.broadcast %256 : vector<2x8x1xf32> to vector<2x8x8xf32>
    %258 = arith.mulf %253, %257 : vector<2x8x8xf32>
    "tpu.trace_start"() <{level = 10 : i32, message = "bqk,bkd->bqd"}> : () -> ()
    %cst_106 = arith.constant dense<0.000000e+00> : vector<2x8x8xf32>
    %259 = tpu.matmul %258, %246, %cst_106 {dimension_numbers = #tpu.dot_dimension_numbers<[2], [1], [1], [2], [0, 0, 0, 1, 1, 2], [0], [0]>} : vector<2x8x8xf32>, vector<2x8x8xf32>, vector<2x8x8xf32> -> vector<2x8x8xf32>
    "tpu.trace_stop"() : () -> ()
    %260 = vector.shape_cast %259 : vector<2x8x8xf32> to vector<16x8xf32>
    %261 = vector.extract_strided_slice %142 {offsets = [24, 0], sizes = [8, 32], strides = [1, 1]} : vector<32x32xf32> to vector<8x32xf32>
    %cst_107 = arith.constant dense<0.000000e+00> : vector<16x32xf32>
    %262 = tpu.matmul %260, %261, %cst_107 {dimension_numbers = #tpu.dot_dimension_numbers<[1], [0], [0], [1], [0, 0, 1, 1], [], []>} : vector<16x8xf32>, vector<8x32xf32>, vector<16x32xf32> -> vector<16x32xf32>
    %263 = arith.addf %243, %262 : vector<16x32xf32>
    %264 = vector.shape_cast %263 : vector<16x32xf32> to vector<2x8x32xf32>
    %265 = vector.shape_cast %264 : vector<2x8x32xf32> to vector<16x32xf32>
    %c0_108 = arith.constant 0 : index
    %c0_109 = arith.constant 0 : index
    %266 = vector.load %arg24[%c0_108, %c0_109] : memref<1x32xf32, #tpu.memory_space<vmem>>, vector<1x32xf32>
    %c0_110 = arith.constant 0 : index
    %c0_111 = arith.constant 0 : index
    %267 = vector.load %arg25[%c0_110, %c0_111] : memref<1x32xf32, #tpu.memory_space<vmem>>, vector<1x32xf32>
    %cst_112 = arith.constant dense<0.000000e+00> : vector<16xf32>
    %268 = vector.multi_reduction <add>, %265, %cst_112 [1] : vector<16x32xf32> to vector<16xf32>
    %269 = vector.shape_cast %268 : vector<16xf32> to vector<16x1xf32>
    %cst_113 = arith.constant 3.200000e+01 : f32
    %270 = vector.broadcast %cst_113 : f32 to vector<16x1xf32>
    %271 = arith.divf %269, %270 : vector<16x1xf32>
    %272 = vector.broadcast %271 : vector<16x1xf32> to vector<16x32xf32>
    %273 = arith.subf %265, %272 : vector<16x32xf32>
    %274 = arith.mulf %273, %273 : vector<16x32xf32>
    %cst_114 = arith.constant dense<0.000000e+00> : vector<16xf32>
    %275 = vector.multi_reduction <add>, %274, %cst_114 [1] : vector<16x32xf32> to vector<16xf32>
    %276 = vector.shape_cast %275 : vector<16xf32> to vector<16x1xf32>
    %cst_115 = arith.constant 3.200000e+01 : f32
    %277 = vector.broadcast %cst_115 : f32 to vector<16x1xf32>
    %278 = arith.divf %276, %277 : vector<16x1xf32>
    %279 = vector.broadcast %271 : vector<16x1xf32> to vector<16x32xf32>
    %280 = arith.subf %265, %279 : vector<16x32xf32>
    %cst_116 = arith.constant 9.99999974E-6 : f32
    %281 = vector.broadcast %cst_116 : f32 to vector<16x1xf32>
    %282 = arith.addf %278, %281 : vector<16x1xf32>
    %283 = math.rsqrt %282 : vector<16x1xf32>
    %284 = vector.broadcast %283 : vector<16x1xf32> to vector<16x32xf32>
    %285 = arith.mulf %280, %284 : vector<16x32xf32>
    %286 = vector.broadcast %266 : vector<1x32xf32> to vector<16x32xf32>
    %287 = arith.mulf %285, %286 : vector<16x32xf32>
    %288 = vector.broadcast %267 : vector<1x32xf32> to vector<16x32xf32>
    %289 = arith.addf %287, %288 : vector<16x32xf32>
    %c0_117 = arith.constant 0 : index
    %c0_118 = arith.constant 0 : index
    %290 = vector.load %arg26[%c0_117, %c0_118] : memref<32x64xf32, #tpu.memory_space<vmem>>, vector<32x64xf32>
    %cst_119 = arith.constant dense<0.000000e+00> : vector<16x64xf32>
    %291 = tpu.matmul %289, %290, %cst_119 {dimension_numbers = #tpu.dot_dimension_numbers<[1], [0], [0], [1], [0, 0, 1, 1], [], []>} : vector<16x32xf32>, vector<32x64xf32>, vector<16x64xf32> -> vector<16x64xf32>
    %c0_120 = arith.constant 0 : index
    %c0_121 = arith.constant 0 : index
    %292 = vector.load %arg27[%c0_120, %c0_121] : memref<1x64xf32, #tpu.memory_space<vmem>>, vector<1x64xf32>
    %293 = vector.broadcast %292 : vector<1x64xf32> to vector<16x64xf32>
    %294 = arith.addf %291, %293 : vector<16x64xf32>
    %cst_122 = arith.constant 0.000000e+00 : f32
    %295 = vector.broadcast %cst_122 : f32 to vector<16x64xf32>
    %296 = arith.maximumf %294, %295 : vector<16x64xf32>
    %c0_123 = arith.constant 0 : index
    %c0_124 = arith.constant 0 : index
    %297 = vector.load %arg28[%c0_123, %c0_124] : memref<64x32xf32, #tpu.memory_space<vmem>>, vector<64x32xf32>
    %cst_125 = arith.constant dense<0.000000e+00> : vector<16x32xf32>
    %298 = tpu.matmul %296, %297, %cst_125 {dimension_numbers = #tpu.dot_dimension_numbers<[1], [0], [0], [1], [0, 0, 1, 1], [], []>} : vector<16x64xf32>, vector<64x32xf32>, vector<16x32xf32> -> vector<16x32xf32>
    %c0_126 = arith.constant 0 : index
    %c0_127 = arith.constant 0 : index
    %299 = vector.load %arg29[%c0_126, %c0_127] : memref<1x32xf32, #tpu.memory_space<vmem>>, vector<1x32xf32>
    %300 = vector.broadcast %299 : vector<1x32xf32> to vector<16x32xf32>
    %301 = arith.addf %298, %300 : vector<16x32xf32>
    %302 = arith.addf %301, %265 : vector<16x32xf32>
    %303 = vector.shape_cast %302 : vector<16x32xf32> to vector<2x8x32xf32>
    %c0_128 = arith.constant 0 : index
    %c0_129 = arith.constant 0 : index
    %c0_130 = arith.constant 0 : index
    %304 = vector.load %arg30[%c0_128, %c0_129, %c0_130] : memref<2x8x32xf32, #tpu.memory_space<vmem>>, vector<2x8x32xf32>
    tpu.vector_store %arg30[%c0_128, %c0_129, %c0_130], %303 {strides = array<i32>} : memref<2x8x32xf32, #tpu.memory_space<vmem>>, vector<2x8x32xf32>,
    return
  }
}

</mosaic_0001>

<bundles_post_ra>
// kernel: _lambda_.5
= control target key start
LH: loop header
LB: loop body
LE: loop exit
PB: predicated region body
PF: predicated region fallthrough
CT: control target
= control target key end

     0   :  { %vm24_vm0 = vcmask 261120   ;;  %s269_s0 = inlined_call_operand.vmem [shape: f32[16,32], index: 0, kind: input, shape index: {}]   ;;  %s270_s3 = inlined_call_operand.vmem [shape: f32[32,128], index: 3, kind: input, shape index: {}]   ;;  %s271_s1 = inlined_call_operand.vmem [shape: f32[1,32], index: 1, kind: input, shape index: {}]   ;;  %s272_s2 = inlined_call_operand.vmem [shape: f32[1,32], index: 2, kind: input, shape index: {}]   ;;  %s273_s4 = inlined_call_operand.vmem [shape: f32[1,128], index: 4, kind: input, shape index: {}]   ;;  %s274_s5 = inlined_call_operand.vmem [shape: f32[16,128], index: 5, kind: output, shape index: {}]  }
   0x1   :  { %v20_v0 = vld [vmem:[%s269_s0] sm:$0xff]  ;;  %v21_v1 = vld [vmem:[%s269_s0 + $0x8] sm:$0xff]  ;;  %v70_v16 = vld [vmem:[%s270_s3 + $0x10] sm:$0xff] }
   0x2   :  { %v25_v2 = vsel %vm24_vm0, %v20_v0, 0.0  ;;  %v28_v3 = vsel %vm24_vm0, %v21_v1, 0.0  ;;  %v68_v14 = vld [vmem:[%s270_s3] sm:$0xff]  ;;  %v69_v15 = vld [vmem:[%s270_s3 + $0x8] sm:$0xff]  ;;  %v71_v18 = vld [vmem:[%s270_s3 + $0x18] sm:$0xff] }
   0x3   :  { %26 = vadd.xlane.f32.xlu0 %v25_v2  ;;  %v188_v17 = vpack.c.bf16 %v69_v15, %v68_v14  ;;  %v192_v19 = vpack.c.bf16 %v71_v18, %v70_v16  ;;  %v166_v27 = vld [vmem:[%s271_s1] ss:$0 sm:$0xff] }
   0x4   :  { %v167_v29 = vld [vmem:[%s272_s2] ss:$0 sm:$0xff] }
   0x5   :  { %189 = vmatprep.subr.bf16.mxu0 %v188_v17  ;;  %v168_v36 = vld [vmem:[%s273_s4] ss:$0 sm:$0xff] }
   0x6   :  { %191 = vmatpush3.bf16.msra.mxu0 %v188_v17 }
   0x7   :  { %29 = vadd.xlane.f32.xlu0 %v28_v3  ;;  %193 = vmatprep.subr.bf16.mxu0 %v192_v19 }
   0xa   :  { %195 = vmatpush3.bf16.msra.mxu0 %v192_v19 }
  0x90   :  { %v27_v4 = vpop.xlane.xlu0 %26 }
  0x91   :  { %v32_v5 = vmul.f32 0.03125, %v27_v4 }
  0x93   :  { %v34_v6 = vsub.f32 %v20_v0, %v32_v5 }
  0x94   :  { %v30_v7 = vpop.xlane.xlu0 %29 }
  0x95   :  { %v33_v8 = vmul.f32 0.03125, %v30_v7  ;;  %v36_v9 = vmul.f32 %v34_v6, %v34_v6 }
  0x97   :  { %v35_v10 = vsub.f32 %v21_v1, %v33_v8  ;;  %v38_v11 = vsel %vm24_vm0, %v36_v9, 0.0 }
  0x98   :  { %39 = vadd.xlane.f32.xlu1 %v38_v11 }
  0x99   :  { %v37_v12 = vmul.f32 %v35_v10, %v35_v10 }
  0x9b   :  { %v41_v13 = vsel %vm24_vm0, %v37_v12, 0.0 }
  0x9c   :  { %42 = vadd.xlane.f32.xlu1 %v41_v13 }
 0x125   :  { %v40_v20 = vpop.xlane.xlu1 %39 }
 0x126   :  { %v44_v21 = vmul.f32 0.03125, %v40_v20 }
 0x128   :  { %v46_v22 = vadd.f32 1e-05, %v44_v21 }
 0x129   :  { %v43_v23 = vpop.xlane.xlu1 %42 }
 0x12a   :  { %196 = vrsqrt.f32 %v46_v22  ;;  %v45_v24 = vmul.f32 0.03125, %v43_v23 }
 0x12c   :  { %v47_v25 = vadd.f32 1e-05, %v45_v24 }
 0x12e   :  { %198 = vrsqrt.f32 %v47_v25 }
 0x134   :  { %v197_v26 = vpop.eup %196 }
 0x135   :  { %v50_v28 = vmul.f32 %v197_v26, %v34_v6 }
 0x137   :  { %v58_v30 = vmul.f32 %v166_v27, %v50_v28 }
 0x138   :  { %v199_v31 = vpop.eup %198 }
 0x139   :  { %v51_v32 = vmul.f32 %v199_v31, %v35_v10  ;;  %v66_v33 = vadd.f32 %v167_v29, %v58_v30 }
 0x13b   :  { %v59_v34 = vmul.f32 %v166_v27, %v51_v32  ;;  %185 = vmatprep.mubr.msk.f32.mxu0 %vm24_vm0, %v66_v33 }
 0x13d   :  { %v67_v35 = vadd.f32 %v167_v29, %v59_v34 }
 0x13f   :  { %186 = vmatmul.mubr.msk.f32.vlgmr.msra.gmra.mrb[0].mxu0 %vm24_vm0, %v67_v35 }
 0x212   :  { %v187_v37 = vpop.f32.mrb[0].mxu0 }
 0x213   :  { %v157_v38 = vadd.f32 %v187_v37, %v168_v36  ;;  %v151_v39 = vpop.f32.mrb[1].mxu0 }
 0x214   :  { %v152_v40 = vadd.f32 %v168_v36, %v151_v39 }
 0x215   :  { %161 = vst [vmem:[%s274_s5 + $0x8] sm:$0xff] %v157_v38 }
 0x216   :  { %160 = vst [vmem:[%s274_s5] sm:$0xff] %v152_v40 }

// kernel: _lambda_.3
= control target key start
LH: loop header
LB: loop body
LE: loop exit
PB: predicated region body
PF: predicated region fallthrough
CT: control target
= control target key end

     0   :  { %vm154_vm0 = vcmask 261120   ;;  %s5081_s6 = smov 6   ;;  %s5082_s10 = smov 10   ;;  %v5086_v48 = vmov 0.0   ;;  %vm5087_vm1 = vmmov 0   ;;  %vm457_vm2 = vcmask 64512   ;;  %s5624_s0 = inlined_call_operand.smem [shape: u32[31], index: -1, kind: input, shape index: {}] }
   0x1   :  { %s1_s5 = sld [smem:[%s5624_s0]]   ;;  %s5083_s14 = smov 8   ;;  %vm4230_vm3 = vcmask 523264  }
   0x2   :  { %s4325_s9 = sld [smem:[%s5624_s0 + %s5081_s6]]   ;;  %s5084_s18 = smov 4  }
   0x3   :  { %s4329_s13 = sld [smem:[%s5624_s0 + %s5082_s10]]   ;;  %s5085_s22 = smov 5  }
   0x4   :  { %s5145_s17 = sld [smem:[%s5624_s0 + %s5083_s14]]   ;;  %s5088_s26 = smov 11  }
   0x5   :  { %s4323_s21 = sld [smem:[%s5624_s0 + %s5084_s18]]   ;;  %s5089_s30 = smov 7  }
   0x6   :  { %s4324_s25 = sld [smem:[%s5624_s0 + %s5085_s22]]   ;;  %s5090_s4 = smov 9  }
   0x7   :  { %v5124_v0 = vld [vmem:[%s1_s5] sm:$0xff]  ;;  %v5126_v1 = vld [vmem:[%s1_s5 + $0x8] sm:$0xff]  ;;  %s4330_s29 = sld [smem:[%s5624_s0 + %s5088_s26]]   ;;  %s5091_s8 = smov 2  }
   0x8   :  { %v155_v2 = vsel %vm154_vm0, %v5124_v0, 0.0  ;;  %v158_v3 = vsel %vm154_vm0, %v5126_v1, 0.0  ;;  %v134_v14 = vld [vmem:[%s4325_s9] sm:$0xff]  ;;  %v135_v15 = vld [vmem:[%s4325_s9 + $0x8] sm:$0xff]  ;;  %v136_v16 = vld [vmem:[%s4325_s9 + $0x10] sm:$0xff]  ;;  %s4326_s3 = sld [smem:[%s5624_s0 + %s5089_s30]]   ;;  %s5092_s12 = smov 120  }
   0x9   :  { %156 = vadd.xlane.f32.xlu0 %v155_v2  ;;  %v4882_v17 = vpack.c.bf16 %v135_v15, %v134_v14  ;;  %v144_v18 = vld [vmem:[%s4329_s13] sm:$0xff]  ;;  %v145_v19 = vld [vmem:[%s4329_s13 + $0x8] sm:$0xff]  ;;  %v137_v20 = vld [vmem:[%s4325_s9 + $0x18] sm:$0xff]  ;;  %s4328_s7 = sld [smem:[%s5624_s0 + %s5090_s4]]   ;;  %s5094_s14 = smov 12  }
   0xa   :  { %v4898_v21 = vpack.c.bf16 %v145_v19, %v144_v18  ;;  %v4886_v22 = vpack.c.bf16 %v137_v20, %v136_v16  ;;  %v146_v23 = vld [vmem:[%s4329_s13 + $0x10] sm:$0xff]  ;;  %v147_v24 = vld [vmem:[%s4329_s13 + $0x18] sm:$0xff]  ;;  %v139_v26 = vld [vmem:[%s5145_s17] sm:$0xff]  ;;  %s4321_s11 = sld [smem:[%s5624_s0 + %s5091_s8]]   ;;  %s5093_s13 = smov 112  }
   0xb   :  { %4883 = vmatprep.subr.bf16.mxu1 %v4882_v17  ;;  %v4902_v25 = vpack.c.bf16 %v147_v24, %v146_v23  ;;  %v140_v27 = vld [vmem:[%s5145_s17 + $0x8] sm:$0xff]  ;;  %v4350_v36 = vld [vmem:[%s4323_s21] ss:$0 sm:$0xff]  ;;  %v141_v43 = vld [vmem:[%s5145_s17 + $0x10] sm:$0xff]  ;;  %s5095_s18 = smov 104   ;;  %s5096_s19 = smov 13  }
   0xc   :  { %4885 = vmatpush3.bf16.msra.mxu1 %v4882_v17  ;;  %4899 = vmatprep.subr.bf16.mxu0 %v4898_v21  ;;  %v4890_v28 = vpack.c.bf16 %v140_v27, %v139_v26  ;;  %v4351_v38 = vld [vmem:[%s4324_s25] ss:$0 sm:$0xff]  ;;  %v142_v44 = vld [vmem:[%s5145_s17 + $0x18] sm:$0xff]  ;;  %s5233_s17 = sld [smem:[%s5624_s0 + %s5094_s14]]   ;;  %s5097_s23 = smov 18  }
   0xd   :  { %159 = vadd.xlane.f32.xlu0 %v158_v3  ;;  %4901 = vmatpush3.bf16.msra.mxu0 %v4898_v21  ;;  %v4894_v47 = vpack.c.bf16 %v142_v44, %v141_v43  ;;  %v4358_v49 = vld [vmem:[%s4330_s29] ss:$0 sm:$0xff]  ;;  %s4332_s22 = sld [smem:[%s5624_s0 + %s5096_s19]]   ;;  %s5098_s27 = smov 16  }
   0xe   :  { %4887 = vmatprep.subr.bf16.mxu1 %v4886_v22  ;;  %4903 = vmatprep.subr.bf16.mxu0 %v4902_v25  ;;  %v4352_v55 = vld [vmem:[%s4326_s3] ss:$0 sm:$0xff]  ;;  %s4337_s26 = sld [smem:[%s5624_s0 + %s5097_s23]]   ;;  %s5099_s1 = smov 1  }
   0xf   :  { %v4355_v56 = vld [vmem:[%s4328_s7] ss:$0 sm:$0xff]  ;;  %s4335_s30 = sld [smem:[%s5624_s0 + %s5098_s27]]   ;;  %s5100_s5 = smov 20  }
  0x10   :  { %4889 = vmatpush3.bf16.msra.mxu1 %v4886_v22  ;;  %s4320_s4 = sld [smem:[%s5624_s0 + %s5099_s1]]   ;;  %s5101_s9 = smov 14  }
  0x11   :  { %4905 = vmatpush3.bf16.msra.mxu0 %v4902_v25  ;;  %4891 = vmatprep.subr.bf16.mxu1 %v4890_v28  ;;  %s4339_s8 = sld [smem:[%s5624_s0 + %s5100_s5]]   ;;  %s5102_s15 = smov 15  }
  0x12   :  { %4629 = vmatprep.subr.mxu0 %v5086_v48  ;;  %v149_v24 = vld [vmem:[%s5233_s17] sm:$0xff]  ;;  %s4333_s14 = sld [smem:[%s5624_s0 + %s5101_s9]]   ;;  %s5103_s20 = smov 19  }
  0x13   :  { %s4334_s19 = sld [smem:[%s5624_s0 + %s5102_s15]]   ;;  %s5104_s24 = smov 17  }
  0x14   :  { %s4338_s23 = sld [smem:[%s5624_s0 + %s5103_s20]]   ;;  %s5105_s28 = smov 21  }
  0x15   :  { %s4336_s27 = sld [smem:[%s5624_s0 + %s5104_s24]]   ;;  %s5106_s2 = smov 3  }
  0x16   :  { %s4340_s1 = sld [smem:[%s5624_s0 + %s5105_s28]]   ;;  %s5107_s6 = smov 22  }
  0x17   :  { %s4322_s5 = sld [smem:[%s5624_s0 + %s5106_s2]]  }
  0x18   :  { %s5457_s9 = sld [smem:[%s5624_s0 + %s5107_s6]]  }
  0x96   :  { %v157_v4 = vpop.xlane.xlu0 %156 }
  0x97   :  { %v162_v5 = vmul.f32 0.03125, %v157_v4  ;;  %v5210_v4 = vld [vmem:[%s4321_s11] sm:$0xff] }
  0x99   :  { %v164_v6 = vsub.f32 %v5124_v0, %v162_v5 }
  0x9a   :  { %v160_v7 = vpop.xlane.xlu0 %159 }
  0x9b   :  { %v163_v8 = vmul.f32 0.03125, %v160_v7  ;;  %v166_v9 = vmul.f32 %v164_v6, %v164_v6 }
  0x9d   :  { %v165_v10 = vsub.f32 %v5126_v1, %v163_v8  ;;  %v168_v11 = vsel %vm154_vm0, %v166_v9, 0.0  ;;  %v5213_v8 = vld [vmem:[%s4321_s11 + $0x8] sm:$0xff]  ;;  %s5109_s11 = smov 26  }
  0x9e   :  { %169 = vadd.xlane.f32.xlu1 %v168_v11  ;;  %s4345_s16 = sld [smem:[%s5624_s0 + %s5109_s11]]  }
  0x9f   :  { %v167_v12 = vmul.f32 %v165_v10, %v165_v10 }
  0xa1   :  { %v171_v13 = vsel %vm154_vm0, %v167_v12, 0.0 }
  0xa2   :  { %172 = vadd.xlane.f32.xlu1 %v171_v13 }
 0x12b   :  { %v170_v29 = vpop.xlane.xlu1 %169 }
 0x12c   :  { %v174_v30 = vmul.f32 0.03125, %v170_v29 }
 0x12e   :  { %v176_v31 = vadd.f32 1e-05, %v174_v30 }
 0x12f   :  { %v173_v32 = vpop.xlane.xlu1 %172 }
 0x130   :  { %5005 = vrsqrt.f32 %v176_v31  ;;  %v175_v33 = vmul.f32 0.03125, %v173_v32 }
 0x132   :  { %v177_v34 = vadd.f32 1e-05, %v175_v33 }
 0x134   :  { %5007 = vrsqrt.f32 %v177_v34 }
 0x13a   :  { %v5006_v35 = vpop.eup %5005 }
 0x13b   :  { %v180_v37 = vmul.f32 %v5006_v35, %v164_v6 }
 0x13d   :  { %v188_v39 = vmul.f32 %v4350_v36, %v180_v37 }
 0x13e   :  { %v5008_v40 = vpop.eup %5007 }
 0x13f   :  { %v181_v41 = vmul.f32 %v5008_v40, %v165_v10  ;;  %v196_v42 = vadd.f32 %v4351_v38, %v188_v39 }
 0x141   :  { %v189_v45 = vmul.f32 %v4350_v36, %v181_v41  ;;  %4594 = vmatprep.mubr.msk.f32.mxu1 %vm154_vm0, %v196_v42  ;;  %4616 = vmatprep.mubr.msk.f32.mxu0 %vm154_vm0, %v196_v42 }
 0x143   :  { %v197_v46 = vadd.f32 %v4351_v38, %v189_v45 }
 0x145   :  { %4595 = vmatmul.mubr.msk.f32.vlgmr.msra.gmra.mrb[0].mxu1 %vm154_vm0, %v197_v46  ;;  %4617 = vmatmul.mubr.msk.f32.vlgmr.msra.gmra.mrb[0].mxu0 %vm154_vm0, %v197_v46 }
 0x146   :  { %4893 = vmatpush3.bf16.msra.mxu1 %v4890_v28  ;;  %4605 = vmatprep.mubr.msk.f32.mxu1 %vm154_vm0, %v196_v42 }
 0x147   :  { %4895 = vmatprep.subr.bf16.mxu1 %v4894_v47  ;;  %4631 = vmatprep.mubr.msk.f32.mxu0 %vm5087_vm1, %v5086_v48 }
 0x14a   :  { %4897 = vmatpush3.bf16.msra.mxu1 %v4894_v47 }
 0x14b   :  { %4619 = vmatprep.subr.mxu1 %v5086_v48 }
 0x14d   :  { %4606 = vmatmul.mubr.msk.f32.vlgmr.msra.gmra.mrb[2].mxu1 %vm154_vm0, %v197_v46 }
 0x14e   :  { %4621 = vmatprep.mubr.msk.f32.mxu1 %vm5087_vm1, %v5086_v48 }
 0x218   :  { %v4596_v50 = vpop.f32.mrb[0].mxu1  ;;  %v4618_v51 = vpop.f32.mrb[0].mxu0 }
 0x219   :  { %v276_v52 = vpop.f32.mrb[1].mxu1  ;;  %v440_v53 = vpop.f32.mrb[1].mxu0  ;;  %v282_v61 = vadd.f32 %v4596_v50, %v4352_v55  ;;  %v5199_v3 = vadd.f32 %v4618_v51, %v4358_v49 }
 0x21a   :  { %v5178_v54 = vadd.f32 %v4358_v49, %v440_v53  ;;  %v277_v58 = vadd.f32 %v4352_v55, %v276_v52 }
 0x21b   :  { %v5196_v2 = vmul.f32 0.35355338, %v282_v61 }
 0x21c   :  { %4630 = vmatpush3.msra.mxu0 %v5178_v54  ;;  %v5185_v62 = vmul.f32 0.35355338, %v277_v58 }
 0x21d   :  { %4639 = vmatprep.subr.mxu0 %v149_v24 }
 0x220   :  { %v4607_v57 = vpop.f32.mrb[2].mxu1 }
 0x221   :  { %v359_v59 = vpop.f32.mrb[3].mxu1  ;;  %v5188_v63 = vadd.f32 %v4607_v57, %v4355_v56 }
 0x222   :  { %v5181_v60 = vadd.f32 %v4355_v56, %v359_v59 }
 0x224   :  { %4620 = vmatpush3.xpose.msk.msra.mxu1 %vm457_vm2, %v5181_v60 }
 0x225   :  { %4624 = vmatprep.subr.mxu1 %v5086_v48 }
 0x227   :  { %4622 = vmatmul.mubr.msk.f32.vlgmr.msra.gmra.mrb[4].mxu1 %vm457_vm2, %v5185_v62 }
 0x228   :  { %4625 = vmatpush3.xpose.msk.msra.mxu1 %vm457_vm2, %v5188_v63  ;;  %4626 = vmatprep.mubr.msk.f32.mxu1 %vm5087_vm1, %v5086_v48 }
 0x229   :  { %4634 = vmatprep.subr.mxu1 %v5086_v48 }
 0x22b   :  { %4627 = vmatmul.mubr.msk.f32.vlgmr.msra.gmra.mrb[6].mxu1 %vm457_vm2, %v5196_v2 }
 0x22c   :  { %4635 = vmatpush3.msra.mxu1 %v5199_v3  ;;  %4636 = vmatprep.mubr.msk.f32.mxu1 %vm5087_vm1, %v5086_v48 }
 0x22d   :  { %4644 = vmatprep.subr.mxu1 %v5086_v48 }
 0x2fa   :  { %v530_v5 = vpop.f32.mrb[4].mxu1 }
 0x2fb   :  { %v531_v6 = vadd.f32 %v530_v5, %v5210_v4  ;;  %v4623_v7 = vpop.f32.mrb[5].mxu1 }
 0x2fd   :  { %v610_v9 = vsel %vm457_vm2, %v531_v6, -inf }
 0x2fe   :  { %611 = vmax.xlane.f32.xlu0 %v610_v9  ;;  %v606_v10 = vpop.f32.mrb[6].mxu1 }
 0x2ff   :  { %v607_v11 = vadd.f32 %v606_v10, %v5213_v8  ;;  %v4628_v12 = vpop.f32.mrb[7].mxu1 }
 0x301   :  { %v613_v13 = vsel %vm457_vm2, %v607_v11, -inf }
 0x302   :  { %614 = vmax.xlane.f32.xlu1 %v613_v13 }
 0x38b   :  { %v612_v14 = vpop.xlane.xlu0 %611 }
 0x38c   :  { %v616_v15 = vsub.f32 %v531_v6, %v612_v14 }
 0x38e   :  { %v618_v16 = vmul.f32 1.442695, %v616_v15 }
 0x38f   :  { %v615_v17 = vpop.xlane.xlu1 %614 }
 0x390   :  { %5009 = vpow2.f32 %v618_v16  ;;  %v617_v18 = vsub.f32 %v607_v11, %v615_v17 }
 0x392   :  { %v620_v19 = vmul.f32 1.442695, %v617_v18 }
 0x394   :  { %5011 = vpow2.f32 %v620_v19 }
 0x39a   :  { %v5010_v20 = vpop.eup %5009 }
 0x39b   :  { %v622_v21 = vsel %vm457_vm2, %v5010_v20, 0.0 }
 0x39c   :  { %623 = vadd.xlane.f32.xlu0 %v622_v21 }
 0x39e   :  { %v5012_v22 = vpop.eup %5011 }
 0x39f   :  { %v625_v23 = vsel %vm457_vm2, %v5012_v22, 0.0 }
 0x3a0   :  { %626 = vadd.xlane.f32.xlu1 %v625_v23 }
 0x3b1   :  { %861 = vrot.lane.b32.xlu1 %v5185_v62, %s5092_s12 }
 0x3b2   :  { %863 = vrot.lane.b32.xlu0 %v5181_v60, %s5092_s12 }
 0x3b5   :  { %941 = vrot.lane.b32.xlu1 %v5188_v63, %s5092_s12 }
 0x3b9   :  { %939 = vrot.lane.b32.xlu1 %v5196_v2, %s5092_s12 }
 0x3bd   :  { %1278 = vrot.lane.b32.xlu1 %v5181_v60, %s5093_s13 }
 0x429   :  { %v624_v25 = vpop.xlane.xlu0 %623 }
 0x42a   :  { %5013 = vrcp.f32 %v624_v25 }
 0x42d   :  { %v627_v26 = vpop.xlane.xlu1 %626  ;;  %v864_v31 = vpop.permute.xlu0 %863 }
 0x42e   :  { %5015 = vrcp.f32 %v627_v26 }
 0x431   :  { %v862_v32 = vpop.permute.xlu1 %861 }
 0x434   :  { %v5014_v27 = vpop.eup %5013 }
 0x435   :  { %v630_v28 = vmul.f32 %v5014_v27, %v5010_v20  ;;  %v942_v35 = vpop.permute.xlu1 %941 }
 0x437   :  { %4632 = vmatmul.mubr.msk.f32.vlgmr.msra.gmra.mrb[2].mxu0 %vm457_vm2, %v630_v28 }
 0x438   :  { %v5016_v29 = vpop.eup %5015  ;;  %4640 = vmatpush3.msra.mxu0 %v149_v24  ;;  %v150_v24 = vld [vmem:[%s5233_s17 + $0x8] sm:$0xff] }
 0x439   :  { %v631_v30 = vmul.f32 %v5016_v29, %v5012_v22  ;;  %4649 = vmatprep.subr.mxu0 %v5086_v48  ;;  %v940_v38 = vpop.permute.xlu1 %939 }
 0x43b   :  { %4637 = vmatmul.mubr.msk.f32.vlgmr.msra.gmra.mrb[8].mxu1 %vm457_vm2, %v631_v30 }
 0x43c   :  { %4645 = vmatpush3.xpose.msk.msra.mxu1 %vm457_vm2, %v864_v31  ;;  %4646 = vmatprep.mubr.msk.f32.mxu1 %vm5087_vm1, %v5086_v48 }
 0x43d   :  { %4654 = vmatprep.subr.mxu1 %v5086_v48  ;;  %v1279_v55 = vpop.permute.xlu1 %1278 }
 0x43f   :  { %4647 = vmatmul.mubr.msk.f32.vlgmr.msra.gmra.mrb[10].mxu1 %vm457_vm2, %v862_v32 }
 0x440   :  { %4656 = vmatprep.mubr.msk.f32.mxu1 %vm5087_vm1, %v5086_v48 }
 0x50a   :  { %v701_v33 = vpop.f32.mrb[2].mxu0 }
 0x50b   :  { %v4633_v34 = vpop.f32.mrb[3].mxu0  ;;  %4641 = vmatprep.mubr.msk.f32.mxu0 %vm457_vm2, %v701_v33 }
 0x50e   :  { %v774_v36 = vpop.f32.mrb[8].mxu1 }
 0x50f   :  { %v4638_v37 = vpop.f32.mrb[9].mxu1  ;;  %4642 = vmatmul.mubr.msk.f32.vlgmr.msra.gmra.mrb[4].mxu0 %vm457_vm2, %v774_v36 }
 0x510   :  { %4650 = vmatpush3.xpose.msk.msra.mxu0 %vm457_vm2, %v942_v35  ;;  %4651 = vmatprep.mubr.msk.f32.mxu0 %vm5087_vm1, %v5086_v48 }
 0x511   :  { %4659 = vmatprep.subr.mxu0 %v5086_v48 }
 0x512   :  { %v935_v39 = vpop.f32.mrb[10].mxu1 }
 0x513   :  { %v936_v40 = vadd.f32 %v935_v39, %v5210_v4  ;;  %v4648_v41 = vpop.f32.mrb[11].mxu1  ;;  %4652 = vmatmul.mubr.msk.f32.vlgmr.msra.gmra.mrb[6].mxu0 %vm457_vm2, %v940_v38  ;;  %v151_v39 = vld [vmem:[%s5233_s17 + $0x10] sm:$0xff] }
 0x514   :  { %4661 = vmatprep.mubr.msk.f32.mxu0 %vm5087_vm1, %v5086_v48 }
 0x515   :  { %v1017_v42 = vsel %vm457_vm2, %v936_v40, -inf }
 0x516   :  { %1018 = vmax.xlane.f32.xlu0 %v1017_v42 }
 0x52c   :  { %1040 = vrot.lane.b32.xlu0 %v5178_v54, %s5092_s12 }
 0x530   :  { %1276 = vrot.lane.b32.xlu0 %v5185_v62, %s5093_s13 }
 0x534   :  { %1354 = vrot.lane.b32.xlu0 %v5196_v2, %s5093_s13 }
 0x5a3   :  { %v1019_v43 = vpop.xlane.xlu0 %1018 }
 0x5a4   :  { %v1023_v44 = vsub.f32 %v936_v40, %v1019_v43 }
 0x5a6   :  { %v1025_v45 = vmul.f32 1.442695, %v1023_v44 }
 0x5a7   :  { %v1041_v46 = vpop.permute.xlu0 %1040 }
 0x5a8   :  { %5017 = vpow2.f32 %v1025_v45  ;;  %4655 = vmatpush3.msra.mxu1 %v1041_v46 }
 0x5a9   :  { %4669 = vmatprep.subr.mxu1 %v5086_v48 }
 0x5ab   :  { %v1277_v59 = vpop.permute.xlu0 %1276 }
 0x5af   :  { %v1355_v5 = vpop.permute.xlu0 %1354 }
 0x5b2   :  { %v5018_v47 = vpop.eup %5017 }
 0x5b3   :  { %v1029_v49 = vsel %vm457_vm2, %v5018_v47, 0.0 }
 0x5b4   :  { %1030 = vadd.xlane.f32.xlu1 %v1029_v49 }
 0x5c5   :  { %1356 = vrot.lane.b32.xlu1 %v5188_v63, %s5093_s13 }
 0x5e6   :  { %v1013_v50 = vpop.f32.mrb[6].mxu0 }
 0x5e7   :  { %v1014_v51 = vadd.f32 %v1013_v50, %v5213_v8  ;;  %v4653_v52 = vpop.f32.mrb[7].mxu0 }
 0x5e9   :  { %v1020_v53 = vsel %vm457_vm2, %v1014_v51, -inf }
 0x5ea   :  { %1021 = vmax.xlane.f32.xlu1 %v1020_v53 }
 0x641   :  { %v1031_v56 = vpop.xlane.xlu1 %1030 }
 0x642   :  { %5019 = vrcp.f32 %v1031_v56 }
 0x645   :  { %v1357_v61 = vpop.permute.xlu1 %1356 }
 0x64c   :  { %v5020_v57 = vpop.eup %5019 }
 0x64d   :  { %v1037_v58 = vmul.f32 %v5020_v57, %v5018_v47 }
 0x64f   :  { %4657 = vmatmul.mubr.msk.f32.vlgmr.msra.gmra.mrb[12].mxu1 %vm457_vm2, %v1037_v58 }
 0x650   :  { %4670 = vmatpush3.xpose.msk.msra.mxu1 %vm457_vm2, %v1279_v55  ;;  %4671 = vmatprep.mubr.msk.f32.mxu1 %vm5087_vm1, %v5086_v48 }
 0x651   :  { %4674 = vmatprep.subr.mxu1 %v5086_v48 }
 0x653   :  { %4672 = vmatmul.mubr.msk.f32.vlgmr.msra.gmra.mrb[14].mxu1 %vm457_vm2, %v1277_v59 }
 0x654   :  { %4675 = vmatpush3.xpose.msk.msra.mxu1 %vm457_vm2, %v1357_v61  ;;  %4676 = vmatprep.mubr.msk.f32.mxu1 %vm5087_vm1, %v5086_v48 }
 0x655   :  { %4684 = vmatprep.subr.mxu1 %v5086_v48 }
 0x657   :  { %4677 = vmatmul.mubr.msk.f32.vlgmr.msra.gmra.mrb[16].mxu1 %vm457_vm2, %v1355_v5 }
 0x658   :  { %4686 = vmatprep.mubr.msk.f32.mxu1 %vm5087_vm1, %v5086_v48 }
 0x677   :  { %v1022_v6 = vpop.xlane.xlu1 %1021 }
 0x678   :  { %v1024_v7 = vsub.f32 %v1014_v51, %v1022_v6 }
 0x67a   :  { %v1027_v9 = vmul.f32 1.442695, %v1024_v7 }
 0x67c   :  { %5021 = vpow2.f32 %v1027_v9 }
 0x686   :  { %v5022_v10 = vpop.eup %5021 }
 0x687   :  { %v1032_v11 = vsel %vm457_vm2, %v5022_v10, 0.0 }
 0x688   :  { %1033 = vadd.xlane.f32.xlu0 %v1032_v11 }
 0x69e   :  { %1117 = vrot.lane.b32.xlu0 %v5199_v3, %s5092_s12 }
 0x6a2   :  { %1530 = vrot.lane.b32.xlu0 %v5199_v3, %s5093_s13 }
 0x6a6   :  { %1691 = vrot.lane.b32.xlu0 %v5181_v60, %s5095_s18 }
 0x6aa   :  { %1769 = vrot.lane.b32.xlu0 %v5188_v63, %s5095_s18 }
 0x6ae   :  { %1689 = vrot.lane.b32.xlu0 %v5185_v62, %s5095_s18 }
 0x715   :  { %v1034_v12 = vpop.xlane.xlu0 %1033 }
 0x716   :  { %5023 = vrcp.f32 %v1034_v12 }
 0x719   :  { %v1118_v13 = vpop.permute.xlu0 %1117 }
 0x71a   :  { %4660 = vmatpush3.msra.mxu0 %v1118_v13 }
 0x71b   :  { %4664 = vmatprep.subr.mxu0 %v150_v24 }
 0x71d   :  { %v1531_v14 = vpop.permute.xlu0 %1530 }
 0x71e   :  { %4685 = vmatpush3.msra.mxu1 %v1531_v14 }
 0x71f   :  { %4694 = vmatprep.subr.mxu1 %v5086_v48 }
 0x720   :  { %v5024_v15 = vpop.eup %5023 }
 0x721   :  { %v1038_v16 = vmul.f32 %v5024_v15, %v5022_v10  ;;  %v1692_v41 = vpop.permute.xlu0 %1691 }
 0x722   :  { %v1112_v17 = vpop.f32.mrb[12].mxu1 }
 0x723   :  { %v4658_v18 = vpop.f32.mrb[13].mxu1  ;;  %4662 = vmatmul.mubr.msk.f32.vlgmr.msra.gmra.mrb[8].mxu0 %vm457_vm2, %v1038_v16 }
 0x724   :  { %4666 = vmatprep.mubr.msk.f32.mxu0 %vm457_vm2, %v1112_v17  ;;  %4665 = vmatpush3.msra.mxu0 %v150_v24 }
 0x725   :  { %4679 = vmatprep.subr.mxu0 %v5086_v48  ;;  %v1770_v44 = vpop.permute.xlu0 %1769 }
 0x726   :  { %v1350_v60 = vpop.f32.mrb[14].mxu1 }
 0x727   :  { %v1351_v62 = vadd.f32 %v1350_v60, %v5210_v4  ;;  %v4673_v63 = vpop.f32.mrb[15].mxu1 }
 0x729   :  { %v1432_v19 = vsel %vm457_vm2, %v1351_v62, -inf  ;;  %v1690_v46 = vpop.permute.xlu0 %1689 }
 0x72a   :  { %1433 = vmax.xlane.f32.xlu1 %v1432_v19  ;;  %v1428_v20 = vpop.f32.mrb[16].mxu1  ;;  %v152_v19 = vld [vmem:[%s5233_s17 + $0x18] sm:$0xff]  ;;  %s5110_s17 = smov 28  }
 0x72b   :  { %v1429_v21 = vadd.f32 %v1428_v20, %v5213_v8  ;;  %v4678_v22 = vpop.f32.mrb[17].mxu1  ;;  %s5593_s21 = sld [smem:[%s5624_s0 + %s5110_s17]]  }
 0x72d   :  { %v1435_v23 = vsel %vm457_vm2, %v1429_v21, -inf }
 0x72e   :  { %1436 = vmax.xlane.f32.xlu1 %v1435_v23  ;;  %v4361_v23 = vld [vmem:[%s4332_s22] ss:$0 sm:$0xff]  ;;  %s5111_s22 = smov 24  }
 0x72f   :  { %v456_v24 = vadd.f32 %v4361_v23, %v5126_v1  ;;  %s4343_s25 = sld [smem:[%s5624_s0 + %s5111_s22]]  }
 0x7b7   :  { %v1434_v25 = vpop.xlane.xlu1 %1433 }
 0x7b8   :  { %v1438_v26 = vsub.f32 %v1351_v62, %v1434_v25  ;;  %v455_v25 = vadd.f32 %v4361_v23, %v5124_v0 }
 0x7ba   :  { %v1440_v27 = vmul.f32 1.442695, %v1438_v26 }
 0x7bb   :  { %v1437_v28 = vpop.xlane.xlu1 %1436 }
 0x7bc   :  { %5025 = vpow2.f32 %v1440_v27  ;;  %v1439_v29 = vsub.f32 %v1429_v21, %v1437_v28 }
 0x7be   :  { %v1442_v30 = vmul.f32 1.442695, %v1439_v29 }
 0x7c0   :  { %5027 = vpow2.f32 %v1442_v30 }
 0x7c6   :  { %v5026_v31 = vpop.eup %5025 }
 0x7c7   :  { %v1444_v32 = vsel %vm457_vm2, %v5026_v31, 0.0 }
 0x7c8   :  { %1445 = vadd.xlane.f32.xlu1 %v1444_v32 }
 0x7ca   :  { %v5028_v33 = vpop.eup %5027 }
 0x7cb   :  { %v1447_v34 = vsel %vm457_vm2, %v5028_v33, 0.0 }
 0x7cc   :  { %1448 = vadd.xlane.f32.xlu1 %v1447_v34 }
 0x7dd   :  { %1454 = vrot.lane.b32.xlu1 %v5178_v54, %s5093_s13 }
 0x7e1   :  { %1767 = vrot.lane.b32.xlu1 %v5196_v2, %s5095_s18 }
 0x7f6   :  { %v1189_v35 = vpop.f32.mrb[8].mxu0 }
 0x7f7   :  { %v4663_v36 = vpop.f32.mrb[9].mxu0  ;;  %4667 = vmatmul.mubr.msk.f32.vlgmr.msra.gmra.mrb[4].mxu0 %vm457_vm2, %v1189_v35 }
 0x7f8   :  { %4681 = vmatprep.mubr.msk.f32.mxu0 %vm5087_vm1, %v5086_v48 }
 0x855   :  { %v1446_v37 = vpop.xlane.xlu1 %1445 }
 0x856   :  { %5029 = vrcp.f32 %v1446_v37 }
 0x859   :  { %v1449_v38 = vpop.xlane.xlu1 %1448 }
 0x85a   :  { %5031 = vrcp.f32 %v1449_v38 }
 0x85d   :  { %v1455_v40 = vpop.permute.xlu1 %1454 }
 0x85e   :  { %4680 = vmatpush3.msra.mxu0 %v1455_v40  ;;  %v2111_v40 = vld [vmem:[%s4337_s26] sm:$0xff] }
 0x85f   :  { %4689 = vmatprep.subr.mxu0 %v151_v39 }
 0x860   :  { %v5030_v42 = vpop.eup %5029 }
 0x861   :  { %v1452_v43 = vmul.f32 %v5030_v42, %v5026_v31  ;;  %v1768_v52 = vpop.permute.xlu1 %1767 }
 0x863   :  { %4682 = vmatmul.mubr.msk.f32.vlgmr.msra.gmra.mrb[10].mxu0 %vm457_vm2, %v1452_v43  ;;  %v2106_v43 = vld [vmem:[%s4335_s30] sm:$0xff] }
 0x864   :  { %v5032_v2 = vpop.eup %5031  ;;  %4690 = vmatpush3.msra.mxu0 %v151_v39 }
 0x865   :  { %v1453_v45 = vmul.f32 %v5032_v2, %v5028_v33  ;;  %4699 = vmatprep.subr.mxu0 %v5086_v48  ;;  %v2107_v2 = vld [vmem:[%s4335_s30 + $0x8] sm:$0xff] }
 0x867   :  { %4687 = vmatmul.mubr.msk.f32.vlgmr.msra.gmra.mrb[18].mxu1 %vm457_vm2, %v1453_v45  ;;  %v2113_v45 = vld [vmem:[%s4337_s26 + $0x10] sm:$0xff] }
 0x868   :  { %4695 = vmatpush3.xpose.msk.msra.mxu1 %vm457_vm2, %v1692_v41  ;;  %4696 = vmatprep.mubr.msk.f32.mxu1 %vm5087_vm1, %v5086_v48  ;;  %v2112_v41 = vld [vmem:[%s4337_s26 + $0x8] sm:$0xff] }
 0x869   :  { %4704 = vmatprep.subr.mxu1 %v5086_v48  ;;  %v4914_v42 = vpack.c.bf16 %v2112_v41, %v2111_v40 }
 0x86b   :  { %4697 = vmatmul.mubr.msk.f32.vlgmr.msra.gmra.mrb[20].mxu1 %vm457_vm2, %v1690_v46  ;;  %v2114_v46 = vld [vmem:[%s4337_s26 + $0x18] sm:$0xff]  ;;  %s5112_s26 = smov 25  }
 0x86c   :  { %4706 = vmatprep.mubr.msk.f32.mxu1 %vm5087_vm1, %v5086_v48  ;;  %s4344_s29 = sld [smem:[%s5624_s0 + %s5112_s26]]  }
 0x936   :  { %v1526_v47 = vpop.f32.mrb[10].mxu0 }
 0x937   :  { %v4683_v49 = vpop.f32.mrb[11].mxu0  ;;  %4691 = vmatprep.mubr.msk.f32.mxu0 %vm457_vm2, %v1526_v47  ;;  %v2108_v47 = vld [vmem:[%s4335_s30 + $0x10] sm:$0xff] }
 0x938   :  { %v4918_v49 = vpack.c.bf16 %v2114_v46, %v2113_v45 }
 0x93a   :  { %v1602_v50 = vpop.f32.mrb[18].mxu1 }
 0x93b   :  { %v4688_v51 = vpop.f32.mrb[19].mxu1  ;;  %4692 = vmatmul.mubr.msk.f32.vlgmr.msra.gmra.mrb[4].mxu0 %vm457_vm2, %v1602_v50  ;;  %v2109_v50 = vld [vmem:[%s4335_s30 + $0x18] sm:$0xff]  ;;  %s5113_s30 = smov 27  }
 0x93c   :  { %4700 = vmatpush3.xpose.msk.msra.mxu0 %vm457_vm2, %v1770_v44  ;;  %4701 = vmatprep.mubr.msk.f32.mxu0 %vm5087_vm1, %v5086_v48  ;;  %v4906_v44 = vpack.c.bf16 %v2107_v2, %v2106_v43  ;;  %v4910_v51 = vpack.c.bf16 %v2109_v50, %v2108_v47  ;;  %s4346_s3 = sld [smem:[%s5624_s0 + %s5113_s30]]  }
 0x93d   :  { %4709 = vmatprep.subr.mxu0 %v5086_v48 }
 0x93e   :  { %v1763_v53 = vpop.f32.mrb[20].mxu1 }
 0x93f   :  { %v1764_v55 = vadd.f32 %v1763_v53, %v5210_v4  ;;  %v4698_v56 = vpop.f32.mrb[21].mxu1  ;;  %4702 = vmatmul.mubr.msk.f32.vlgmr.msra.gmra.mrb[12].mxu0 %vm457_vm2, %v1768_v52  ;;  %v128_v52 = vld [vmem:[%s4320_s4] sm:$0xff]  ;;  %v129_v53 = vld [vmem:[%s4320_s4 + $0x8] sm:$0xff]  ;;  %s5114_s4 = smov 29  }
 0x940   :  { %4711 = vmatprep.mubr.msk.f32.mxu0 %vm5087_vm1, %v5086_v48  ;;  %v2117_v56 = vld [vmem:[%s4339_s8 + $0x8] sm:$0xff]  ;;  %s4348_s7 = sld [smem:[%s5624_s0 + %s5114_s4]]  }
 0x941   :  { %v1845_v57 = vsel %vm457_vm2, %v1764_v55, -inf }
 0x942   :  { %1846 = vmax.xlane.f32.xlu0 %v1845_v57 }
 0x9cf   :  { %v1847_v58 = vpop.xlane.xlu0 %1846 }
 0x9d0   :  { %v1851_v59 = vsub.f32 %v1764_v55, %v1847_v58  ;;  %v2116_v55 = vld [vmem:[%s4339_s8] sm:$0xff] }
 0x9d1   :  { %v4922_v57 = vpack.c.bf16 %v2117_v56, %v2116_v55 }
 0x9d2   :  { %v1853_v61 = vmul.f32 1.442695, %v1851_v59 }
 0x9d4   :  { %5033 = vpow2.f32 %v1853_v61 }
 0x9de   :  { %v5034_v5 = vpop.eup %5033 }
 0x9df   :  { %v1857_v6 = vsel %vm457_vm2, %v5034_v5, 0.0 }
 0x9e0   :  { %1858 = vadd.xlane.f32.xlu0 %v1857_v6 }
 0xa12   :  { %v1841_v7 = vpop.f32.mrb[12].mxu0 }
 0xa13   :  { %v1842_v4 = vadd.f32 %v1841_v7, %v5213_v8  ;;  %v4703_v9 = vpop.f32.mrb[13].mxu0 }
 0xa14   :  { %v4394_v9 = vld [vmem:[%s4333_s14] ss:$0 sm:$0xff] }
 0xa15   :  { %v1848_v10 = vsel %vm457_vm2, %v1842_v4, -inf }
 0xa16   :  { %1849 = vmax.xlane.f32.xlu1 %v1848_v10 }
 0xa27   :  { %1943 = vrot.lane.b32.xlu1 %v5199_v3, %s5095_s18 }
 0xa6d   :  { %v1859_v8 = vpop.xlane.xlu0 %1858 }
 0xaa3   :  { %v1850_v11 = vpop.xlane.xlu1 %1849 }
 0xaa4   :  { %v1852_v12 = vsub.f32 %v1842_v4, %v1850_v11 }
 0xaa6   :  { %v1855_v13 = vmul.f32 1.442695, %v1852_v12 }
 0xaa7   :  { %v1944_v14 = vpop.permute.xlu1 %1943 }
 0xaa8   :  { %5035 = vpow2.f32 %v1855_v13  ;;  %4710 = vmatpush3.msra.mxu0 %v1944_v14  ;;  %v4395_v13 = vld [vmem:[%s4334_s19] ss:$0 sm:$0xff] }
 0xaa9   :  { %5037 = vrcp.f32 %v1859_v8  ;;  %4714 = vmatprep.subr.mxu0 %v152_v19  ;;  %v2119_v8 = vld [vmem:[%s4339_s8 + $0x18] sm:$0xff] }
 0xab2   :  { %v5036_v15 = vpop.eup %5035 }
 0xab3   :  { %v1860_v16 = vsel %vm457_vm2, %v5036_v15, 0.0  ;;  %v5038_v18 = vpop.eup %5037 }
 0xab4   :  { %1861 = vadd.xlane.f32.xlu0 %v1860_v16  ;;  %v1865_v3 = vmul.f32 %v5038_v18, %v5034_v5  ;;  %v2118_v16 = vld [vmem:[%s4339_s8 + $0x10] sm:$0xff]  ;;  %s5115_s8 = smov 30  }
 0xaca   :  { %1867 = vrot.lane.b32.xlu0 %v5178_v54, %s5095_s18 }
 0xb41   :  { %v1862_v17 = vpop.xlane.xlu0 %1861 }
 0xb42   :  { %5039 = vrcp.f32 %v1862_v17 }
 0xb45   :  { %v1868_v60 = vpop.permute.xlu0 %1867 }
 0xb46   :  { %4705 = vmatpush3.msra.mxu1 %v1868_v60  ;;  %v4399_v60 = vld [vmem:[%s4338_s23] ss:$0 sm:$0xff] }
 0xb47   :  { %4707 = vmatmul.mubr.msk.f32.vlgmr.msra.gmra.mrb[22].mxu1 %vm457_vm2, %v1865_v3  ;;  %4907 = vmatprep.subr.bf16.mxu1 %v4906_v44  ;;  %v4926_v3 = vpack.c.bf16 %v2119_v8, %v2118_v16 }
 0xb48   :  { %4909 = vmatpush3.bf16.msra.mxu1 %v4906_v44 }
 0xb49   :  { %4911 = vmatprep.subr.bf16.mxu1 %v4910_v51 }
 0xb4c   :  { %v5040_v62 = vpop.eup %5039  ;;  %4913 = vmatpush3.bf16.msra.mxu1 %v4910_v51 }
 0xb4d   :  { %v1866_v63 = vmul.f32 %v5040_v62, %v5036_v15  ;;  %4923 = vmatprep.subr.bf16.mxu1 %v4922_v57 }
 0xb4f   :  { %4712 = vmatmul.mubr.msk.f32.vlgmr.msra.gmra.mrb[14].mxu0 %vm457_vm2, %v1866_v63 }
 0xb50   :  { %4715 = vmatpush3.msra.mxu0 %v152_v19 }
 0xb51   :  { %4915 = vmatprep.subr.bf16.mxu0 %v4914_v42 }
 0xc1a   :  { %v1939_v20 = vpop.f32.mrb[22].mxu1 }
 0xc1b   :  { %v4708_v21 = vpop.f32.mrb[23].mxu1  ;;  %4716 = vmatprep.mubr.msk.f32.mxu0 %vm457_vm2, %v1939_v20 }
 0xc1c   :  { %v4396_v21 = vld [vmem:[%s4336_s27] ss:$0 sm:$0xff] }
 0xc22   :  { %v2015_v54 = vpop.f32.mrb[14].mxu0 }
 0xc23   :  { %v4713_v22 = vpop.f32.mrb[15].mxu0  ;;  %4717 = vmatmul.mubr.msk.f32.vlgmr.msra.gmra.mrb[4].mxu0 %vm457_vm2, %v2015_v54 }
 0xc24   :  { %4917 = vmatpush3.bf16.msra.mxu0 %v4914_v42  ;;  %4738 = vmatprep.mubr.msk.f32.mxu0 %vm154_vm0, %v128_v52 }
 0xc25   :  { %4919 = vmatprep.subr.bf16.mxu0 %v4918_v49 }
 0xc28   :  { %4921 = vmatpush3.bf16.msra.mxu0 %v4918_v49 }
 0xc29   :  { %4752 = vmatprep.subr.mxu0 %v5086_v48 }
 0xc2b   :  { %4739 = vmatmul.mubr.msk.f32.vlgmr.msra.gmra.mrb[16].mxu0 %vm154_vm0, %v129_v53 }
 0xc2c   :  { %4754 = vmatprep.mubr.msk.f32.mxu0 %vm5087_vm1, %v5086_v48 }
 0xcf6   :  { %v4718_v26 = vpop.f32.mrb[4].mxu0 }
 0xcf7   :  { %v5351_v27 = vadd.f32 %v4718_v26, %v456_v24  ;;  %v2091_v28 = vpop.f32.mrb[5].mxu0 }
 0xcf8   :  { %v5353_v29 = vadd.f32 %v2091_v28, %v455_v25  ;;  %v4402_v28 = vld [vmem:[%s4340_s1] ss:$0 sm:$0xff] }
 0xcf9   :  { %v2129_v30 = vsel %vm154_vm0, %v5351_v27, 0.0 }
 0xcfa   :  { %2130 = vadd.xlane.f32.xlu0 %v2129_v30  ;;  %v2126_v31 = vsel %vm154_vm0, %v5353_v29, 0.0 }
 0xcfb   :  { %2127 = vadd.xlane.f32.xlu1 %v2126_v31 }
 0xcfe   :  { %v4740_v62 = vpop.f32.mrb[16].mxu0 }
 0xcff   :  { %v5396_v63 = vadd.f32 %v4740_v62, %v4399_v60  ;;  %v2335_v19 = vpop.f32.mrb[17].mxu0 }
 0xd00   :  { %v5398_v20 = vadd.f32 %v4399_v60, %v2335_v19 }
 0xd02   :  { %4753 = vmatpush3.xpose.msk.msra.mxu0 %vm457_vm2, %v5398_v20 }
 0xd03   :  { %4762 = vmatprep.subr.mxu0 %v5086_v48 }
 0xd87   :  { %v2131_v32 = vpop.xlane.xlu0 %2130 }
 0xd88   :  { %v2133_v33 = vmul.f32 0.03125, %v2131_v32  ;;  %v2128_v34 = vpop.xlane.xlu1 %2127 }
 0xd89   :  { %v2132_v1 = vmul.f32 0.03125, %v2128_v34  ;;  %v5434_v34 = vld [vmem:[%s4322_s5 + $0x8] sm:$0xff] }
 0xd8a   :  { %v2135_v0 = vsub.f32 %v5351_v27, %v2133_v33 }
 0xd8b   :  { %v2134_v35 = vsub.f32 %v5353_v29, %v2132_v1  ;;  %v5436_v1 = vld [vmem:[%s4322_s5] sm:$0xff] }
 0xd8c   :  { %v2137_v36 = vmul.f32 %v2135_v0, %v2135_v0 }
 0xd8d   :  { %v2136_v37 = vmul.f32 %v2134_v35, %v2134_v35 }
 0xd8e   :  { %v2141_v38 = vsel %vm154_vm0, %v2137_v36, 0.0 }
 0xd8f   :  { %2142 = vadd.xlane.f32.xlu1 %v2141_v38  ;;  %v2138_v39 = vsel %vm154_vm0, %v2136_v37, 0.0 }
 0xd90   :  { %2139 = vadd.xlane.f32.xlu0 %v2138_v39 }
 0xe1c   :  { %v2143_v58 = vpop.xlane.xlu1 %2142 }
 0xe1d   :  { %v2145_v59 = vmul.f32 0.03125, %v2143_v58  ;;  %v2140_v61 = vpop.xlane.xlu0 %2139 }
 0xe1e   :  { %v2144_v5 = vmul.f32 0.03125, %v2140_v61 }
 0xe1f   :  { %v2147_v6 = vadd.f32 1e-05, %v2145_v59 }
 0xe20   :  { %v2146_v7 = vadd.f32 1e-05, %v2144_v5 }
 0xe21   :  { %5041 = vrsqrt.f32 %v2147_v6 }
 0xe22   :  { %5043 = vrsqrt.f32 %v2146_v7 }
 0xe2b   :  { %v5042_v4 = vpop.eup %5041 }
 0xe2c   :  { %v5044_v10 = vpop.eup %5043  ;;  %v2151_v11 = vmul.f32 %v5042_v4, %v2135_v0 }
 0xe2d   :  { %v2150_v12 = vmul.f32 %v5044_v10, %v2134_v35 }
 0xe2e   :  { %v2159_v14 = vmul.f32 %v4394_v9, %v2151_v11 }
 0xe2f   :  { %v2158_v15 = vmul.f32 %v4394_v9, %v2150_v12 }
 0xe30   :  { %v2167_v18 = vadd.f32 %v4395_v13, %v2159_v14 }
 0xe31   :  { %v2166_v17 = vadd.f32 %v4395_v13, %v2158_v15 }
 0xe33   :  { %4727 = vmatprep.mubr.msk.f32.mxu1 %vm154_vm0, %v2166_v17 }
 0xe34   :  { %4728 = vmatmul.mubr.msk.f32.vlgmr.msra.gmra.mrb[24].mxu1 %vm154_vm0, %v2167_v18 }
 0xe35   :  { %4925 = vmatpush3.bf16.msra.mxu1 %v4922_v57  ;;  %4749 = vmatprep.mubr.msk.f32.mxu1 %vm154_vm0, %v128_v52  ;;  %v2121_v52 = vld [vmem:[%s5457_s9] sm:$0xff] }
 0xe36   :  { %4927 = vmatprep.subr.bf16.mxu1 %v4926_v3 }
 0xe39   :  { %4929 = vmatpush3.bf16.msra.mxu1 %v4926_v3 }
 0xe3a   :  { %4757 = vmatprep.subr.mxu1 %v5086_v48 }
 0xe3c   :  { %4750 = vmatmul.mubr.msk.f32.vlgmr.msra.gmra.mrb[26].mxu1 %vm154_vm0, %v129_v53 }
 0xe3d   :  { %4759 = vmatprep.mubr.msk.f32.mxu1 %vm5087_vm1, %v5086_v48 }
 0xe42   :  { %4758 = vmatpush3.xpose.msk.msra.mxu1 %vm457_vm2, %v5396_v63 }
 0xe43   :  { %4767 = vmatprep.subr.mxu1 %v5086_v48 }
 0xf07   :  { %v4729_v54 = vpop.f32.mrb[24].mxu1 }
 0xf08   :  { %v2252_v22 = vadd.f32 %v4729_v54, %v4396_v21  ;;  %v2246_v23 = vpop.f32.mrb[25].mxu1 }
 0xf09   :  { %v2247_v24 = vadd.f32 %v4396_v21, %v2246_v23 }
 0xf0a   :  { %v5412_v25 = vmul.f32 0.35355338, %v2252_v22 }
 0xf0b   :  { %v5414_v26 = vmul.f32 0.35355338, %v2247_v24 }
 0xf0c   :  { %4760 = vmatmul.mubr.msk.f32.vlgmr.msra.gmra.mrb[28].mxu1 %vm457_vm2, %v5412_v25 }
 0xf0d   :  { %4755 = vmatmul.mubr.msk.f32.vlgmr.msra.gmra.mrb[18].mxu0 %vm457_vm2, %v5414_v26  ;;  %4769 = vmatprep.mubr.msk.f32.mxu1 %vm5087_vm1, %v5086_v48 }
 0xf0e   :  { %4764 = vmatprep.mubr.msk.f32.mxu0 %vm5087_vm1, %v5086_v48 }
 0xf0f   :  { %v4751_v30 = vpop.f32.mrb[26].mxu1 }
 0xf10   :  { %v5424_v31 = vadd.f32 %v4751_v30, %v4402_v28  ;;  %v2416_v32 = vpop.f32.mrb[27].mxu1 }
 0xf11   :  { %v5426_v33 = vadd.f32 %v4402_v28, %v2416_v32 }
 0xf12   :  { %4768 = vmatpush3.msra.mxu1 %v5424_v31 }
 0xf13   :  { %4763 = vmatpush3.msra.mxu0 %v5426_v33  ;;  %4777 = vmatprep.subr.mxu1 %v5086_v48 }
 0xf14   :  { %4772 = vmatprep.subr.mxu0 %v2121_v52 }
 0xfdf   :  { %v2581_v0 = vpop.f32.mrb[28].mxu1 }
 0xfe0   :  { %v2582_v35 = vadd.f32 %v2581_v0, %v5434_v34  ;;  %v2505_v36 = vpop.f32.mrb[18].mxu0  ;;  %v4761_v37 = vpop.f32.mrb[29].mxu1 }
 0xfe1   :  { %v2506_v38 = vadd.f32 %v2505_v36, %v5436_v1  ;;  %v4756_v39 = vpop.f32.mrb[19].mxu0 }
 0xfe2   :  { %v2588_v40 = vsel %vm457_vm2, %v2582_v35, -inf }
 0xfe3   :  { %2589 = vmax.xlane.f32.xlu1 %v2588_v40  ;;  %v2585_v41 = vsel %vm457_vm2, %v2506_v38, -inf }
 0xfe4   :  { %2586 = vmax.xlane.f32.xlu0 %v2585_v41 }
0x1070   :  { %v2590_v42 = vpop.xlane.xlu1 %2589 }
0x1071   :  { %v2592_v43 = vsub.f32 %v2582_v35, %v2590_v42  ;;  %v2587_v2 = vpop.xlane.xlu0 %2586 }
0x1072   :  { %v2591_v44 = vsub.f32 %v2506_v38, %v2587_v2 }
0x1073   :  { %v2595_v45 = vmul.f32 1.442695, %v2592_v43 }
0x1074   :  { %v2593_v46 = vmul.f32 1.442695, %v2591_v44 }
0x1075   :  { %5045 = vpow2.f32 %v2595_v45 }
0x1076   :  { %5047 = vpow2.f32 %v2593_v46 }
0x107f   :  { %v5046_v47 = vpop.eup %5045 }
0x1080   :  { %v5048_v49 = vpop.eup %5047  ;;  %v2600_v50 = vsel %vm457_vm2, %v5046_v47, 0.0 }
0x1081   :  { %2601 = vadd.xlane.f32.xlu1 %v2600_v50  ;;  %v2597_v51 = vsel %vm457_vm2, %v5048_v49, 0.0 }
0x1082   :  { %2598 = vadd.xlane.f32.xlu0 %v2597_v51 }
0x1092   :  { %2836 = vrot.lane.b32.xlu1 %v5414_v26, %s5092_s12 }
0x1096   :  { %2916 = vrot.lane.b32.xlu1 %v5396_v63, %s5092_s12 }
0x1098   :  { %2838 = vrot.lane.b32.xlu0 %v5398_v20, %s5092_s12 }
0x109a   :  { %2914 = vrot.lane.b32.xlu1 %v5412_v25, %s5092_s12 }
0x109e   :  { %3253 = vrot.lane.b32.xlu1 %v5398_v20, %s5093_s13 }
0x110e   :  { %v2602_v53 = vpop.xlane.xlu1 %2601 }
0x110f   :  { %5049 = vrcp.f32 %v2602_v53  ;;  %v2599_v55 = vpop.xlane.xlu0 %2598 }
0x1110   :  { %5051 = vrcp.f32 %v2599_v55 }
0x1112   :  { %v2837_v5 = vpop.permute.xlu1 %2836 }
0x1113   :  { %v2839_v61 = vpop.permute.xlu0 %2838 }
0x1116   :  { %v2917_v6 = vpop.permute.xlu1 %2916 }
0x1119   :  { %v5050_v56 = vpop.eup %5049 }
0x111a   :  { %v5052_v57 = vpop.eup %5051  ;;  %v2606_v58 = vmul.f32 %v5050_v56, %v5046_v47  ;;  %v2915_v14 = vpop.permute.xlu1 %2914 }
0x111b   :  { %v2605_v59 = vmul.f32 %v5052_v57, %v5048_v49 }
0x111c   :  { %4770 = vmatmul.mubr.msk.f32.vlgmr.msra.gmra.mrb[30].mxu1 %vm457_vm2, %v2606_v58 }
0x111d   :  { %4778 = vmatpush3.xpose.msk.msra.mxu1 %vm457_vm2, %v2839_v61  ;;  %4765 = vmatmul.mubr.msk.f32.vlgmr.msra.gmra.mrb[20].mxu0 %vm457_vm2, %v2605_v59 }
0x111e   :  { %4779 = vmatprep.mubr.msk.f32.mxu1 %vm5087_vm1, %v5086_v48  ;;  %4773 = vmatpush3.msra.mxu0 %v2121_v52  ;;  %v3254_v22 = vpop.permute.xlu1 %3253  ;;  %v2122_v52 = vld [vmem:[%s5457_s9 + $0x8] sm:$0xff] }
0x111f   :  { %4782 = vmatprep.subr.mxu0 %v5086_v48  ;;  %4787 = vmatprep.subr.mxu1 %v5086_v48 }
0x1120   :  { %4780 = vmatmul.mubr.msk.f32.vlgmr.msra.gmra.mrb[32].mxu1 %vm457_vm2, %v2837_v5 }
0x1121   :  { %4789 = vmatprep.mubr.msk.f32.mxu1 %vm5087_vm1, %v5086_v48 }
0x11ef   :  { %v2749_v7 = vpop.f32.mrb[30].mxu1 }
0x11f0   :  { %v2676_v4 = vpop.f32.mrb[20].mxu0  ;;  %v4771_v9 = vpop.f32.mrb[31].mxu1 }
0x11f1   :  { %v4766_v10 = vpop.f32.mrb[21].mxu0  ;;  %4774 = vmatprep.mubr.msk.f32.mxu0 %vm457_vm2, %v2676_v4 }
0x11f2   :  { %4775 = vmatmul.mubr.msk.f32.vlgmr.msra.gmra.mrb[22].mxu0 %vm457_vm2, %v2749_v7 }
0x11f3   :  { %4783 = vmatpush3.xpose.msk.msra.mxu0 %vm457_vm2, %v2917_v6  ;;  %v2910_v11 = vpop.f32.mrb[32].mxu1  ;;  %4784 = vmatprep.mubr.msk.f32.mxu0 %vm5087_vm1, %v5086_v48 }
0x11f4   :  { %v2911_v12 = vadd.f32 %v2910_v11, %v5436_v1  ;;  %v4781_v13 = vpop.f32.mrb[33].mxu1  ;;  %4792 = vmatprep.subr.mxu0 %v5086_v48 }
0x11f6   :  { %4785 = vmatmul.mubr.msk.f32.vlgmr.msra.gmra.mrb[24].mxu0 %vm457_vm2, %v2915_v14  ;;  %v2992_v15 = vsel %vm457_vm2, %v2911_v12, -inf }
0x11f7   :  { %2993 = vmax.xlane.f32.xlu0 %v2992_v15  ;;  %4794 = vmatprep.mubr.msk.f32.mxu0 %vm5087_vm1, %v5086_v48 }
0x120d   :  { %3015 = vrot.lane.b32.xlu0 %v5426_v33, %s5092_s12 }
0x1211   :  { %3251 = vrot.lane.b32.xlu0 %v5414_v26, %s5093_s13 }
0x1215   :  { %3329 = vrot.lane.b32.xlu0 %v5412_v25, %s5093_s13 }
0x1284   :  { %v2994_v16 = vpop.xlane.xlu0 %2993 }
0x1285   :  { %v2998_v8 = vsub.f32 %v2911_v12, %v2994_v16  ;;  %v2123_v12 = vld [vmem:[%s5457_s9 + $0x10] sm:$0xff] }
0x1287   :  { %v3000_v17 = vmul.f32 1.442695, %v2998_v8 }
0x1288   :  { %v3016_v18 = vpop.permute.xlu0 %3015 }
0x1289   :  { %5053 = vpow2.f32 %v3000_v17  ;;  %4788 = vmatpush3.msra.mxu1 %v3016_v18 }
0x128a   :  { %4802 = vmatprep.subr.mxu1 %v5086_v48 }
0x128c   :  { %v3252_v30 = vpop.permute.xlu0 %3251 }
0x1290   :  { %v3330_v0 = vpop.permute.xlu0 %3329 }
0x1293   :  { %v5054_v3 = vpop.eup %5053 }
0x1294   :  { %v3004_v60 = vsel %vm457_vm2, %v5054_v3, 0.0 }
0x1295   :  { %3005 = vadd.xlane.f32.xlu1 %v3004_v60 }
0x12a6   :  { %3331 = vrot.lane.b32.xlu1 %v5396_v63, %s5093_s13 }
0x12c9   :  { %v2988_v62 = vpop.f32.mrb[24].mxu0 }
0x12ca   :  { %v2989_v19 = vadd.f32 %v2988_v62, %v5434_v34  ;;  %v4786_v21 = vpop.f32.mrb[25].mxu0 }
0x12cc   :  { %v2995_v54 = vsel %vm457_vm2, %v2989_v19, -inf }
0x12cd   :  { %2996 = vmax.xlane.f32.xlu1 %v2995_v54 }
0x1322   :  { %v3006_v23 = vpop.xlane.xlu1 %3005 }
0x1323   :  { %5055 = vrcp.f32 %v3006_v23 }
0x1326   :  { %v3332_v32 = vpop.permute.xlu1 %3331 }
0x132d   :  { %v5056_v24 = vpop.eup %5055 }
0x132e   :  { %v3012_v28 = vmul.f32 %v5056_v24, %v5054_v3 }
0x1330   :  { %4790 = vmatmul.mubr.msk.f32.vlgmr.msra.gmra.mrb[34].mxu1 %vm457_vm2, %v3012_v28 }
0x1331   :  { %4803 = vmatpush3.xpose.msk.msra.mxu1 %vm457_vm2, %v3254_v22  ;;  %4804 = vmatprep.mubr.msk.f32.mxu1 %vm5087_vm1, %v5086_v48 }
0x1332   :  { %4807 = vmatprep.subr.mxu1 %v5086_v48 }
0x1334   :  { %4805 = vmatmul.mubr.msk.f32.vlgmr.msra.gmra.mrb[36].mxu1 %vm457_vm2, %v3252_v30 }
0x1335   :  { %4808 = vmatpush3.xpose.msk.msra.mxu1 %vm457_vm2, %v3332_v32  ;;  %4809 = vmatprep.mubr.msk.f32.mxu1 %vm5087_vm1, %v5086_v48 }
0x1336   :  { %4817 = vmatprep.subr.mxu1 %v5086_v48 }
0x1338   :  { %4810 = vmatmul.mubr.msk.f32.vlgmr.msra.gmra.mrb[38].mxu1 %vm457_vm2, %v3330_v0 }
0x1339   :  { %4819 = vmatprep.mubr.msk.f32.mxu1 %vm5087_vm1, %v5086_v48 }
0x135a   :  { %v2997_v35 = vpop.xlane.xlu1 %2996 }
0x135b   :  { %v2999_v36 = vsub.f32 %v2989_v19, %v2997_v35 }
0x135d   :  { %v3002_v37 = vmul.f32 1.442695, %v2999_v36 }
0x135f   :  { %5057 = vpow2.f32 %v3002_v37 }
0x1369   :  { %v5058_v38 = vpop.eup %5057 }
0x136a   :  { %v3007_v39 = vsel %vm457_vm2, %v5058_v38, 0.0 }
0x136b   :  { %3008 = vadd.xlane.f32.xlu0 %v3007_v39 }
0x1381   :  { %3092 = vrot.lane.b32.xlu0 %v5424_v31, %s5092_s12  ;;  %s5108_s12 = smov 23  }
0x1382   :  { %s4342_s10 = sld [smem:[%s5624_s0 + %s5108_s12]]  }
0x1385   :  { %3505 = vrot.lane.b32.xlu0 %v5424_v31, %s5093_s13 }
0x1389   :  { %3666 = vrot.lane.b32.xlu0 %v5398_v20, %s5095_s18 }
0x138d   :  { %3744 = vrot.lane.b32.xlu0 %v5396_v63, %s5095_s18 }
0x1391   :  { %3664 = vrot.lane.b32.xlu0 %v5414_v26, %s5095_s18 }
0x13f8   :  { %v3009_v40 = vpop.xlane.xlu0 %3008 }
0x13f9   :  { %5059 = vrcp.f32 %v3009_v40 }
0x13fc   :  { %v3093_v41 = vpop.permute.xlu0 %3092 }
0x13fd   :  { %4793 = vmatpush3.msra.mxu0 %v3093_v41 }
0x13fe   :  { %4797 = vmatprep.subr.mxu0 %v2122_v52 }
0x1400   :  { %v3506_v42 = vpop.permute.xlu0 %3505 }
0x1401   :  { %4818 = vmatpush3.msra.mxu1 %v3506_v42 }
0x1402   :  { %4827 = vmatprep.subr.mxu1 %v5086_v48 }
0x1403   :  { %v5060_v43 = vpop.eup %5059  ;;  %v3087_v2 = vpop.f32.mrb[34].mxu1 }
0x1404   :  { %v3013_v44 = vmul.f32 %v5060_v43, %v5058_v38  ;;  %v4791_v45 = vpop.f32.mrb[35].mxu1  ;;  %v3667_v14 = vpop.permute.xlu0 %3666 }
0x1406   :  { %4795 = vmatmul.mubr.msk.f32.vlgmr.msra.gmra.mrb[26].mxu0 %vm457_vm2, %v3013_v44 }
0x1407   :  { %4799 = vmatprep.mubr.msk.f32.mxu0 %vm457_vm2, %v3087_v2  ;;  %v3325_v63 = vpop.f32.mrb[36].mxu1  ;;  %4798 = vmatpush3.msra.mxu0 %v2122_v52 }
0x1408   :  { %v3326_v20 = vadd.f32 %v3325_v63, %v5436_v1  ;;  %v4806_v26 = vpop.f32.mrb[37].mxu1  ;;  %4812 = vmatprep.subr.mxu0 %v5086_v48  ;;  %v3745_v8 = vpop.permute.xlu0 %3744 }
0x1409   :  { %v2124_v26 = vld [vmem:[%s5457_s9 + $0x18] sm:$0xff] }
0x140a   :  { %v3407_v46 = vsel %vm457_vm2, %v3326_v20, -inf }
0x140b   :  { %v3403_v47 = vpop.f32.mrb[38].mxu1  ;;  %3408 = vmax.xlane.f32.xlu1 %v3407_v46 }
0x140c   :  { %v3404_v49 = vadd.f32 %v3403_v47, %v5434_v34  ;;  %v4811_v50 = vpop.f32.mrb[39].mxu1  ;;  %v3665_v18 = vpop.permute.xlu0 %3664 }
0x140d   :  { %v4405_v50 = vld [vmem:[%s4342_s10] ss:$0 sm:$0xff] }
0x140e   :  { %v3410_v51 = vsel %vm457_vm2, %v3404_v49, -inf }
0x140f   :  { %3411 = vmax.xlane.f32.xlu1 %v3410_v51  ;;  %v2432_v51 = vadd.f32 %v5351_v27, %v4405_v50 }
0x1498   :  { %v3409_v53 = vpop.xlane.xlu1 %3408 }
0x1499   :  { %v3413_v55 = vsub.f32 %v3326_v20, %v3409_v53  ;;  %v2431_v53 = vadd.f32 %v5353_v29, %v4405_v50 }
0x149b   :  { %v3415_v56 = vmul.f32 1.442695, %v3413_v55 }
0x149c   :  { %v3412_v57 = vpop.xlane.xlu1 %3411 }
0x149d   :  { %5061 = vpow2.f32 %v3415_v56  ;;  %v3414_v58 = vsub.f32 %v3404_v49, %v3412_v57 }
0x149f   :  { %v3417_v59 = vmul.f32 1.442695, %v3414_v58 }
0x14a1   :  { %5063 = vpow2.f32 %v3417_v59 }
0x14a7   :  { %v5062_v61 = vpop.eup %5061 }
0x14a8   :  { %v3419_v5 = vsel %vm457_vm2, %v5062_v61, 0.0 }
0x14a9   :  { %3420 = vadd.xlane.f32.xlu1 %v3419_v5 }
0x14ab   :  { %v5064_v6 = vpop.eup %5063 }
0x14ac   :  { %v3422_v7 = vsel %vm457_vm2, %v5064_v6, 0.0 }
0x14ad   :  { %3423 = vadd.xlane.f32.xlu1 %v3422_v7 }
0x14be   :  { %3429 = vrot.lane.b32.xlu1 %v5426_v33, %s5093_s13  ;;  %s4349_s13 = sld [smem:[%s5624_s0 + %s5115_s8]]  }
0x14c2   :  { %3742 = vrot.lane.b32.xlu1 %v5412_v25, %s5095_s18 }
0x14d9   :  { %v3164_v4 = vpop.f32.mrb[26].mxu0 }
0x14da   :  { %v4796_v9 = vpop.f32.mrb[27].mxu0  ;;  %4800 = vmatmul.mubr.msk.f32.vlgmr.msra.gmra.mrb[22].mxu0 %vm457_vm2, %v3164_v4 }
0x14db   :  { %4814 = vmatprep.mubr.msk.f32.mxu0 %vm5087_vm1, %v5086_v48 }
0x1536   :  { %v3421_v10 = vpop.xlane.xlu1 %3420 }
0x1537   :  { %5065 = vrcp.f32 %v3421_v10 }
0x153a   :  { %v3424_v11 = vpop.xlane.xlu1 %3423 }
0x153b   :  { %5067 = vrcp.f32 %v3424_v11 }
0x153e   :  { %v3430_v13 = vpop.permute.xlu1 %3429 }
0x153f   :  { %4813 = vmatpush3.msra.mxu0 %v3430_v13  ;;  %v4122_v13 = vld [vmem:[%s4345_s16 + $0x8] sm:$0xff] }
0x1540   :  { %4822 = vmatprep.subr.mxu0 %v2123_v12 }
0x1541   :  { %v5066_v15 = vpop.eup %5065 }
0x1542   :  { %v3427_v16 = vmul.f32 %v5066_v15, %v5062_v61  ;;  %v3743_v21 = vpop.permute.xlu1 %3742  ;;  %v4123_v15 = vld [vmem:[%s4345_s16 + $0x10] sm:$0xff] }
0x1544   :  { %4815 = vmatmul.mubr.msk.f32.vlgmr.msra.gmra.mrb[28].mxu0 %vm457_vm2, %v3427_v16  ;;  %v4124_v16 = vld [vmem:[%s4345_s16 + $0x18] sm:$0xff] }
0x1545   :  { %v5068_v25 = vpop.eup %5067  ;;  %4823 = vmatpush3.msra.mxu0 %v2123_v12  ;;  %v4121_v12 = vld [vmem:[%s4345_s16] sm:$0xff] }
0x1546   :  { %v3428_v17 = vmul.f32 %v5068_v25, %v5064_v6  ;;  %4832 = vmatprep.subr.mxu0 %v5086_v48  ;;  %v4934_v25 = vpack.c.bf16 %v4124_v16, %v4123_v15 }
0x1548   :  { %4820 = vmatmul.mubr.msk.f32.vlgmr.msra.gmra.mrb[40].mxu1 %vm457_vm2, %v3428_v17  ;;  %v4216_v17 = vld [vmem:[%s5593_s21 + $0x8] sm:$0xff] }
0x1549   :  { %4828 = vmatpush3.xpose.msk.msra.mxu1 %vm457_vm2, %v3667_v14  ;;  %4829 = vmatprep.mubr.msk.f32.mxu1 %vm5087_vm1, %v5086_v48  ;;  %v4930_v14 = vpack.c.bf16 %v4122_v13, %v4121_v12 }
0x154a   :  { %4837 = vmatprep.subr.mxu1 %v5086_v48 }
0x154c   :  { %4830 = vmatmul.mubr.msk.f32.vlgmr.msra.gmra.mrb[42].mxu1 %vm457_vm2, %v3665_v18  ;;  %v4217_v18 = vld [vmem:[%s5593_s21 + $0x10] sm:$0xff] }
0x154d   :  { %4839 = vmatprep.mubr.msk.f32.mxu1 %vm5087_vm1, %v5086_v48 }
0x1617   :  { %v3501_v3 = vpop.f32.mrb[28].mxu0 }
0x1618   :  { %v4816_v60 = vpop.f32.mrb[29].mxu0  ;;  %4824 = vmatprep.mubr.msk.f32.mxu0 %vm457_vm2, %v3501_v3 }
0x1619   :  { %v4218_v60 = vld [vmem:[%s5593_s21 + $0x18] sm:$0xff] }
0x161b   :  { %v3577_v62 = vpop.f32.mrb[40].mxu1 }
0x161c   :  { %v4821_v19 = vpop.f32.mrb[41].mxu1  ;;  %4825 = vmatmul.mubr.msk.f32.vlgmr.msra.gmra.mrb[22].mxu0 %vm457_vm2, %v3577_v62  ;;  %v4942_v62 = vpack.c.bf16 %v4218_v60, %v4217_v18 }
0x161d   :  { %4833 = vmatpush3.xpose.msk.msra.mxu0 %vm457_vm2, %v3745_v8  ;;  %4834 = vmatprep.mubr.msk.f32.mxu0 %vm5087_vm1, %v5086_v48  ;;  %v4215_v8 = vld [vmem:[%s5593_s21] sm:$0xff] }
0x161e   :  { %4842 = vmatprep.subr.mxu0 %v5086_v48  ;;  %v4938_v3 = vpack.c.bf16 %v4216_v17, %v4215_v8  ;;  %v4219_v19 = vld [vmem:[%s5593_s21 + $0x20] sm:$0xff] }
0x161f   :  { %v3738_v54 = vpop.f32.mrb[42].mxu1 }
0x1620   :  { %v3739_v22 = vadd.f32 %v3738_v54, %v5436_v1  ;;  %v4831_v23 = vpop.f32.mrb[43].mxu1  ;;  %4835 = vmatmul.mubr.msk.f32.vlgmr.msra.gmra.mrb[30].mxu0 %vm457_vm2, %v3743_v21  ;;  %v4220_v21 = vld [vmem:[%s5593_s21 + $0x28] sm:$0xff] }
0x1621   :  { %4844 = vmatprep.mubr.msk.f32.mxu0 %vm5087_vm1, %v5086_v48  ;;  %v4946_v54 = vpack.c.bf16 %v4220_v21, %v4219_v19 }
0x1622   :  { %v3820_v24 = vsel %vm457_vm2, %v3739_v22, -inf }
0x1623   :  { %3821 = vmax.xlane.f32.xlu0 %v3820_v24 }
0x16b0   :  { %v3822_v28 = vpop.xlane.xlu0 %3821 }
0x16b1   :  { %v3826_v30 = vsub.f32 %v3739_v22, %v3822_v28 }
0x16b3   :  { %v3828_v32 = vmul.f32 1.442695, %v3826_v30 }
0x16b5   :  { %5069 = vpow2.f32 %v3828_v32 }
0x16bf   :  { %v5070_v0 = vpop.eup %5069 }
0x16c0   :  { %v3832_v35 = vsel %vm457_vm2, %v5070_v0, 0.0 }
0x16c1   :  { %3833 = vadd.xlane.f32.xlu0 %v3832_v35  ;;  %v4438_v35 = vld [vmem:[%s4343_s25] ss:$0 sm:$0xff] }
0x16f3   :  { %v3816_v36 = vpop.f32.mrb[30].mxu0 }
0x16f4   :  { %v3817_v1 = vadd.f32 %v3816_v36, %v5434_v34  ;;  %v4836_v37 = vpop.f32.mrb[31].mxu0 }
0x16f6   :  { %v3823_v38 = vsel %vm457_vm2, %v3817_v1, -inf }
0x16f7   :  { %3824 = vmax.xlane.f32.xlu1 %v3823_v38  ;;  %v4439_v38 = vld [vmem:[%s4344_s29] ss:$0 sm:$0xff] }
0x1708   :  { %3918 = vrot.lane.b32.xlu1 %v5424_v31, %s5095_s18 }
0x174e   :  { %v3834_v34 = vpop.xlane.xlu0 %3833 }
0x1784   :  { %v3825_v48 = vpop.xlane.xlu1 %3824 }
0x1785   :  { %v3827_v39 = vsub.f32 %v3817_v1, %v3825_v48 }
0x1787   :  { %v3830_v40 = vmul.f32 1.442695, %v3827_v39 }
0x1788   :  { %v3919_v41 = vpop.permute.xlu1 %3918 }
0x1789   :  { %5071 = vpow2.f32 %v3830_v40  ;;  %4843 = vmatpush3.msra.mxu0 %v3919_v41 }
0x178a   :  { %5073 = vrcp.f32 %v3834_v34  ;;  %4847 = vmatprep.subr.mxu0 %v2124_v26 }
0x1793   :  { %v5072_v42 = vpop.eup %5071 }
0x1794   :  { %v3835_v43 = vsel %vm457_vm2, %v5072_v42, 0.0  ;;  %v5074_v44 = vpop.eup %5073 }
0x1795   :  { %3836 = vadd.xlane.f32.xlu0 %v3835_v43  ;;  %v3840_v31 = vmul.f32 %v5074_v44, %v5070_v0  ;;  %v4222_v43 = vld [vmem:[%s5593_s21 + $0x38] sm:$0xff] }
0x17ab   :  { %3842 = vrot.lane.b32.xlu0 %v5426_v33, %s5095_s18 }
0x1822   :  { %v3837_v2 = vpop.xlane.xlu0 %3836 }
0x1823   :  { %5075 = vrcp.f32 %v3837_v2  ;;  %v4440_v2 = vld [vmem:[%s4346_s3] ss:$0 sm:$0xff] }
0x1826   :  { %v3843_v45 = vpop.permute.xlu0 %3842 }
0x1827   :  { %4838 = vmatpush3.msra.mxu1 %v3843_v45 }
0x1828   :  { %4840 = vmatmul.mubr.msk.f32.vlgmr.msra.gmra.mrb[44].mxu1 %vm457_vm2, %v3840_v31  ;;  %4931 = vmatprep.subr.bf16.mxu1 %v4930_v14 }
0x1829   :  { %4933 = vmatpush3.bf16.msra.mxu1 %v4930_v14 }
0x182a   :  { %4935 = vmatprep.subr.bf16.mxu1 %v4934_v25 }
0x182d   :  { %v5076_v63 = vpop.eup %5075  ;;  %4937 = vmatpush3.bf16.msra.mxu1 %v4934_v25 }
0x182e   :  { %v3841_v20 = vmul.f32 %v5076_v63, %v5072_v42  ;;  %v4221_v42 = vld [vmem:[%s5593_s21 + $0x30] sm:$0xff] }
0x182f   :  { %v4950_v34 = vpack.c.bf16 %v4222_v43, %v4221_v42 }
0x1830   :  { %4845 = vmatmul.mubr.msk.f32.vlgmr.msra.gmra.mrb[32].mxu0 %vm457_vm2, %v3841_v20 }
0x1831   :  { %4848 = vmatpush3.msra.mxu0 %v2124_v26 }
0x1832   :  { %4939 = vmatprep.subr.bf16.mxu0 %v4938_v3 }
0x18fb   :  { %v3914_v46 = vpop.f32.mrb[44].mxu1 }
0x18fc   :  { %v4841_v47 = vpop.f32.mrb[45].mxu1  ;;  %4849 = vmatprep.mubr.msk.f32.mxu0 %vm457_vm2, %v3914_v46  ;;  %v4443_v46 = vld [vmem:[%s4348_s7] ss:$0 sm:$0xff] }
0x1903   :  { %v3990_v33 = vpop.f32.mrb[32].mxu0 }
0x1904   :  { %v4846_v49 = vpop.f32.mrb[33].mxu0  ;;  %4850 = vmatmul.mubr.msk.f32.vlgmr.msra.gmra.mrb[22].mxu0 %vm457_vm2, %v3990_v33 }
0x1905   :  { %4941 = vmatpush3.bf16.msra.mxu0 %v4938_v3 }
0x1906   :  { %4943 = vmatprep.subr.bf16.mxu0 %v4942_v62 }
0x1909   :  { %4945 = vmatpush3.bf16.msra.mxu0 %v4942_v62 }
0x190a   :  { %4947 = vmatprep.subr.bf16.mxu0 %v4946_v54 }
0x190d   :  { %4949 = vmatpush3.bf16.msra.mxu0 %v4946_v54 }
0x190e   :  { %4951 = vmatprep.subr.bf16.mxu0 %v4950_v34 }
0x1911   :  { %4953 = vmatpush3.bf16.msra.mxu0 %v4950_v34 }
0x19d7   :  { %v4851_v52 = vpop.f32.mrb[22].mxu0 }
0x19d8   :  { %v5575_v55 = vadd.f32 %v4851_v52, %v2432_v51  ;;  %v4066_v56 = vpop.f32.mrb[23].mxu0 }
0x19d9   :  { %v5577_v57 = vadd.f32 %v4066_v56, %v2431_v53 }
0x19da   :  { %v4082_v58 = vsel %vm154_vm0, %v5575_v55, 0.0 }
0x19db   :  { %4083 = vadd.xlane.f32.xlu0 %v4082_v58  ;;  %v4079_v59 = vsel %vm154_vm0, %v5577_v57, 0.0 }
0x19dc   :  { %4080 = vadd.xlane.f32.xlu1 %v4079_v59 }
0x1a68   :  { %v4084_v61 = vpop.xlane.xlu0 %4083 }
0x1a69   :  { %v4086_v5 = vmul.f32 0.03125, %v4084_v61  ;;  %v4081_v6 = vpop.xlane.xlu1 %4080 }
0x1a6a   :  { %v4085_v27 = vmul.f32 0.03125, %v4081_v6 }
0x1a6b   :  { %v4088_v7 = vsub.f32 %v5575_v55, %v4086_v5 }
0x1a6c   :  { %v4087_v29 = vsub.f32 %v5577_v57, %v4085_v27 }
0x1a6d   :  { %v4090_v4 = vmul.f32 %v4088_v7, %v4088_v7 }
0x1a6e   :  { %v4089_v9 = vmul.f32 %v4087_v29, %v4087_v29 }
0x1a6f   :  { %v4094_v10 = vsel %vm154_vm0, %v4090_v4, 0.0 }
0x1a70   :  { %4095 = vadd.xlane.f32.xlu1 %v4094_v10  ;;  %v4091_v11 = vsel %vm154_vm0, %v4089_v9, 0.0 }
0x1a71   :  { %4092 = vadd.xlane.f32.xlu0 %v4091_v11 }
0x1afd   :  { %v4096_v22 = vpop.xlane.xlu1 %4095 }
0x1afe   :  { %v4098_v23 = vmul.f32 0.03125, %v4096_v22  ;;  %v4093_v24 = vpop.xlane.xlu0 %4092 }
0x1aff   :  { %v4097_v28 = vmul.f32 0.03125, %v4093_v24 }
0x1b00   :  { %v4100_v30 = vadd.f32 1e-05, %v4098_v23 }
0x1b01   :  { %v4099_v32 = vadd.f32 1e-05, %v4097_v28 }
0x1b02   :  { %5077 = vrsqrt.f32 %v4100_v30 }
0x1b03   :  { %5079 = vrsqrt.f32 %v4099_v32 }
0x1b0c   :  { %v5078_v0 = vpop.eup %5077 }
0x1b0d   :  { %v5080_v36 = vpop.eup %5079  ;;  %v4104_v1 = vmul.f32 %v5078_v0, %v4088_v7 }
0x1b0e   :  { %v4103_v37 = vmul.f32 %v5080_v36, %v4087_v29 }
0x1b0f   :  { %v4112_v48 = vmul.f32 %v4438_v35, %v4104_v1 }
0x1b10   :  { %v4111_v39 = vmul.f32 %v4438_v35, %v4103_v37 }
0x1b11   :  { %v4120_v41 = vadd.f32 %v4439_v38, %v4112_v48 }
0x1b12   :  { %v4119_v40 = vadd.f32 %v4439_v38, %v4111_v39 }
0x1b14   :  { %4860 = vmatprep.mubr.msk.f32.mxu1 %vm154_vm0, %v4119_v40 }
0x1b15   :  { %4861 = vmatmul.mubr.msk.f32.vlgmr.msra.gmra.mrb[46].mxu1 %vm154_vm0, %v4120_v41 }
0x1be8   :  { %v4862_v44 = vpop.f32.mrb[46].mxu1 }
0x1be9   :  { %v4210_v31 = vadd.f32 %v4862_v44, %v4440_v2  ;;  %v4204_v45 = vpop.f32.mrb[47].mxu1 }
0x1bea   :  { %v4205_v63 = vadd.f32 %v4440_v2, %v4204_v45 }
0x1beb   :  { %v4214_v26 = vmax.f32 %v4210_v31, 0.0 }
0x1bec   :  { %v4213_v20 = vmax.f32 %v4205_v63, 0.0 }
0x1bee   :  { %4879 = vmatprep.mubr.msk.f32.mxu0 %vm4230_vm3, %v4213_v20 }
0x1bef   :  { %4880 = vmatmul.mubr.msk.f32.vlgmr.msra.gmra.mrb[34].mxu0 %vm4230_vm3, %v4214_v26 }
0x1cc2   :  { %v4881_v47 = vpop.f32.mrb[34].mxu0 }
0x1cc3   :  { %v4309_v33 = vadd.f32 %v4881_v47, %v4443_v46  ;;  %v4303_v49 = vpop.f32.mrb[35].mxu0 }
0x1cc4   :  { %v4304_v50 = vadd.f32 %v4443_v46, %v4303_v49 }
0x1cc5   :  { %v4313_v51 = vadd.f32 %v5575_v55, %v4309_v33 }
0x1cc6   :  { %v4312_v52 = vadd.f32 %v5577_v57, %v4304_v50 }
0x1cc7   :  { %4315 = vst.msk [vmem:[%s4349_s13 + $0x8] sm:$0xff] %vm154_vm0, %v4313_v51 }
0x1cc8   :  { %4314 = vst.msk [vmem:[%s4349_s13] sm:$0xff] %vm154_vm0, %v4312_v52 }

// kernel: _lambda_.4
= control target key start
LH: loop header
LB: loop body
LE: loop exit
PB: predicated region body
PF: predicated region fallthrough
CT: control target
= control target key end

     0   :  { %s5589_s6 = smov 1   ;;  %s5590_s10 = smov 2   ;;  %s6292_s0 = inlined_call_operand.smem [shape: u32[31], index: -1, kind: input, shape index: {}] }
   0x1   :  { %s5646_s5 = sld [smem:[%s6292_s0]]   ;;  %s5591_s14 = smov 3  }
   0x2   :  { %s5651_s9 = sld [smem:[%s6292_s0 + %s5589_s6]]   ;;  %s5592_s18 = smov 4  }
   0x3   :  { %s5656_s13 = sld [smem:[%s6292_s0 + %s5590_s10]]   ;;  %s5593_s22 = smov 5  }
   0x4   :  { %s5661_s17 = sld [smem:[%s6292_s0 + %s5591_s14]]   ;;  %s5594_s26 = smov 6  }
   0x5   :  { %s5666_s21 = sld [smem:[%s6292_s0 + %s5592_s18]]   ;;  %s5595_s30 = smov 7  }
   0x6   :  { %s5671_s25 = sld [smem:[%s6292_s0 + %s5593_s22]]   ;;  %s5596_s4 = smov 8  }
   0x7   :  { %s5676_s29 = sld [smem:[%s6292_s0 + %s5594_s26]]   ;;  %s5597_s10 = smov 9  }
   0x8   :  { %6304 = sst [smem:[#allocation32_spill]] %s5651_s9  ;;  %s5598_s15 = smov 10  }
   0x9   :  { %6305 = sst [smem:[#allocation33_spill]] %s5656_s13  ;;  %s5599_s20 = smov 11  }
   0xa   :  { %6306 = sst [smem:[#allocation34_spill]] %s5661_s17  ;;  %s5600_s26 = smov 12  }
   0xb   :  { %6307 = sst [smem:[#allocation35_spill]] %s5666_s21  ;;  %s5601_s1 = smov 13  }
   0xc   :  { %6308 = sst [smem:[#allocation36_spill]] %s5671_s25  ;;  %s5602_s7 = smov 14  }
   0xd   :  { %s5681_s3 = sld [smem:[%s6292_s0 + %s5595_s30]]   ;;  %s5604_s22 = smov 16  }
   0xe   :  { %s5686_s8 = sld [smem:[%s6292_s0 + %s5596_s4]]   ;;  %s5605_s28 = smov 17  }
   0xf   :  { %s5691_s14 = sld [smem:[%s6292_s0 + %s5597_s10]]  }
  0x10   :  { %s5696_s19 = sld [smem:[%s6292_s0 + %s5598_s15]]   ;;  %s5603_s15 = smov 15  }
  0x11   :  { %s5701_s24 = sld [smem:[%s6292_s0 + %s5599_s20]]  }
  0x12   :  { %s5706_s30 = sld [smem:[%s6292_s0 + %s5600_s26]]  }
  0x13   :  { %s5711_s6 = sld [smem:[%s6292_s0 + %s5601_s1]]  }
  0x14   :  { %6309 = sst [smem:[#allocation37_spill]] %s5686_s8 }
  0x15   :  { %s5716_s12 = sld [smem:[%s6292_s0 + %s5602_s7]]   ;;  %s5606_s7 = smov 18  }
  0x16   :  { %6310 = sst [smem:[#allocation38_spill]] %s5696_s19 }
  0x17   :  { %s5721_s20 = sld [smem:[%s6292_s0 + %s5603_s15]]   ;;  %s5607_s15 = smov 19  }
  0x18   :  { %6311 = sst [smem:[#allocation39_spill]] %s5706_s30 }
  0x19   :  { %s5726_s27 = sld [smem:[%s6292_s0 + %s5604_s22]]   ;;  %s5608_s22 = smov 20  }
  0x1a   :  { %s5731_s4 = sld [smem:[%s6292_s0 + %s5605_s28]]   ;;  %s5609_s28 = smov 21  }
  0x1b   :  { %s5736_s17 = sld [smem:[%s6292_s0 + %s5606_s7]]   ;;  %s5610_s7 = smov 22  }
  0x1c   :  { %s5741_s9 = sld [smem:[%s6292_s0 + %s5607_s15]]   ;;  %s5611_s15 = smov 23  }
  0x1d   :  { %s5751_s30 = sld [smem:[%s6292_s0 + %s5609_s28]]   ;;  %s5613_s28 = smov 25  }
  0x1e   :  { %s5761_s13 = sld [smem:[%s6292_s0 + %s5611_s15]]   ;;  %s5615_s15 = smov 27  }
  0x1f   :  { %6312 = sst [smem:[#allocation40_spill]] %s5726_s27 }
  0x20   :  { %s5746_s27 = sld [smem:[%s6292_s0 + %s5608_s22]]   ;;  %s5612_s22 = smov 24  }
  0x21   :  { %6313 = sst [smem:[#allocation41_spill]] %s5736_s17 }
  0x22   :  { %s5756_s17 = sld [smem:[%s6292_s0 + %s5610_s7]]   ;;  %s5614_s7 = smov 26  }
  0x23   :  { %s5771_s25 = sld [smem:[%s6292_s0 + %s5613_s28]]   ;;  %s5617_s28 = smov 29  }
  0x24   :  { %s5781_s21 = sld [smem:[%s6292_s0 + %s5615_s15]]  }
  0x25   :  { %s5791_s19 = sld [smem:[%s6292_s0 + %s5617_s28]]  }
  0x26   :  { %6314 = sst [smem:[#allocation42_spill]] %s5746_s27 }
  0x27   :  { %s5766_s27 = sld [smem:[%s6292_s0 + %s5612_s22]]   ;;  %s5616_s22 = smov 28  }
  0x28   :  { %6315 = sst [smem:[#allocation43_spill]] %s5756_s17 }
  0x29   :  { %s5776_s17 = sld [smem:[%s6292_s0 + %s5614_s7]]   ;;  %s5618_s7 = smov 30  }
  0x2a   :  { %s5786_s8 = sld [smem:[%s6292_s0 + %s5616_s22]]  }
  0x2f   :  { %6316 = sst [smem:[#allocation44_spill]] %s5776_s17 }
  0x30   :  { %s5796_s17 = sld [smem:[%s6292_s0 + %s5618_s7]]  }
  0x31   :  { %66 = vsyncpa [#allocation3], 0 }
  0x32   :  { %67 = vsyncpa [#allocation5], 0 }
  0x33   :  { %68 = vsyncpa [#allocation8], 0 }
  0x34   :  { %69 = vsyncpa [#allocation11], 0 }
  0x35   :  { %70 = vsyncpa [#allocation14], 0 }
  0x36   :  { %71 = vsyncpa [#allocation17], 0 }
  0x37   :  { %72 = vsyncpa [#allocation20], 0 }
  0x38   :  { %73 = vsyncpa [#allocation23], 0  ;;  %s5619_s15 = smov [#allocation4]   ;;  %s5620_s18 = smov [#allocation7]  }
  0x39   :  { %s106_s16 = sshll.u32 %s5619_s15, 4  ;;  %s130_s22 = sshll.u32 %s5620_s18, 4  ;;  %s107_s16 = int_to_ptr.vmem [resolvable:$true] %s106_s16  ;;  %s131_s22 = int_to_ptr.vmem [resolvable:$true] %s130_s22 }
  0x3a   :  { %s5265_s23 = scalar_lea.hbm %s5691_s14, 16 }
  0x3b   :  { %p5266_p0 = scmp.ne.s32.totalorder %s5691_s14, %s5265_s23  ;;  %p5269_p1 = scmp.lt.u32.totalorder %s5265_s23, %s5691_s14 }
  0x3d   :  { %p5271_p2 = pnand %p5269_p1, %p5266_p0 }
  0x3f   :  { %5274 = shalt.err (!%p5271_p2)
}
  0x40   :  { %s5275_s0 = scalar_lea.vmem %s107_s16, 16  ;;  %s5279_s26 = scalar_lea.vmem %s107_s16, 32 }
  0x41   :  { %p5276_p3 = scmp.ne.s32.totalorder %s107_s16, %s5275_s0  ;;  %p5280_p4 = scmp.lt.s32.totalorder %s107_s16, %s107_s16 }
  0x42   :  { %p5281_p5 = scmp.lt.s32.totalorder %s5279_s26, %s5275_s0 }
  0x44   :  { %p5282_p6 = por %p5281_p5, %p5280_p4 }
  0x46   :  { %p5283_p7 = pnand %p5282_p6, %p5276_p3 }
  0x48   :  { %5286 = shalt.err (!%p5283_p7)
}
  0x49   :  { %109 = dma.hbm_to_vmem [thread:$0]  %s5691_s14, 16, %s107_s16, [#allocation5]  }
  0x4a   :  { %s5287_s28 = scalar_lea.hbm %s5711_s6, 16 }
  0x4b   :  { %p5288_p8 = scmp.ne.s32.totalorder %s5711_s6, %s5287_s28  ;;  %p5291_p9 = scmp.lt.u32.totalorder %s5287_s28, %s5711_s6 }
  0x4d   :  { %p5293_p10 = pnand %p5291_p9, %p5288_p8 }
  0x4f   :  { %5296 = shalt.err (!%p5293_p10)
}
  0x50   :  { %s5297_s1 = scalar_lea.vmem %s131_s22, 16  ;;  %s5301_s2 = scalar_lea.vmem %s131_s22, 32 }
  0x51   :  { %p5298_p11 = scmp.ne.s32.totalorder %s131_s22, %s5297_s1  ;;  %p5302_p12 = scmp.lt.s32.totalorder %s131_s22, %s131_s22 }
  0x52   :  { %p5303_p13 = scmp.lt.s32.totalorder %s5301_s2, %s5297_s1 }
  0x54   :  { %p5304_p0 = por %p5303_p13, %p5302_p12 }
  0x56   :  { %p5305_p1 = pnand %p5304_p0, %p5298_p11 }
  0x58   :  { %5308 = shalt.err (!%p5305_p1)
}
  0x59   :  { %133 = dma.hbm_to_vmem [thread:$0]  %s5711_s6, 16, %s131_s22, [#allocation8]  }
  0x5a   :  { %s5621_s7 = smov [#allocation10]   ;;  %s5622_s10 = smov [#allocation13]  }
  0x5b   :  { %s150_s14 = sshll.u32 %s5621_s7, 4  ;;  %s174_s11 = sshll.u32 %s5622_s10, 4  ;;  %s151_s14 = int_to_ptr.vmem [resolvable:$true] %s150_s14  ;;  %s175_s11 = int_to_ptr.vmem [resolvable:$true] %s174_s11 }
  0x5c   :  { %s5309_s15 = scalar_lea.hbm %s5721_s20, 16 }
  0x5d   :  { %p5310_p2 = scmp.ne.s32.totalorder %s5721_s20, %s5309_s15  ;;  %p5313_p3 = scmp.lt.u32.totalorder %s5309_s15, %s5721_s20 }
  0x5f   :  { %p5315_p4 = pnand %p5313_p3, %p5310_p2 }
  0x61   :  { %5318 = shalt.err (!%p5315_p4)
}
  0x62   :  { %s5319_s16 = scalar_lea.vmem %s151_s14, 16  ;;  %s5323_s18 = scalar_lea.vmem %s151_s14, 32 }
  0x63   :  { %p5320_p5 = scmp.ne.s32.totalorder %s151_s14, %s5319_s16  ;;  %p5324_p6 = scmp.lt.s32.totalorder %s151_s14, %s151_s14 }
  0x64   :  { %p5325_p7 = scmp.lt.s32.totalorder %s5323_s18, %s5319_s16 }
  0x66   :  { %p5326_p8 = por %p5325_p7, %p5324_p6 }
  0x68   :  { %p5327_p9 = pnand %p5326_p8, %p5320_p5 }
  0x6a   :  { %5330 = shalt.err (!%p5327_p9)
}
  0x6b   :  { %153 = dma.hbm_to_vmem [thread:$0]  %s5721_s20, 16, %s151_s14, [#allocation11]  }
  0x6c   :  { %s5331_s6 = scalar_lea.hbm %s5741_s9, 16 }
  0x6d   :  { %p5332_p10 = scmp.ne.s32.totalorder %s5741_s9, %s5331_s6  ;;  %p5335_p11 = scmp.lt.u32.totalorder %s5331_s6, %s5741_s9 }
  0x6f   :  { %p5337_p12 = pnand %p5335_p11, %p5332_p10 }
  0x71   :  { %5340 = shalt.err (!%p5337_p12)
}
  0x72   :  { %s5341_s22 = scalar_lea.vmem %s175_s11, 16  ;;  %s5345_s23 = scalar_lea.vmem %s175_s11, 32 }
  0x73   :  { %p5342_p13 = scmp.ne.s32.totalorder %s175_s11, %s5341_s22  ;;  %p5346_p0 = scmp.lt.s32.totalorder %s175_s11, %s175_s11 }
  0x74   :  { %p5347_p1 = scmp.lt.s32.totalorder %s5345_s23, %s5341_s22 }
  0x76   :  { %p5348_p2 = por %p5347_p1, %p5346_p0 }
  0x78   :  { %p5349_p3 = pnand %p5348_p2, %p5342_p13 }
  0x7a   :  { %5352 = shalt.err (!%p5349_p3)
}
  0x7b   :  { %177 = dma.hbm_to_vmem [thread:$0]  %s5741_s9, 16, %s175_s11, [#allocation14]  }
  0x7c   :  { %s5623_s0 = smov [#allocation16]   ;;  %s5624_s26 = smov [#allocation19]  }
  0x7d   :  { %s198_s20 = sshll.u32 %s5623_s0, 4  ;;  %s218_s28 = sshll.u32 %s5624_s26, 4  ;;  %s199_s20 = int_to_ptr.vmem [resolvable:$true] %s198_s20  ;;  %s219_s28 = int_to_ptr.vmem [resolvable:$true] %s218_s28 }
  0x7e   :  { %s5353_s1 = scalar_lea.hbm %s5761_s13, 16 }
  0x7f   :  { %p5354_p4 = scmp.ne.s32.totalorder %s5761_s13, %s5353_s1  ;;  %p5357_p5 = scmp.lt.u32.totalorder %s5353_s1, %s5761_s13 }
  0x81   :  { %p5359_p6 = pnand %p5357_p5, %p5354_p4 }
  0x83   :  { %5362 = shalt.err (!%p5359_p6)
}
  0x84   :  { %s5363_s2 = scalar_lea.vmem %s199_s20, 16  ;;  %s5367_s7 = scalar_lea.vmem %s199_s20, 32 }
  0x85   :  { %p5364_p7 = scmp.ne.s32.totalorder %s199_s20, %s5363_s2  ;;  %p5368_p8 = scmp.lt.s32.totalorder %s199_s20, %s199_s20 }
  0x86   :  { %p5369_p9 = scmp.lt.s32.totalorder %s5367_s7, %s5363_s2 }
  0x88   :  { %p5370_p10 = por %p5369_p9, %p5368_p8 }
  0x8a   :  { %p5371_p11 = pnand %p5370_p10, %p5364_p7 }
  0x8c   :  { %5374 = shalt.err (!%p5371_p11)
}
  0x8d   :  { %201 = dma.hbm_to_vmem [thread:$0]  %s5761_s13, 16, %s199_s20, [#allocation17]  }
  0x8e   :  { %s5375_s9 = scalar_lea.hbm %s5771_s25, 16 }
  0x8f   :  { %p5376_p12 = scmp.ne.s32.totalorder %s5771_s25, %s5375_s9  ;;  %p5379_p13 = scmp.lt.u32.totalorder %s5375_s9, %s5771_s25 }
  0x91   :  { %p5381_p0 = pnand %p5379_p13, %p5376_p12 }
  0x93   :  { %5384 = shalt.err (!%p5381_p0)
}
  0x94   :  { %s5385_s14 = scalar_lea.vmem %s219_s28, 16  ;;  %s5389_s10 = scalar_lea.vmem %s219_s28, 32 }
  0x95   :  { %p5386_p1 = scmp.ne.s32.totalorder %s219_s28, %s5385_s14  ;;  %p5390_p2 = scmp.lt.s32.totalorder %s219_s28, %s219_s28 }
  0x96   :  { %p5391_p3 = scmp.lt.s32.totalorder %s5389_s10, %s5385_s14 }
  0x98   :  { %p5392_p4 = por %p5391_p3, %p5390_p2 }
  0x9a   :  { %p5393_p5 = pnand %p5392_p4, %p5386_p1 }
  0x9c   :  { %5396 = shalt.err (!%p5393_p5)
}
  0x9d   :  { %221 = dma.hbm_to_vmem [thread:$0]  %s5771_s25, 16, %s219_s28, [#allocation20]  }
  0x9e   :  { %s5625_s11 = smov [#allocation2]   ;;  %s5626_s15 = smov [#allocation6]  }
  0x9f   :  { %s94_s13 = sshll.u32 %s5625_s11, 4  ;;  %s118_s16 = sshll.u32 %s5626_s15, 4  ;;  %s95_s13 = int_to_ptr.vmem [resolvable:$true] %s94_s13  ;;  %s119_s16 = int_to_ptr.vmem [resolvable:$true] %s118_s16 }
  0xa0   :  { %s5397_s18 = scalar_lea.hbm %s5681_s3, 16 }
  0xa1   :  { %p5398_p6 = scmp.ne.s32.totalorder %s5681_s3, %s5397_s18  ;;  %p5401_p7 = scmp.lt.u32.totalorder %s5397_s18, %s5681_s3 }
  0xa3   :  { %p5403_p8 = pnand %p5401_p7, %p5398_p6 }
  0xa5   :  { %5406 = shalt.err (!%p5403_p8)
}
  0xa6   :  { %s5407_s6 = scalar_lea.vmem %s95_s13, 16  ;;  %s5411_s22 = scalar_lea.vmem %s95_s13, 32 }
  0xa7   :  { %p5408_p9 = scmp.ne.s32.totalorder %s95_s13, %s5407_s6  ;;  %p5412_p10 = scmp.lt.s32.totalorder %s95_s13, %s95_s13 }
  0xa8   :  { %p5413_p11 = scmp.lt.s32.totalorder %s5411_s22, %s5407_s6 }
  0xaa   :  { %p5414_p12 = por %p5413_p11, %p5412_p10 }
  0xac   :  { %p5415_p13 = pnand %p5414_p12, %p5408_p9 }
  0xae   :  { %5418 = shalt.err (!%p5415_p13)
}
  0xaf   :  { %97 = dma.hbm_to_vmem [thread:$0]  %s5681_s3, 16, %s95_s13, [#allocation3]  }
  0xb0   :  { %s5419_s25 = scalar_lea.hbm %s5701_s24, 16 }
  0xb1   :  { %p5420_p0 = scmp.ne.s32.totalorder %s5701_s24, %s5419_s25  ;;  %p5423_p1 = scmp.lt.u32.totalorder %s5419_s25, %s5701_s24 }
  0xb3   :  { %p5425_p2 = pnand %p5423_p1, %p5420_p0 }
  0xb5   :  { %5428 = shalt.err (!%p5425_p2)
}
  0xb6   :  { %s5429_s23 = scalar_lea.vmem %s119_s16, 16  ;;  %s5433_s0 = scalar_lea.vmem %s119_s16, 32 }
  0xb7   :  { %p5430_p3 = scmp.ne.s32.totalorder %s119_s16, %s5429_s23  ;;  %p5434_p4 = scmp.lt.s32.totalorder %s119_s16, %s119_s16 }
  0xb8   :  { %p5435_p5 = scmp.lt.s32.totalorder %s5433_s0, %s5429_s23 }
  0xba   :  { %p5436_p6 = por %p5435_p5, %p5434_p4 }
  0xbc   :  { %p5437_p7 = pnand %p5436_p6, %p5430_p3 }
  0xbe   :  { %5440 = shalt.err (!%p5437_p7)
}
  0xbf   :  { %121 = dma.hbm_to_vmem [thread:$0]  %s5701_s24, 16, %s119_s16, [#allocation5]  }
  0xc0   :  { %s5627_s20 = smov [#allocation9]   ;;  %s5628_s26 = smov [#allocation12]  }
  0xc1   :  { %s140_s3 = sshll.u32 %s5627_s20, 4  ;;  %s162_s28 = sshll.u32 %s5628_s26, 4  ;;  %s141_s3 = int_to_ptr.vmem [resolvable:$true] %s140_s3  ;;  %s163_s28 = int_to_ptr.vmem [resolvable:$true] %s162_s28 }
  0xc2   :  { %s5441_s1 = scalar_lea.hbm %s5716_s12, 16 }
  0xc3   :  { %p5442_p8 = scmp.ne.s32.totalorder %s5716_s12, %s5441_s1  ;;  %p5445_p9 = scmp.lt.u32.totalorder %s5441_s1, %s5716_s12 }
  0xc5   :  { %p5447_p10 = pnand %p5445_p9, %p5442_p8 }
  0xc7   :  { %5450 = shalt.err (!%p5447_p10)
}
  0xc8   :  { %s5451_s2 = scalar_lea.vmem %s141_s3, 16  ;;  %s5455_s7 = scalar_lea.vmem %s141_s3, 32 }
  0xc9   :  { %p5452_p11 = scmp.ne.s32.totalorder %s141_s3, %s5451_s2  ;;  %p5456_p12 = scmp.lt.s32.totalorder %s141_s3, %s141_s3 }
  0xca   :  { %p5457_p13 = scmp.lt.s32.totalorder %s5455_s7, %s5451_s2 }
  0xcc   :  { %p5458_p0 = por %p5457_p13, %p5456_p12 }
  0xce   :  { %p5459_p1 = pnand %p5458_p0, %p5452_p11 }
  0xd0   :  { %5462 = shalt.err (!%p5459_p1)
}
  0xd1   :  { %143 = dma.hbm_to_vmem [thread:$0]  %s5716_s12, 16, %s141_s3, [#allocation8]  }
  0xd2   :  { %s5463_s24 = scalar_lea.hbm %s5731_s4, 16 }
  0xd3   :  { %p5464_p2 = scmp.ne.s32.totalorder %s5731_s4, %s5463_s24  ;;  %p5467_p3 = scmp.lt.u32.totalorder %s5463_s24, %s5731_s4 }
  0xd5   :  { %p5469_p4 = pnand %p5467_p3, %p5464_p2 }
  0xd7   :  { %5472 = shalt.err (!%p5469_p4)
}
  0xd8   :  { %s5473_s9 = scalar_lea.vmem %s163_s28, 16  ;;  %s5477_s14 = scalar_lea.vmem %s163_s28, 32 }
  0xd9   :  { %p5474_p5 = scmp.ne.s32.totalorder %s163_s28, %s5473_s9  ;;  %p5478_p6 = scmp.lt.s32.totalorder %s163_s28, %s163_s28 }
  0xda   :  { %p5479_p7 = scmp.lt.s32.totalorder %s5477_s14, %s5473_s9 }
  0xdc   :  { %p5480_p8 = por %p5479_p7, %p5478_p6 }
  0xde   :  { %p5481_p9 = pnand %p5480_p8, %p5474_p5 }
  0xe0   :  { %5484 = shalt.err (!%p5481_p9)
}
  0xe1   :  { %165 = dma.hbm_to_vmem [thread:$0]  %s5731_s4, 16, %s163_s28, [#allocation11]  }
  0xe2   :  { %s5629_s10 = smov [#allocation15]   ;;  %s5630_s11 = smov [#allocation18]  }
  0xe3   :  { %s186_s12 = sshll.u32 %s5629_s10, 4  ;;  %s208_s13 = sshll.u32 %s5630_s11, 4  ;;  %s187_s12 = int_to_ptr.vmem [resolvable:$true] %s186_s12  ;;  %s209_s13 = int_to_ptr.vmem [resolvable:$true] %s208_s13 }
  0xe4   :  { %s5485_s15 = scalar_lea.hbm %s5751_s30, 16 }
  0xe5   :  { %p5486_p10 = scmp.ne.s32.totalorder %s5751_s30, %s5485_s15  ;;  %p5489_p11 = scmp.lt.u32.totalorder %s5485_s15, %s5751_s30 }
  0xe7   :  { %p5491_p12 = pnand %p5489_p11, %p5486_p10 }
  0xe9   :  { %5494 = shalt.err (!%p5491_p12)
}
  0xea   :  { %s5495_s16 = scalar_lea.vmem %s187_s12, 16  ;;  %s5499_s18 = scalar_lea.vmem %s187_s12, 32 }
  0xeb   :  { %p5496_p13 = scmp.ne.s32.totalorder %s187_s12, %s5495_s16  ;;  %p5500_p0 = scmp.lt.s32.totalorder %s187_s12, %s187_s12 }
  0xec   :  { %p5501_p1 = scmp.lt.s32.totalorder %s5499_s18, %s5495_s16 }
  0xee   :  { %p5502_p2 = por %p5501_p1, %p5500_p0 }
  0xf0   :  { %p5503_p3 = pnand %p5502_p2, %p5496_p13 }
  0xf2   :  { %5506 = shalt.err (!%p5503_p3)
}
  0xf3   :  { %189 = dma.hbm_to_vmem [thread:$0]  %s5751_s30, 16, %s187_s12, [#allocation14]  }
  0xf4   :  { %s5507_s4 = scalar_lea.hbm %s5766_s27, 16 }
  0xf5   :  { %p5508_p4 = scmp.ne.s32.totalorder %s5766_s27, %s5507_s4  ;;  %p5511_p5 = scmp.lt.u32.totalorder %s5507_s4, %s5766_s27 }
  0xf7   :  { %p5513_p6 = pnand %p5511_p5, %p5508_p4 }
  0xf9   :  { %5516 = shalt.err (!%p5513_p6)
}
  0xfa   :  { %s5517_s6 = scalar_lea.vmem %s209_s13, 16  ;;  %s5521_s22 = scalar_lea.vmem %s209_s13, 32 }
  0xfb   :  { %p5518_p7 = scmp.ne.s32.totalorder %s209_s13, %s5517_s6  ;;  %p5522_p8 = scmp.lt.s32.totalorder %s209_s13, %s209_s13 }
  0xfc   :  { %p5523_p9 = scmp.lt.s32.totalorder %s5521_s22, %s5517_s6 }
  0xfe   :  { %p5524_p10 = por %p5523_p9, %p5522_p8 }
 0x100   :  { %p5525_p11 = pnand %p5524_p10, %p5518_p7 }
 0x102   :  { %5528 = shalt.err (!%p5525_p11)
}
 0x103   :  { %211 = dma.hbm_to_vmem [thread:$0]  %s5766_s27, 16, %s209_s13, [#allocation17]  }
 0x104   :  { %s5631_s25 = smov [#allocation21]   ;;  %s5632_s23 = smov [#allocation22]  }
 0x105   :  { %s230_s30 = sshll.u32 %s5631_s25, 4  ;;  %s242_s0 = sshll.u32 %s5632_s23, 4  ;;  %s231_s30 = int_to_ptr.vmem [resolvable:$true] %s230_s30  ;;  %s243_s0 = int_to_ptr.vmem [resolvable:$true] %s242_s0 }
 0x106   :  { %s5529_s20 = scalar_lea.hbm %s5781_s21, 16 }
 0x107   :  { %p5530_p12 = scmp.ne.s32.totalorder %s5781_s21, %s5529_s20  ;;  %p5533_p13 = scmp.lt.u32.totalorder %s5529_s20, %s5781_s21 }
 0x109   :  { %p5535_p0 = pnand %p5533_p13, %p5530_p12 }
 0x10b   :  { %5538 = shalt.err (!%p5535_p0)
}
 0x10c   :  { %s5539_s3 = scalar_lea.vmem %s231_s30, 16  ;;  %s5543_s26 = scalar_lea.vmem %s231_s30, 32 }
 0x10d   :  { %p5540_p1 = scmp.ne.s32.totalorder %s231_s30, %s5539_s3  ;;  %p5544_p2 = scmp.lt.s32.totalorder %s231_s30, %s231_s30 }
 0x10e   :  { %p5545_p3 = scmp.lt.s32.totalorder %s5543_s26, %s5539_s3 }
 0x110   :  { %p5546_p4 = por %p5545_p3, %p5544_p2 }
 0x112   :  { %p5547_p5 = pnand %p5546_p4, %p5540_p1 }
 0x114   :  { %5550 = shalt.err (!%p5547_p5)
}
 0x115   :  { %233 = dma.hbm_to_vmem [thread:$0]  %s5781_s21, 16, %s231_s30, [#allocation20]  }
 0x116   :  { %s5551_s27 = scalar_lea.hbm %s5791_s19, 16 }
 0x117   :  { %p5552_p6 = scmp.ne.s32.totalorder %s5791_s19, %s5551_s27  ;;  %p5555_p7 = scmp.lt.u32.totalorder %s5551_s27, %s5791_s19 }
 0x119   :  { %p5557_p8 = pnand %p5555_p7, %p5552_p6 }
 0x11b   :  { %5560 = shalt.err (!%p5557_p8)
}
 0x11c   :  { %s5561_s28 = scalar_lea.vmem %s243_s0, 16  ;;  %s5565_s1 = scalar_lea.vmem %s243_s0, 32 }
 0x11d   :  { %p5562_p9 = scmp.ne.s32.totalorder %s243_s0, %s5561_s28  ;;  %p5566_p10 = scmp.lt.s32.totalorder %s243_s0, %s243_s0 }
 0x11e   :  { %p5567_p11 = scmp.lt.s32.totalorder %s5565_s1, %s5561_s28 }
 0x120   :  { %p5568_p12 = por %p5567_p11, %p5566_p10 }
 0x122   :  { %p5569_p13 = pnand %p5568_p12, %p5562_p9 }
 0x124   :  { %5572 = shalt.err (!%p5569_p13)
}
 0x125   :  { %245 = dma.hbm_to_vmem [thread:$0]  %s5791_s19, 16, %s243_s0, [#allocation23]  }
 0x126   :  { %5573 = dma.done.wait [#allocation3], 16  }
 0x127   :  { %5574 = vsyncadd [#allocation3], 4294967280 }
 0x128   :  { %5575 = dma.done.wait [#allocation5], 32  }
 0x129   :  { %5576 = vsyncadd [#allocation5], 4294967264 }
 0x12a   :  { %5577 = dma.done.wait [#allocation8], 32  }
 0x12b   :  { %5578 = vsyncadd [#allocation8], 4294967264 }
 0x12c   :  { %5579 = dma.done.wait [#allocation11], 32  }
 0x12d   :  { %5580 = vsyncadd [#allocation11], 4294967264 }
 0x12e   :  { %5581 = dma.done.wait [#allocation14], 32  }
 0x12f   :  { %5582 = vsyncadd [#allocation14], 4294967264 }
 0x130   :  { %5583 = dma.done.wait [#allocation17], 32  }
 0x131   :  { %5584 = vsyncadd [#allocation17], 4294967264 }
 0x132   :  { %5585 = dma.done.wait [#allocation20], 32  }
 0x133   :  { %5586 = vsyncadd [#allocation20], 4294967264 }
 0x134   :  { %5587 = dma.done.wait [#allocation23], 16  }
 0x135   :  { %5588 = vsyncadd [#allocation23], 4294967280  ;;  %vm316_vm0 = vcmask 261120   ;;  %v5855_v0 = vld [vmem:[%s5646_s5] sm:$0xff]  ;;  %v5858_v1 = vld [vmem:[%s5646_s5 + $0x8] sm:$0xff]  ;;  %s6317_s21 = sld [smem:[#allocation38_spill]] }
 0x136   :  { %v317_v2 = vsel %vm316_vm0, %v5855_v0, 0.0  ;;  %v320_v3 = vsel %vm316_vm0, %v5858_v1, 0.0  ;;  %v296_v14 = vld [vmem:[%s5676_s29] sm:$0xff]  ;;  %v297_v15 = vld [vmem:[%s5676_s29 + $0x8] sm:$0xff]  ;;  %s6318_s5 = sld [smem:[#allocation37_spill]]  ;;  %v298_v19 = vld [vmem:[%s5676_s29 + $0x10] sm:$0xff] }
 0x137   :  { %318 = vadd.xlane.f32.xlu0 %v317_v2  ;;  %v5052_v17 = vpack.c.bf16 %v297_v15, %v296_v14  ;;  %v299_v20 = vld [vmem:[%s5676_s29 + $0x18] sm:$0xff]  ;;  %s6319_s19 = sld [smem:[#allocation35_spill]]  ;;  %s6320_s2 = sld [smem:[#allocation36_spill]]  ;;  %v5633_v48 = vmov 0.0   ;;  %vm5634_vm1 = vmmov 0   ;;  %vm619_vm2 = vcmask 64512  }
 0x138   :  { %v5056_v22 = vpack.c.bf16 %v299_v20, %v298_v19  ;;  %v4528_v49 = vld [vmem:[#allocation6] ss:$0 sm:$0xff]  ;;  %v4522_v55 = vld [vmem:[#allocation2] ss:$0 sm:$0xff]  ;;  %v4525_v56 = vld [vmem:[#allocation4] ss:$0 sm:$0xff] }
 0x139   :  { %5053 = vmatprep.subr.bf16.mxu1 %v5052_v17  ;;  %s6321_s29 = sld [smem:[#allocation33_spill]]  ;;  %s6322_s7 = sld [smem:[#allocation39_spill]]  ;;  %vm4392_vm3 = vcmask 523264  }
 0x13a   :  { %5055 = vmatpush3.bf16.msra.mxu1 %v5052_v17  ;;  %s5635_s24 = smov 120   ;;  %s5636_s9 = smov 112  }
 0x13b   :  { %321 = vadd.xlane.f32.xlu0 %v320_v3  ;;  %v306_v16 = vld [vmem:[%s6317_s21] sm:$0xff]  ;;  %v307_v18 = vld [vmem:[%s6317_s21 + $0x8] sm:$0xff]  ;;  %5057 = vmatprep.subr.bf16.mxu1 %v5056_v22  ;;  %v308_v23 = vld [vmem:[%s6317_s21 + $0x10] sm:$0xff]  ;;  %s5637_s14 = smov 104   ;;  %s6323_s10 = sld [smem:[#allocation41_spill]] }
 0x13c   :  { %v5068_v21 = vpack.c.bf16 %v307_v18, %v306_v16  ;;  %v309_v24 = vld [vmem:[%s6317_s21 + $0x18] sm:$0xff]  ;;  %v301_v26 = vld [vmem:[%s6318_s5] sm:$0xff]  ;;  %v302_v27 = vld [vmem:[%s6318_s5 + $0x8] sm:$0xff]  ;;  %s6324_s12 = sld [smem:[#allocation40_spill]]  ;;  %s6326_s13 = sld [smem:[#allocation42_spill]] }
 0x13d   :  { %v5072_v25 = vpack.c.bf16 %v309_v24, %v308_v23  ;;  %v5060_v28 = vpack.c.bf16 %v302_v27, %v301_v26  ;;  %v4520_v36 = vld [vmem:[%s6319_s19] ss:$0 sm:$0xff]  ;;  %v303_v43 = vld [vmem:[%s6318_s5 + $0x10] sm:$0xff]  ;;  %v304_v44 = vld [vmem:[%s6318_s5 + $0x18] sm:$0xff]  ;;  %s6325_s11 = sld [smem:[#allocation32_spill]]  ;;  %s6327_s15 = sld [smem:[#allocation34_spill]] }
 0x13e   :  { %5069 = vmatprep.subr.bf16.mxu0 %v5068_v21  ;;  %5059 = vmatpush3.bf16.msra.mxu1 %v5056_v22  ;;  %v4521_v38 = vld [vmem:[%s6320_s2] ss:$0 sm:$0xff]  ;;  %v5064_v47 = vpack.c.bf16 %v304_v44, %v303_v43  ;;  %s6328_s16 = sld [smem:[#allocation43_spill]]  ;;  %s6329_s18 = sld [smem:[#allocation44_spill]] }
 0x13f   :  { %5071 = vmatpush3.bf16.msra.mxu0 %v5068_v21  ;;  %5061 = vmatprep.subr.bf16.mxu1 %v5060_v28  ;;  %v311_v24 = vld [vmem:[%s6322_s7] sm:$0xff] }
 0x140   :  { %5073 = vmatprep.subr.bf16.mxu0 %v5072_v25 }
 0x143   :  { %5075 = vmatpush3.bf16.msra.mxu0 %v5072_v25 }
 0x144   :  { %4799 = vmatprep.subr.mxu0 %v5633_v48 }
 0x1c4   :  { %v319_v4 = vpop.xlane.xlu0 %318 }
 0x1c5   :  { %v324_v5 = vmul.f32 0.03125, %v319_v4  ;;  %v5924_v4 = vld [vmem:[%s6321_s29] sm:$0xff] }
 0x1c7   :  { %v326_v6 = vsub.f32 %v5855_v0, %v324_v5 }
 0x1c8   :  { %v322_v7 = vpop.xlane.xlu0 %321 }
 0x1c9   :  { %v325_v8 = vmul.f32 0.03125, %v322_v7  ;;  %v328_v9 = vmul.f32 %v326_v6, %v326_v6 }
 0x1cb   :  { %v327_v10 = vsub.f32 %v5858_v1, %v325_v8  ;;  %v330_v11 = vsel %vm316_vm0, %v328_v9, 0.0  ;;  %v5928_v8 = vld [vmem:[%s6321_s29 + $0x8] sm:$0xff] }
 0x1cc   :  { %331 = vadd.xlane.f32.xlu1 %v330_v11 }
 0x1cd   :  { %v329_v12 = vmul.f32 %v327_v10, %v327_v10 }
 0x1cf   :  { %v333_v13 = vsel %vm316_vm0, %v329_v12, 0.0 }
 0x1d0   :  { %334 = vadd.xlane.f32.xlu1 %v333_v13 }
 0x259   :  { %v332_v29 = vpop.xlane.xlu1 %331 }
 0x25a   :  { %v336_v30 = vmul.f32 0.03125, %v332_v29 }
 0x25c   :  { %v338_v31 = vadd.f32 1e-05, %v336_v30 }
 0x25d   :  { %v335_v32 = vpop.xlane.xlu1 %334 }
 0x25e   :  { %5189 = vrsqrt.f32 %v338_v31  ;;  %v337_v33 = vmul.f32 0.03125, %v335_v32 }
 0x260   :  { %v339_v34 = vadd.f32 1e-05, %v337_v33 }
 0x262   :  { %5191 = vrsqrt.f32 %v339_v34 }
 0x268   :  { %v5190_v35 = vpop.eup %5189 }
 0x269   :  { %v342_v37 = vmul.f32 %v5190_v35, %v326_v6 }
 0x26b   :  { %v350_v39 = vmul.f32 %v4520_v36, %v342_v37 }
 0x26c   :  { %v5192_v40 = vpop.eup %5191 }
 0x26d   :  { %v343_v41 = vmul.f32 %v5192_v40, %v327_v10  ;;  %v358_v42 = vadd.f32 %v4521_v38, %v350_v39 }
 0x26f   :  { %v351_v45 = vmul.f32 %v4520_v36, %v343_v41  ;;  %4764 = vmatprep.mubr.msk.f32.mxu1 %vm316_vm0, %v358_v42  ;;  %4786 = vmatprep.mubr.msk.f32.mxu0 %vm316_vm0, %v358_v42 }
 0x271   :  { %v359_v46 = vadd.f32 %v4521_v38, %v351_v45 }
 0x273   :  { %4765 = vmatmul.mubr.msk.f32.vlgmr.msra.gmra.mrb[0].mxu1 %vm316_vm0, %v359_v46  ;;  %4787 = vmatmul.mubr.msk.f32.vlgmr.msra.gmra.mrb[0].mxu0 %vm316_vm0, %v359_v46 }
 0x274   :  { %5063 = vmatpush3.bf16.msra.mxu1 %v5060_v28  ;;  %4775 = vmatprep.mubr.msk.f32.mxu1 %vm316_vm0, %v358_v42 }
 0x275   :  { %5065 = vmatprep.subr.bf16.mxu1 %v5064_v47  ;;  %4801 = vmatprep.mubr.msk.f32.mxu0 %vm5634_vm1, %v5633_v48 }
 0x278   :  { %5067 = vmatpush3.bf16.msra.mxu1 %v5064_v47 }
 0x279   :  { %4789 = vmatprep.subr.mxu1 %v5633_v48 }
 0x27b   :  { %4776 = vmatmul.mubr.msk.f32.vlgmr.msra.gmra.mrb[2].mxu1 %vm316_vm0, %v359_v46 }
 0x27c   :  { %4791 = vmatprep.mubr.msk.f32.mxu1 %vm5634_vm1, %v5633_v48 }
 0x346   :  { %v4766_v50 = vpop.f32.mrb[0].mxu1  ;;  %v4788_v51 = vpop.f32.mrb[0].mxu0 }
 0x347   :  { %v438_v52 = vpop.f32.mrb[1].mxu1  ;;  %v602_v53 = vpop.f32.mrb[1].mxu0  ;;  %v444_v61 = vadd.f32 %v4766_v50, %v4522_v55  ;;  %v5915_v3 = vadd.f32 %v4788_v51, %v4528_v49 }
 0x348   :  { %v5894_v54 = vadd.f32 %v4528_v49, %v602_v53  ;;  %v439_v58 = vadd.f32 %v4522_v55, %v438_v52 }
 0x349   :  { %v5912_v2 = vmul.f32 0.35355338, %v444_v61 }
 0x34a   :  { %4800 = vmatpush3.msra.mxu0 %v5894_v54  ;;  %v5901_v62 = vmul.f32 0.35355338, %v439_v58 }
 0x34b   :  { %4809 = vmatprep.subr.mxu0 %v311_v24 }
 0x34e   :  { %v4777_v57 = vpop.f32.mrb[2].mxu1 }
 0x34f   :  { %v521_v59 = vpop.f32.mrb[3].mxu1  ;;  %v5904_v63 = vadd.f32 %v4777_v57, %v4525_v56 }
 0x350   :  { %v5897_v60 = vadd.f32 %v4525_v56, %v521_v59 }
 0x352   :  { %4790 = vmatpush3.xpose.msk.msra.mxu1 %vm619_vm2, %v5897_v60 }
 0x353   :  { %4794 = vmatprep.subr.mxu1 %v5633_v48 }
 0x355   :  { %4792 = vmatmul.mubr.msk.f32.vlgmr.msra.gmra.mrb[4].mxu1 %vm619_vm2, %v5901_v62 }
 0x356   :  { %4795 = vmatpush3.xpose.msk.msra.mxu1 %vm619_vm2, %v5904_v63  ;;  %4796 = vmatprep.mubr.msk.f32.mxu1 %vm5634_vm1, %v5633_v48 }
 0x357   :  { %4804 = vmatprep.subr.mxu1 %v5633_v48 }
 0x359   :  { %4797 = vmatmul.mubr.msk.f32.vlgmr.msra.gmra.mrb[6].mxu1 %vm619_vm2, %v5912_v2 }
 0x35a   :  { %4805 = vmatpush3.msra.mxu1 %v5915_v3  ;;  %4806 = vmatprep.mubr.msk.f32.mxu1 %vm5634_vm1, %v5633_v48 }
 0x35b   :  { %4814 = vmatprep.subr.mxu1 %v5633_v48 }
 0x428   :  { %v692_v5 = vpop.f32.mrb[4].mxu1 }
 0x429   :  { %v693_v6 = vadd.f32 %v692_v5, %v5924_v4  ;;  %v4793_v7 = vpop.f32.mrb[5].mxu1 }
 0x42b   :  { %v772_v9 = vsel %vm619_vm2, %v693_v6, -inf }
 0x42c   :  { %773 = vmax.xlane.f32.xlu0 %v772_v9  ;;  %v768_v10 = vpop.f32.mrb[6].mxu1 }
 0x42d   :  { %v769_v11 = vadd.f32 %v768_v10, %v5928_v8  ;;  %v4798_v12 = vpop.f32.mrb[7].mxu1 }
 0x42f   :  { %v775_v13 = vsel %vm619_vm2, %v769_v11, -inf }
 0x430   :  { %776 = vmax.xlane.f32.xlu1 %v775_v13 }
 0x4b9   :  { %v774_v14 = vpop.xlane.xlu0 %773 }
 0x4ba   :  { %v778_v15 = vsub.f32 %v693_v6, %v774_v14 }
 0x4bc   :  { %v780_v16 = vmul.f32 1.442695, %v778_v15 }
 0x4bd   :  { %v777_v17 = vpop.xlane.xlu1 %776 }
 0x4be   :  { %5193 = vpow2.f32 %v780_v16  ;;  %v779_v18 = vsub.f32 %v769_v11, %v777_v17 }
 0x4c0   :  { %v782_v19 = vmul.f32 1.442695, %v779_v18 }
 0x4c2   :  { %5195 = vpow2.f32 %v782_v19 }
 0x4c8   :  { %v5194_v20 = vpop.eup %5193 }
 0x4c9   :  { %v784_v21 = vsel %vm619_vm2, %v5194_v20, 0.0 }
 0x4ca   :  { %785 = vadd.xlane.f32.xlu0 %v784_v21 }
 0x4cc   :  { %v5196_v22 = vpop.eup %5195 }
 0x4cd   :  { %v787_v23 = vsel %vm619_vm2, %v5196_v22, 0.0 }
 0x4ce   :  { %788 = vadd.xlane.f32.xlu1 %v787_v23 }
 0x4df   :  { %1023 = vrot.lane.b32.xlu1 %v5901_v62, %s5635_s24 }
 0x4e0   :  { %1025 = vrot.lane.b32.xlu0 %v5897_v60, %s5635_s24 }
 0x4e3   :  { %1103 = vrot.lane.b32.xlu1 %v5904_v63, %s5635_s24 }
 0x4e7   :  { %1101 = vrot.lane.b32.xlu1 %v5912_v2, %s5635_s24 }
 0x4eb   :  { %1440 = vrot.lane.b32.xlu1 %v5897_v60, %s5636_s9 }
 0x557   :  { %v786_v25 = vpop.xlane.xlu0 %785 }
 0x558   :  { %5197 = vrcp.f32 %v786_v25 }
 0x55b   :  { %v789_v26 = vpop.xlane.xlu1 %788  ;;  %v1026_v31 = vpop.permute.xlu0 %1025 }
 0x55c   :  { %5199 = vrcp.f32 %v789_v26 }
 0x55f   :  { %v1024_v32 = vpop.permute.xlu1 %1023 }
 0x562   :  { %v5198_v27 = vpop.eup %5197 }
 0x563   :  { %v792_v28 = vmul.f32 %v5198_v27, %v5194_v20  ;;  %v1104_v35 = vpop.permute.xlu1 %1103 }
 0x565   :  { %4802 = vmatmul.mubr.msk.f32.vlgmr.msra.gmra.mrb[2].mxu0 %vm619_vm2, %v792_v28 }
 0x566   :  { %v5200_v29 = vpop.eup %5199  ;;  %4810 = vmatpush3.msra.mxu0 %v311_v24  ;;  %v312_v24 = vld [vmem:[%s6322_s7 + $0x8] sm:$0xff] }
 0x567   :  { %v793_v30 = vmul.f32 %v5200_v29, %v5196_v22  ;;  %4819 = vmatprep.subr.mxu0 %v5633_v48  ;;  %v1102_v38 = vpop.permute.xlu1 %1101 }
 0x569   :  { %4807 = vmatmul.mubr.msk.f32.vlgmr.msra.gmra.mrb[8].mxu1 %vm619_vm2, %v793_v30 }
 0x56a   :  { %4815 = vmatpush3.xpose.msk.msra.mxu1 %vm619_vm2, %v1026_v31  ;;  %4816 = vmatprep.mubr.msk.f32.mxu1 %vm5634_vm1, %v5633_v48 }
 0x56b   :  { %4824 = vmatprep.subr.mxu1 %v5633_v48  ;;  %v1441_v55 = vpop.permute.xlu1 %1440 }
 0x56d   :  { %4817 = vmatmul.mubr.msk.f32.vlgmr.msra.gmra.mrb[10].mxu1 %vm619_vm2, %v1024_v32 }
 0x56e   :  { %4826 = vmatprep.mubr.msk.f32.mxu1 %vm5634_vm1, %v5633_v48 }
 0x638   :  { %v863_v33 = vpop.f32.mrb[2].mxu0 }
 0x639   :  { %v4803_v34 = vpop.f32.mrb[3].mxu0  ;;  %4811 = vmatprep.mubr.msk.f32.mxu0 %vm619_vm2, %v863_v33 }
 0x63c   :  { %v936_v36 = vpop.f32.mrb[8].mxu1 }
 0x63d   :  { %v4808_v37 = vpop.f32.mrb[9].mxu1  ;;  %4812 = vmatmul.mubr.msk.f32.vlgmr.msra.gmra.mrb[4].mxu0 %vm619_vm2, %v936_v36 }
 0x63e   :  { %4820 = vmatpush3.xpose.msk.msra.mxu0 %vm619_vm2, %v1104_v35  ;;  %4821 = vmatprep.mubr.msk.f32.mxu0 %vm5634_vm1, %v5633_v48 }
 0x63f   :  { %4829 = vmatprep.subr.mxu0 %v5633_v48 }
 0x640   :  { %v1097_v39 = vpop.f32.mrb[10].mxu1 }
 0x641   :  { %v1098_v40 = vadd.f32 %v1097_v39, %v5924_v4  ;;  %v4818_v41 = vpop.f32.mrb[11].mxu1  ;;  %4822 = vmatmul.mubr.msk.f32.vlgmr.msra.gmra.mrb[6].mxu0 %vm619_vm2, %v1102_v38  ;;  %v313_v39 = vld [vmem:[%s6322_s7 + $0x10] sm:$0xff] }
 0x642   :  { %4831 = vmatprep.mubr.msk.f32.mxu0 %vm5634_vm1, %v5633_v48 }
 0x643   :  { %v1179_v42 = vsel %vm619_vm2, %v1098_v40, -inf }
 0x644   :  { %1180 = vmax.xlane.f32.xlu0 %v1179_v42 }
 0x65a   :  { %1202 = vrot.lane.b32.xlu0 %v5894_v54, %s5635_s24 }
 0x65e   :  { %1438 = vrot.lane.b32.xlu0 %v5901_v62, %s5636_s9 }
 0x662   :  { %1516 = vrot.lane.b32.xlu0 %v5912_v2, %s5636_s9 }
 0x6d1   :  { %v1181_v43 = vpop.xlane.xlu0 %1180 }
 0x6d2   :  { %v1185_v44 = vsub.f32 %v1098_v40, %v1181_v43 }
 0x6d4   :  { %v1187_v45 = vmul.f32 1.442695, %v1185_v44 }
 0x6d5   :  { %v1203_v46 = vpop.permute.xlu0 %1202 }
 0x6d6   :  { %5201 = vpow2.f32 %v1187_v45  ;;  %4825 = vmatpush3.msra.mxu1 %v1203_v46 }
 0x6d7   :  { %4839 = vmatprep.subr.mxu1 %v5633_v48 }
 0x6d9   :  { %v1439_v59 = vpop.permute.xlu0 %1438 }
 0x6dd   :  { %v1517_v5 = vpop.permute.xlu0 %1516 }
 0x6e0   :  { %v5202_v47 = vpop.eup %5201 }
 0x6e1   :  { %v1191_v49 = vsel %vm619_vm2, %v5202_v47, 0.0 }
 0x6e2   :  { %1192 = vadd.xlane.f32.xlu1 %v1191_v49 }
 0x6f3   :  { %1518 = vrot.lane.b32.xlu1 %v5904_v63, %s5636_s9 }
 0x714   :  { %v1175_v50 = vpop.f32.mrb[6].mxu0 }
 0x715   :  { %v1176_v51 = vadd.f32 %v1175_v50, %v5928_v8  ;;  %v4823_v52 = vpop.f32.mrb[7].mxu0 }
 0x717   :  { %v1182_v53 = vsel %vm619_vm2, %v1176_v51, -inf }
 0x718   :  { %1183 = vmax.xlane.f32.xlu1 %v1182_v53 }
 0x76f   :  { %v1193_v56 = vpop.xlane.xlu1 %1192 }
 0x770   :  { %5203 = vrcp.f32 %v1193_v56 }
 0x773   :  { %v1519_v61 = vpop.permute.xlu1 %1518 }
 0x77a   :  { %v5204_v57 = vpop.eup %5203 }
 0x77b   :  { %v1199_v58 = vmul.f32 %v5204_v57, %v5202_v47 }
 0x77d   :  { %4827 = vmatmul.mubr.msk.f32.vlgmr.msra.gmra.mrb[12].mxu1 %vm619_vm2, %v1199_v58 }
 0x77e   :  { %4840 = vmatpush3.xpose.msk.msra.mxu1 %vm619_vm2, %v1441_v55  ;;  %4841 = vmatprep.mubr.msk.f32.mxu1 %vm5634_vm1, %v5633_v48 }
 0x77f   :  { %4844 = vmatprep.subr.mxu1 %v5633_v48 }
 0x781   :  { %4842 = vmatmul.mubr.msk.f32.vlgmr.msra.gmra.mrb[14].mxu1 %vm619_vm2, %v1439_v59 }
 0x782   :  { %4845 = vmatpush3.xpose.msk.msra.mxu1 %vm619_vm2, %v1519_v61  ;;  %4846 = vmatprep.mubr.msk.f32.mxu1 %vm5634_vm1, %v5633_v48 }
 0x783   :  { %4854 = vmatprep.subr.mxu1 %v5633_v48 }
 0x785   :  { %4847 = vmatmul.mubr.msk.f32.vlgmr.msra.gmra.mrb[16].mxu1 %vm619_vm2, %v1517_v5 }
 0x786   :  { %4856 = vmatprep.mubr.msk.f32.mxu1 %vm5634_vm1, %v5633_v48 }
 0x7a5   :  { %v1184_v6 = vpop.xlane.xlu1 %1183 }
 0x7a6   :  { %v1186_v7 = vsub.f32 %v1176_v51, %v1184_v6 }
 0x7a8   :  { %v1189_v9 = vmul.f32 1.442695, %v1186_v7 }
 0x7aa   :  { %5205 = vpow2.f32 %v1189_v9 }
 0x7b4   :  { %v5206_v10 = vpop.eup %5205 }
 0x7b5   :  { %v1194_v11 = vsel %vm619_vm2, %v5206_v10, 0.0 }
 0x7b6   :  { %1195 = vadd.xlane.f32.xlu0 %v1194_v11 }
 0x7cc   :  { %1279 = vrot.lane.b32.xlu0 %v5915_v3, %s5635_s24 }
 0x7d0   :  { %1692 = vrot.lane.b32.xlu0 %v5915_v3, %s5636_s9 }
 0x7d4   :  { %1853 = vrot.lane.b32.xlu0 %v5897_v60, %s5637_s14 }
 0x7d8   :  { %1931 = vrot.lane.b32.xlu0 %v5904_v63, %s5637_s14 }
 0x7dc   :  { %1851 = vrot.lane.b32.xlu0 %v5901_v62, %s5637_s14 }
 0x843   :  { %v1196_v12 = vpop.xlane.xlu0 %1195 }
 0x844   :  { %5207 = vrcp.f32 %v1196_v12 }
 0x847   :  { %v1280_v13 = vpop.permute.xlu0 %1279 }
 0x848   :  { %4830 = vmatpush3.msra.mxu0 %v1280_v13 }
 0x849   :  { %4834 = vmatprep.subr.mxu0 %v312_v24 }
 0x84b   :  { %v1693_v14 = vpop.permute.xlu0 %1692 }
 0x84c   :  { %4855 = vmatpush3.msra.mxu1 %v1693_v14 }
 0x84d   :  { %4864 = vmatprep.subr.mxu1 %v5633_v48 }
 0x84e   :  { %v5208_v15 = vpop.eup %5207 }
 0x84f   :  { %v1200_v16 = vmul.f32 %v5208_v15, %v5206_v10  ;;  %v1854_v41 = vpop.permute.xlu0 %1853 }
 0x850   :  { %v1274_v17 = vpop.f32.mrb[12].mxu1 }
 0x851   :  { %v4828_v18 = vpop.f32.mrb[13].mxu1  ;;  %4832 = vmatmul.mubr.msk.f32.vlgmr.msra.gmra.mrb[8].mxu0 %vm619_vm2, %v1200_v16 }
 0x852   :  { %4836 = vmatprep.mubr.msk.f32.mxu0 %vm619_vm2, %v1274_v17  ;;  %4835 = vmatpush3.msra.mxu0 %v312_v24 }
 0x853   :  { %4849 = vmatprep.subr.mxu0 %v5633_v48  ;;  %v1932_v44 = vpop.permute.xlu0 %1931 }
 0x854   :  { %v1512_v60 = vpop.f32.mrb[14].mxu1 }
 0x855   :  { %v1513_v62 = vadd.f32 %v1512_v60, %v5924_v4  ;;  %v4843_v63 = vpop.f32.mrb[15].mxu1 }
 0x857   :  { %v1594_v19 = vsel %vm619_vm2, %v1513_v62, -inf  ;;  %v1852_v46 = vpop.permute.xlu0 %1851 }
 0x858   :  { %1595 = vmax.xlane.f32.xlu1 %v1594_v19  ;;  %v1590_v20 = vpop.f32.mrb[16].mxu1  ;;  %v314_v19 = vld [vmem:[%s6322_s7 + $0x18] sm:$0xff] }
 0x859   :  { %v1591_v21 = vadd.f32 %v1590_v20, %v5928_v8  ;;  %v4848_v22 = vpop.f32.mrb[17].mxu1 }
 0x85b   :  { %v1597_v23 = vsel %vm619_vm2, %v1591_v21, -inf }
 0x85c   :  { %1598 = vmax.xlane.f32.xlu1 %v1597_v23  ;;  %v4531_v23 = vld [vmem:[#allocation7] ss:$0 sm:$0xff] }
 0x85d   :  { %v618_v24 = vadd.f32 %v4531_v23, %v5858_v1 }
 0x8e5   :  { %v1596_v25 = vpop.xlane.xlu1 %1595 }
 0x8e6   :  { %v1600_v26 = vsub.f32 %v1513_v62, %v1596_v25  ;;  %v617_v25 = vadd.f32 %v4531_v23, %v5855_v0 }
 0x8e8   :  { %v1602_v27 = vmul.f32 1.442695, %v1600_v26 }
 0x8e9   :  { %v1599_v28 = vpop.xlane.xlu1 %1598 }
 0x8ea   :  { %5209 = vpow2.f32 %v1602_v27  ;;  %v1601_v29 = vsub.f32 %v1591_v21, %v1599_v28 }
 0x8ec   :  { %v1604_v30 = vmul.f32 1.442695, %v1601_v29 }
 0x8ee   :  { %5211 = vpow2.f32 %v1604_v30 }
 0x8f4   :  { %v5210_v31 = vpop.eup %5209 }
 0x8f5   :  { %v1606_v32 = vsel %vm619_vm2, %v5210_v31, 0.0 }
 0x8f6   :  { %1607 = vadd.xlane.f32.xlu1 %v1606_v32 }
 0x8f8   :  { %v5212_v33 = vpop.eup %5211 }
 0x8f9   :  { %v1609_v34 = vsel %vm619_vm2, %v5212_v33, 0.0 }
 0x8fa   :  { %1610 = vadd.xlane.f32.xlu1 %v1609_v34 }
 0x90b   :  { %1616 = vrot.lane.b32.xlu1 %v5894_v54, %s5636_s9 }
 0x90f   :  { %1929 = vrot.lane.b32.xlu1 %v5912_v2, %s5637_s14 }
 0x924   :  { %v1351_v35 = vpop.f32.mrb[8].mxu0 }
 0x925   :  { %v4833_v36 = vpop.f32.mrb[9].mxu0  ;;  %4837 = vmatmul.mubr.msk.f32.vlgmr.msra.gmra.mrb[4].mxu0 %vm619_vm2, %v1351_v35 }
 0x926   :  { %4851 = vmatprep.mubr.msk.f32.mxu0 %vm5634_vm1, %v5633_v48 }
 0x983   :  { %v1608_v37 = vpop.xlane.xlu1 %1607 }
 0x984   :  { %5213 = vrcp.f32 %v1608_v37 }
 0x987   :  { %v1611_v38 = vpop.xlane.xlu1 %1610 }
 0x988   :  { %5215 = vrcp.f32 %v1611_v38 }
 0x98b   :  { %v1617_v40 = vpop.permute.xlu1 %1616 }
 0x98c   :  { %4850 = vmatpush3.msra.mxu0 %v1617_v40  ;;  %v2273_v40 = vld [vmem:[%s6323_s10] sm:$0xff] }
 0x98d   :  { %4859 = vmatprep.subr.mxu0 %v313_v39 }
 0x98e   :  { %v5214_v42 = vpop.eup %5213 }
 0x98f   :  { %v1614_v43 = vmul.f32 %v5214_v42, %v5210_v31  ;;  %v1930_v52 = vpop.permute.xlu1 %1929 }
 0x991   :  { %4852 = vmatmul.mubr.msk.f32.vlgmr.msra.gmra.mrb[10].mxu0 %vm619_vm2, %v1614_v43  ;;  %v2268_v43 = vld [vmem:[%s6324_s12] sm:$0xff] }
 0x992   :  { %v5216_v2 = vpop.eup %5215  ;;  %4860 = vmatpush3.msra.mxu0 %v313_v39 }
 0x993   :  { %v1615_v45 = vmul.f32 %v5216_v2, %v5212_v33  ;;  %4869 = vmatprep.subr.mxu0 %v5633_v48  ;;  %v2269_v2 = vld [vmem:[%s6324_s12 + $0x8] sm:$0xff] }
 0x995   :  { %4857 = vmatmul.mubr.msk.f32.vlgmr.msra.gmra.mrb[18].mxu1 %vm619_vm2, %v1615_v45  ;;  %v2275_v45 = vld [vmem:[%s6323_s10 + $0x10] sm:$0xff] }
 0x996   :  { %4865 = vmatpush3.xpose.msk.msra.mxu1 %vm619_vm2, %v1854_v41  ;;  %4866 = vmatprep.mubr.msk.f32.mxu1 %vm5634_vm1, %v5633_v48  ;;  %v2274_v41 = vld [vmem:[%s6323_s10 + $0x8] sm:$0xff] }
 0x997   :  { %4874 = vmatprep.subr.mxu1 %v5633_v48  ;;  %v5084_v42 = vpack.c.bf16 %v2274_v41, %v2273_v40 }
 0x999   :  { %4867 = vmatmul.mubr.msk.f32.vlgmr.msra.gmra.mrb[20].mxu1 %vm619_vm2, %v1852_v46  ;;  %v2276_v46 = vld [vmem:[%s6323_s10 + $0x18] sm:$0xff] }
 0x99a   :  { %4876 = vmatprep.mubr.msk.f32.mxu1 %vm5634_vm1, %v5633_v48 }
 0xa64   :  { %v1688_v47 = vpop.f32.mrb[10].mxu0 }
 0xa65   :  { %v4853_v49 = vpop.f32.mrb[11].mxu0  ;;  %4861 = vmatprep.mubr.msk.f32.mxu0 %vm619_vm2, %v1688_v47  ;;  %v2270_v47 = vld [vmem:[%s6324_s12 + $0x10] sm:$0xff] }
 0xa66   :  { %v5088_v49 = vpack.c.bf16 %v2276_v46, %v2275_v45 }
 0xa68   :  { %v1764_v50 = vpop.f32.mrb[18].mxu1 }
 0xa69   :  { %v4858_v51 = vpop.f32.mrb[19].mxu1  ;;  %4862 = vmatmul.mubr.msk.f32.vlgmr.msra.gmra.mrb[4].mxu0 %vm619_vm2, %v1764_v50  ;;  %v2271_v50 = vld [vmem:[%s6324_s12 + $0x18] sm:$0xff] }
 0xa6a   :  { %4870 = vmatpush3.xpose.msk.msra.mxu0 %vm619_vm2, %v1932_v44  ;;  %4871 = vmatprep.mubr.msk.f32.mxu0 %vm5634_vm1, %v5633_v48  ;;  %v5076_v44 = vpack.c.bf16 %v2269_v2, %v2268_v43  ;;  %v290_v51 = vld [vmem:[%s6325_s11] sm:$0xff] }
 0xa6b   :  { %4879 = vmatprep.subr.mxu0 %v5633_v48 }
 0xa6c   :  { %v1925_v53 = vpop.f32.mrb[20].mxu1 }
 0xa6d   :  { %v1926_v55 = vadd.f32 %v1925_v53, %v5924_v4  ;;  %v4868_v56 = vpop.f32.mrb[21].mxu1  ;;  %4872 = vmatmul.mubr.msk.f32.vlgmr.msra.gmra.mrb[12].mxu0 %vm619_vm2, %v1930_v52  ;;  %v5080_v52 = vpack.c.bf16 %v2271_v50, %v2270_v47  ;;  %v291_v53 = vld [vmem:[%s6325_s11 + $0x8] sm:$0xff] }
 0xa6e   :  { %4881 = vmatprep.mubr.msk.f32.mxu0 %vm5634_vm1, %v5633_v48  ;;  %v2279_v56 = vld [vmem:[%s6326_s13 + $0x8] sm:$0xff] }
 0xa6f   :  { %v2007_v57 = vsel %vm619_vm2, %v1926_v55, -inf }
 0xa70   :  { %2008 = vmax.xlane.f32.xlu0 %v2007_v57 }
 0xafd   :  { %v2009_v58 = vpop.xlane.xlu0 %2008 }
 0xafe   :  { %v2013_v59 = vsub.f32 %v1926_v55, %v2009_v58  ;;  %v2278_v55 = vld [vmem:[%s6326_s13] sm:$0xff] }
 0xaff   :  { %v5092_v57 = vpack.c.bf16 %v2279_v56, %v2278_v55 }
 0xb00   :  { %v2015_v61 = vmul.f32 1.442695, %v2013_v59 }
 0xb02   :  { %5217 = vpow2.f32 %v2015_v61 }
 0xb0c   :  { %v5218_v5 = vpop.eup %5217 }
 0xb0d   :  { %v2019_v6 = vsel %vm619_vm2, %v5218_v5, 0.0 }
 0xb0e   :  { %2020 = vadd.xlane.f32.xlu0 %v2019_v6 }
 0xb40   :  { %v2003_v7 = vpop.f32.mrb[12].mxu0 }
 0xb41   :  { %v2004_v4 = vadd.f32 %v2003_v7, %v5928_v8  ;;  %v4873_v9 = vpop.f32.mrb[13].mxu0 }
 0xb42   :  { %v4564_v9 = vld [vmem:[#allocation9] ss:$0 sm:$0xff] }
 0xb43   :  { %v2010_v10 = vsel %vm619_vm2, %v2004_v4, -inf }
 0xb44   :  { %2011 = vmax.xlane.f32.xlu1 %v2010_v10 }
 0xb55   :  { %2105 = vrot.lane.b32.xlu1 %v5915_v3, %s5637_s14 }
 0xb9b   :  { %v2021_v8 = vpop.xlane.xlu0 %2020 }
 0xbd1   :  { %v2012_v11 = vpop.xlane.xlu1 %2011 }
 0xbd2   :  { %v2014_v12 = vsub.f32 %v2004_v4, %v2012_v11 }
 0xbd4   :  { %v2017_v13 = vmul.f32 1.442695, %v2014_v12 }
 0xbd5   :  { %v2106_v14 = vpop.permute.xlu1 %2105 }
 0xbd6   :  { %5219 = vpow2.f32 %v2017_v13  ;;  %4880 = vmatpush3.msra.mxu0 %v2106_v14  ;;  %v4565_v13 = vld [vmem:[#allocation10] ss:$0 sm:$0xff] }
 0xbd7   :  { %5221 = vrcp.f32 %v2021_v8  ;;  %4884 = vmatprep.subr.mxu0 %v314_v19  ;;  %v2281_v8 = vld [vmem:[%s6326_s13 + $0x18] sm:$0xff] }
 0xbe0   :  { %v5220_v15 = vpop.eup %5219 }
 0xbe1   :  { %v2022_v16 = vsel %vm619_vm2, %v5220_v15, 0.0  ;;  %v5222_v18 = vpop.eup %5221 }
 0xbe2   :  { %2023 = vadd.xlane.f32.xlu0 %v2022_v16  ;;  %v2027_v3 = vmul.f32 %v5222_v18, %v5218_v5  ;;  %v2280_v16 = vld [vmem:[%s6326_s13 + $0x10] sm:$0xff] }
 0xbf8   :  { %2029 = vrot.lane.b32.xlu0 %v5894_v54, %s5637_s14 }
 0xc6f   :  { %v2024_v17 = vpop.xlane.xlu0 %2023 }
 0xc70   :  { %5223 = vrcp.f32 %v2024_v17 }
 0xc73   :  { %v2030_v60 = vpop.permute.xlu0 %2029 }
 0xc74   :  { %4875 = vmatpush3.msra.mxu1 %v2030_v60  ;;  %v4569_v60 = vld [vmem:[#allocation13] ss:$0 sm:$0xff] }
 0xc75   :  { %4877 = vmatmul.mubr.msk.f32.vlgmr.msra.gmra.mrb[22].mxu1 %vm619_vm2, %v2027_v3  ;;  %5077 = vmatprep.subr.bf16.mxu1 %v5076_v44  ;;  %v5096_v3 = vpack.c.bf16 %v2281_v8, %v2280_v16 }
 0xc76   :  { %5079 = vmatpush3.bf16.msra.mxu1 %v5076_v44 }
 0xc77   :  { %5081 = vmatprep.subr.bf16.mxu1 %v5080_v52 }
 0xc7a   :  { %v5224_v62 = vpop.eup %5223  ;;  %5083 = vmatpush3.bf16.msra.mxu1 %v5080_v52  ;;  %v2283_v52 = vld [vmem:[%s6328_s16] sm:$0xff] }
 0xc7b   :  { %v2028_v63 = vmul.f32 %v5224_v62, %v5220_v15  ;;  %5093 = vmatprep.subr.bf16.mxu1 %v5092_v57 }
 0xc7d   :  { %4882 = vmatmul.mubr.msk.f32.vlgmr.msra.gmra.mrb[14].mxu0 %vm619_vm2, %v2028_v63 }
 0xc7e   :  { %4885 = vmatpush3.msra.mxu0 %v314_v19 }
 0xc7f   :  { %5085 = vmatprep.subr.bf16.mxu0 %v5084_v42 }
 0xd48   :  { %v2101_v20 = vpop.f32.mrb[22].mxu1 }
 0xd49   :  { %v4878_v21 = vpop.f32.mrb[23].mxu1  ;;  %4886 = vmatprep.mubr.msk.f32.mxu0 %vm619_vm2, %v2101_v20 }
 0xd4a   :  { %v4566_v21 = vld [vmem:[#allocation12] ss:$0 sm:$0xff] }
 0xd50   :  { %v2177_v54 = vpop.f32.mrb[14].mxu0 }
 0xd51   :  { %v4883_v22 = vpop.f32.mrb[15].mxu0  ;;  %4887 = vmatmul.mubr.msk.f32.vlgmr.msra.gmra.mrb[4].mxu0 %vm619_vm2, %v2177_v54 }
 0xd52   :  { %5087 = vmatpush3.bf16.msra.mxu0 %v5084_v42  ;;  %4908 = vmatprep.mubr.msk.f32.mxu0 %vm316_vm0, %v290_v51 }
 0xd53   :  { %5089 = vmatprep.subr.bf16.mxu0 %v5088_v49 }
 0xd56   :  { %5091 = vmatpush3.bf16.msra.mxu0 %v5088_v49 }
 0xd57   :  { %4922 = vmatprep.subr.mxu0 %v5633_v48 }
 0xd59   :  { %4909 = vmatmul.mubr.msk.f32.vlgmr.msra.gmra.mrb[16].mxu0 %vm316_vm0, %v291_v53 }
 0xd5a   :  { %4924 = vmatprep.mubr.msk.f32.mxu0 %vm5634_vm1, %v5633_v48 }
 0xe24   :  { %v4888_v26 = vpop.f32.mrb[4].mxu0 }
 0xe25   :  { %v6058_v27 = vadd.f32 %v4888_v26, %v618_v24  ;;  %v2253_v28 = vpop.f32.mrb[5].mxu0 }
 0xe26   :  { %v6060_v29 = vadd.f32 %v2253_v28, %v617_v25  ;;  %v4572_v28 = vld [vmem:[#allocation15] ss:$0 sm:$0xff] }
 0xe27   :  { %v2291_v30 = vsel %vm316_vm0, %v6058_v27, 0.0 }
 0xe28   :  { %2292 = vadd.xlane.f32.xlu0 %v2291_v30  ;;  %v2288_v31 = vsel %vm316_vm0, %v6060_v29, 0.0 }
 0xe29   :  { %2289 = vadd.xlane.f32.xlu1 %v2288_v31 }
 0xe2c   :  { %v4910_v62 = vpop.f32.mrb[16].mxu0 }
 0xe2d   :  { %v6096_v63 = vadd.f32 %v4910_v62, %v4569_v60  ;;  %v2497_v19 = vpop.f32.mrb[17].mxu0 }
 0xe2e   :  { %v6098_v20 = vadd.f32 %v4569_v60, %v2497_v19 }
 0xe30   :  { %4923 = vmatpush3.xpose.msk.msra.mxu0 %vm619_vm2, %v6098_v20 }
 0xe31   :  { %4932 = vmatprep.subr.mxu0 %v5633_v48 }
 0xeb5   :  { %v2293_v1 = vpop.xlane.xlu0 %2292 }
 0xeb6   :  { %v2295_v0 = vmul.f32 0.03125, %v2293_v1  ;;  %v2290_v32 = vpop.xlane.xlu1 %2289 }
 0xeb7   :  { %v2294_v33 = vmul.f32 0.03125, %v2290_v32  ;;  %v6126_v32 = vld [vmem:[%s6327_s15 + $0x8] sm:$0xff] }
 0xeb8   :  { %v2297_v34 = vsub.f32 %v6058_v27, %v2295_v0 }
 0xeb9   :  { %v2296_v35 = vsub.f32 %v6060_v29, %v2294_v33  ;;  %v6129_v33 = vld [vmem:[%s6327_s15] sm:$0xff] }
 0xeba   :  { %v2299_v36 = vmul.f32 %v2297_v34, %v2297_v34 }
 0xebb   :  { %v2298_v37 = vmul.f32 %v2296_v35, %v2296_v35 }
 0xebc   :  { %v2303_v38 = vsel %vm316_vm0, %v2299_v36, 0.0 }
 0xebd   :  { %2304 = vadd.xlane.f32.xlu1 %v2303_v38  ;;  %v2300_v39 = vsel %vm316_vm0, %v2298_v37, 0.0 }
 0xebe   :  { %2301 = vadd.xlane.f32.xlu0 %v2300_v39 }
 0xf4a   :  { %v2305_v58 = vpop.xlane.xlu1 %2304 }
 0xf4b   :  { %v2307_v59 = vmul.f32 0.03125, %v2305_v58  ;;  %v2302_v61 = vpop.xlane.xlu0 %2301 }
 0xf4c   :  { %v2306_v5 = vmul.f32 0.03125, %v2302_v61 }
 0xf4d   :  { %v2309_v6 = vadd.f32 1e-05, %v2307_v59 }
 0xf4e   :  { %v2308_v7 = vadd.f32 1e-05, %v2306_v5 }
 0xf4f   :  { %5225 = vrsqrt.f32 %v2309_v6 }
 0xf50   :  { %5227 = vrsqrt.f32 %v2308_v7 }
 0xf59   :  { %v5226_v4 = vpop.eup %5225 }
 0xf5a   :  { %v5228_v10 = vpop.eup %5227  ;;  %v2313_v11 = vmul.f32 %v5226_v4, %v2297_v34 }
 0xf5b   :  { %v2312_v12 = vmul.f32 %v5228_v10, %v2296_v35 }
 0xf5c   :  { %v2321_v14 = vmul.f32 %v4564_v9, %v2313_v11 }
 0xf5d   :  { %v2320_v15 = vmul.f32 %v4564_v9, %v2312_v12 }
 0xf5e   :  { %v2329_v18 = vadd.f32 %v4565_v13, %v2321_v14 }
 0xf5f   :  { %v2328_v17 = vadd.f32 %v4565_v13, %v2320_v15 }
 0xf61   :  { %4897 = vmatprep.mubr.msk.f32.mxu1 %vm316_vm0, %v2328_v17 }
 0xf62   :  { %4898 = vmatmul.mubr.msk.f32.vlgmr.msra.gmra.mrb[24].mxu1 %vm316_vm0, %v2329_v18 }
 0xf63   :  { %5095 = vmatpush3.bf16.msra.mxu1 %v5092_v57  ;;  %4919 = vmatprep.mubr.msk.f32.mxu1 %vm316_vm0, %v290_v51 }
 0xf64   :  { %5097 = vmatprep.subr.bf16.mxu1 %v5096_v3 }
 0xf67   :  { %5099 = vmatpush3.bf16.msra.mxu1 %v5096_v3 }
 0xf68   :  { %4927 = vmatprep.subr.mxu1 %v5633_v48 }
 0xf6a   :  { %4920 = vmatmul.mubr.msk.f32.vlgmr.msra.gmra.mrb[26].mxu1 %vm316_vm0, %v291_v53 }
 0xf6b   :  { %4929 = vmatprep.mubr.msk.f32.mxu1 %vm5634_vm1, %v5633_v48 }
 0xf70   :  { %4928 = vmatpush3.xpose.msk.msra.mxu1 %vm619_vm2, %v6096_v63 }
 0xf71   :  { %4937 = vmatprep.subr.mxu1 %v5633_v48 }
0x1035   :  { %v4899_v54 = vpop.f32.mrb[24].mxu1 }
0x1036   :  { %v2414_v22 = vadd.f32 %v4899_v54, %v4566_v21  ;;  %v2408_v23 = vpop.f32.mrb[25].mxu1 }
0x1037   :  { %v2409_v24 = vadd.f32 %v4566_v21, %v2408_v23 }
0x1038   :  { %v6106_v25 = vmul.f32 0.35355338, %v2414_v22 }
0x1039   :  { %v6108_v26 = vmul.f32 0.35355338, %v2409_v24 }
0x103a   :  { %4930 = vmatmul.mubr.msk.f32.vlgmr.msra.gmra.mrb[28].mxu1 %vm619_vm2, %v6106_v25 }
0x103b   :  { %4925 = vmatmul.mubr.msk.f32.vlgmr.msra.gmra.mrb[18].mxu0 %vm619_vm2, %v6108_v26  ;;  %4939 = vmatprep.mubr.msk.f32.mxu1 %vm5634_vm1, %v5633_v48 }
0x103c   :  { %4934 = vmatprep.mubr.msk.f32.mxu0 %vm5634_vm1, %v5633_v48 }
0x103d   :  { %v4921_v30 = vpop.f32.mrb[26].mxu1 }
0x103e   :  { %v6118_v31 = vadd.f32 %v4921_v30, %v4572_v28  ;;  %v2578_v1 = vpop.f32.mrb[27].mxu1 }
0x103f   :  { %v6120_v0 = vadd.f32 %v4572_v28, %v2578_v1 }
0x1040   :  { %4938 = vmatpush3.msra.mxu1 %v6118_v31 }
0x1041   :  { %4933 = vmatpush3.msra.mxu0 %v6120_v0  ;;  %4947 = vmatprep.subr.mxu1 %v5633_v48 }
0x1042   :  { %4942 = vmatprep.subr.mxu0 %v2283_v52 }
0x110d   :  { %v2743_v34 = vpop.f32.mrb[28].mxu1 }
0x110e   :  { %v2744_v35 = vadd.f32 %v2743_v34, %v6126_v32  ;;  %v2667_v36 = vpop.f32.mrb[18].mxu0  ;;  %v4931_v37 = vpop.f32.mrb[29].mxu1 }
0x110f   :  { %v2668_v38 = vadd.f32 %v2667_v36, %v6129_v33  ;;  %v4926_v39 = vpop.f32.mrb[19].mxu0 }
0x1110   :  { %v2750_v40 = vsel %vm619_vm2, %v2744_v35, -inf }
0x1111   :  { %2751 = vmax.xlane.f32.xlu1 %v2750_v40  ;;  %v2747_v41 = vsel %vm619_vm2, %v2668_v38, -inf }
0x1112   :  { %2748 = vmax.xlane.f32.xlu0 %v2747_v41 }
0x119e   :  { %v2752_v42 = vpop.xlane.xlu1 %2751 }
0x119f   :  { %v2754_v43 = vsub.f32 %v2744_v35, %v2752_v42  ;;  %v2749_v2 = vpop.xlane.xlu0 %2748 }
0x11a0   :  { %v2753_v44 = vsub.f32 %v2668_v38, %v2749_v2 }
0x11a1   :  { %v2757_v45 = vmul.f32 1.442695, %v2754_v43 }
0x11a2   :  { %v2755_v46 = vmul.f32 1.442695, %v2753_v44 }
0x11a3   :  { %5229 = vpow2.f32 %v2757_v45 }
0x11a4   :  { %5231 = vpow2.f32 %v2755_v46 }
0x11ad   :  { %v5230_v47 = vpop.eup %5229 }
0x11ae   :  { %v5232_v49 = vpop.eup %5231  ;;  %v2762_v50 = vsel %vm619_vm2, %v5230_v47, 0.0 }
0x11af   :  { %2763 = vadd.xlane.f32.xlu1 %v2762_v50  ;;  %v2759_v51 = vsel %vm619_vm2, %v5232_v49, 0.0 }
0x11b0   :  { %2760 = vadd.xlane.f32.xlu0 %v2759_v51 }
0x11c0   :  { %2998 = vrot.lane.b32.xlu1 %v6108_v26, %s5635_s24 }
0x11c4   :  { %3078 = vrot.lane.b32.xlu1 %v6096_v63, %s5635_s24 }
0x11c6   :  { %3000 = vrot.lane.b32.xlu0 %v6098_v20, %s5635_s24 }
0x11c8   :  { %3076 = vrot.lane.b32.xlu1 %v6106_v25, %s5635_s24 }
0x11cc   :  { %3415 = vrot.lane.b32.xlu1 %v6098_v20, %s5636_s9 }
0x123c   :  { %v2764_v53 = vpop.xlane.xlu1 %2763 }
0x123d   :  { %5233 = vrcp.f32 %v2764_v53  ;;  %v2761_v55 = vpop.xlane.xlu0 %2760 }
0x123e   :  { %5235 = vrcp.f32 %v2761_v55 }
0x1240   :  { %v2999_v5 = vpop.permute.xlu1 %2998 }
0x1241   :  { %v3001_v61 = vpop.permute.xlu0 %3000 }
0x1244   :  { %v3079_v6 = vpop.permute.xlu1 %3078 }
0x1247   :  { %v5234_v56 = vpop.eup %5233 }
0x1248   :  { %v5236_v57 = vpop.eup %5235  ;;  %v2768_v58 = vmul.f32 %v5234_v56, %v5230_v47  ;;  %v3077_v14 = vpop.permute.xlu1 %3076 }
0x1249   :  { %v2767_v59 = vmul.f32 %v5236_v57, %v5232_v49 }
0x124a   :  { %4940 = vmatmul.mubr.msk.f32.vlgmr.msra.gmra.mrb[30].mxu1 %vm619_vm2, %v2768_v58 }
0x124b   :  { %4948 = vmatpush3.xpose.msk.msra.mxu1 %vm619_vm2, %v3001_v61  ;;  %4935 = vmatmul.mubr.msk.f32.vlgmr.msra.gmra.mrb[20].mxu0 %vm619_vm2, %v2767_v59 }
0x124c   :  { %4949 = vmatprep.mubr.msk.f32.mxu1 %vm5634_vm1, %v5633_v48  ;;  %4943 = vmatpush3.msra.mxu0 %v2283_v52  ;;  %v3416_v22 = vpop.permute.xlu1 %3415  ;;  %v2284_v52 = vld [vmem:[%s6328_s16 + $0x8] sm:$0xff] }
0x124d   :  { %4952 = vmatprep.subr.mxu0 %v5633_v48  ;;  %4957 = vmatprep.subr.mxu1 %v5633_v48 }
0x124e   :  { %4950 = vmatmul.mubr.msk.f32.vlgmr.msra.gmra.mrb[32].mxu1 %vm619_vm2, %v2999_v5 }
0x124f   :  { %4959 = vmatprep.mubr.msk.f32.mxu1 %vm5634_vm1, %v5633_v48 }
0x131d   :  { %v2911_v7 = vpop.f32.mrb[30].mxu1 }
0x131e   :  { %v2838_v4 = vpop.f32.mrb[20].mxu0  ;;  %v4941_v9 = vpop.f32.mrb[31].mxu1 }
0x131f   :  { %v4936_v10 = vpop.f32.mrb[21].mxu0  ;;  %4944 = vmatprep.mubr.msk.f32.mxu0 %vm619_vm2, %v2838_v4 }
0x1320   :  { %4945 = vmatmul.mubr.msk.f32.vlgmr.msra.gmra.mrb[22].mxu0 %vm619_vm2, %v2911_v7 }
0x1321   :  { %4953 = vmatpush3.xpose.msk.msra.mxu0 %vm619_vm2, %v3079_v6  ;;  %v3072_v11 = vpop.f32.mrb[32].mxu1  ;;  %4954 = vmatprep.mubr.msk.f32.mxu0 %vm5634_vm1, %v5633_v48 }
0x1322   :  { %v3073_v12 = vadd.f32 %v3072_v11, %v6129_v33  ;;  %v4951_v13 = vpop.f32.mrb[33].mxu1  ;;  %4962 = vmatprep.subr.mxu0 %v5633_v48 }
0x1324   :  { %4955 = vmatmul.mubr.msk.f32.vlgmr.msra.gmra.mrb[24].mxu0 %vm619_vm2, %v3077_v14  ;;  %v3154_v15 = vsel %vm619_vm2, %v3073_v12, -inf }
0x1325   :  { %3155 = vmax.xlane.f32.xlu0 %v3154_v15  ;;  %4964 = vmatprep.mubr.msk.f32.mxu0 %vm5634_vm1, %v5633_v48 }
0x133b   :  { %3177 = vrot.lane.b32.xlu0 %v6120_v0, %s5635_s24 }
0x133f   :  { %3413 = vrot.lane.b32.xlu0 %v6108_v26, %s5636_s9 }
0x1343   :  { %3491 = vrot.lane.b32.xlu0 %v6106_v25, %s5636_s9 }
0x13b2   :  { %v3156_v16 = vpop.xlane.xlu0 %3155 }
0x13b3   :  { %v3160_v8 = vsub.f32 %v3073_v12, %v3156_v16  ;;  %v2285_v12 = vld [vmem:[%s6328_s16 + $0x10] sm:$0xff] }
0x13b5   :  { %v3162_v17 = vmul.f32 1.442695, %v3160_v8 }
0x13b6   :  { %v3178_v18 = vpop.permute.xlu0 %3177 }
0x13b7   :  { %5237 = vpow2.f32 %v3162_v17  ;;  %4958 = vmatpush3.msra.mxu1 %v3178_v18 }
0x13b8   :  { %4972 = vmatprep.subr.mxu1 %v5633_v48 }
0x13ba   :  { %v3414_v30 = vpop.permute.xlu0 %3413 }
0x13be   :  { %v3492_v34 = vpop.permute.xlu0 %3491 }
0x13c1   :  { %v5238_v3 = vpop.eup %5237 }
0x13c2   :  { %v3166_v60 = vsel %vm619_vm2, %v5238_v3, 0.0 }
0x13c3   :  { %3167 = vadd.xlane.f32.xlu1 %v3166_v60 }
0x13d4   :  { %3493 = vrot.lane.b32.xlu1 %v6096_v63, %s5636_s9 }
0x13f7   :  { %v3150_v62 = vpop.f32.mrb[24].mxu0 }
0x13f8   :  { %v3151_v19 = vadd.f32 %v3150_v62, %v6126_v32  ;;  %v4956_v21 = vpop.f32.mrb[25].mxu0 }
0x13fa   :  { %v3157_v54 = vsel %vm619_vm2, %v3151_v19, -inf }
0x13fb   :  { %3158 = vmax.xlane.f32.xlu1 %v3157_v54 }
0x1450   :  { %v3168_v23 = vpop.xlane.xlu1 %3167 }
0x1451   :  { %5239 = vrcp.f32 %v3168_v23 }
0x1454   :  { %v3494_v1 = vpop.permute.xlu1 %3493 }
0x145b   :  { %v5240_v24 = vpop.eup %5239 }
0x145c   :  { %v3174_v28 = vmul.f32 %v5240_v24, %v5238_v3 }
0x145e   :  { %4960 = vmatmul.mubr.msk.f32.vlgmr.msra.gmra.mrb[34].mxu1 %vm619_vm2, %v3174_v28 }
0x145f   :  { %4973 = vmatpush3.xpose.msk.msra.mxu1 %vm619_vm2, %v3416_v22  ;;  %4974 = vmatprep.mubr.msk.f32.mxu1 %vm5634_vm1, %v5633_v48 }
0x1460   :  { %4977 = vmatprep.subr.mxu1 %v5633_v48 }
0x1462   :  { %4975 = vmatmul.mubr.msk.f32.vlgmr.msra.gmra.mrb[36].mxu1 %vm619_vm2, %v3414_v30 }
0x1463   :  { %4978 = vmatpush3.xpose.msk.msra.mxu1 %vm619_vm2, %v3494_v1  ;;  %4979 = vmatprep.mubr.msk.f32.mxu1 %vm5634_vm1, %v5633_v48 }
0x1464   :  { %4987 = vmatprep.subr.mxu1 %v5633_v48 }
0x1466   :  { %4980 = vmatmul.mubr.msk.f32.vlgmr.msra.gmra.mrb[38].mxu1 %vm619_vm2, %v3492_v34 }
0x1467   :  { %4989 = vmatprep.mubr.msk.f32.mxu1 %vm5634_vm1, %v5633_v48 }
0x1488   :  { %v3159_v35 = vpop.xlane.xlu1 %3158 }
0x1489   :  { %v3161_v36 = vsub.f32 %v3151_v19, %v3159_v35 }
0x148b   :  { %v3164_v37 = vmul.f32 1.442695, %v3161_v36 }
0x148d   :  { %5241 = vpow2.f32 %v3164_v37 }
0x1497   :  { %v5242_v38 = vpop.eup %5241 }
0x1498   :  { %v3169_v39 = vsel %vm619_vm2, %v5242_v38, 0.0 }
0x1499   :  { %3170 = vadd.xlane.f32.xlu0 %v3169_v39 }
0x14af   :  { %3254 = vrot.lane.b32.xlu0 %v6118_v31, %s5635_s24 }
0x14b3   :  { %3667 = vrot.lane.b32.xlu0 %v6118_v31, %s5636_s9 }
0x14b7   :  { %3828 = vrot.lane.b32.xlu0 %v6098_v20, %s5637_s14 }
0x14bb   :  { %3906 = vrot.lane.b32.xlu0 %v6096_v63, %s5637_s14 }
0x14bf   :  { %3826 = vrot.lane.b32.xlu0 %v6108_v26, %s5637_s14 }
0x1526   :  { %v3171_v40 = vpop.xlane.xlu0 %3170 }
0x1527   :  { %5243 = vrcp.f32 %v3171_v40 }
0x152a   :  { %v3255_v41 = vpop.permute.xlu0 %3254 }
0x152b   :  { %4963 = vmatpush3.msra.mxu0 %v3255_v41 }
0x152c   :  { %4967 = vmatprep.subr.mxu0 %v2284_v52 }
0x152e   :  { %v3668_v42 = vpop.permute.xlu0 %3667 }
0x152f   :  { %4988 = vmatpush3.msra.mxu1 %v3668_v42 }
0x1530   :  { %4997 = vmatprep.subr.mxu1 %v5633_v48 }
0x1531   :  { %v5244_v43 = vpop.eup %5243  ;;  %v3249_v2 = vpop.f32.mrb[34].mxu1 }
0x1532   :  { %v3175_v44 = vmul.f32 %v5244_v43, %v5242_v38  ;;  %v4961_v45 = vpop.f32.mrb[35].mxu1  ;;  %v3829_v14 = vpop.permute.xlu0 %3828 }
0x1534   :  { %4965 = vmatmul.mubr.msk.f32.vlgmr.msra.gmra.mrb[26].mxu0 %vm619_vm2, %v3175_v44 }
0x1535   :  { %4969 = vmatprep.mubr.msk.f32.mxu0 %vm619_vm2, %v3249_v2  ;;  %v3487_v63 = vpop.f32.mrb[36].mxu1  ;;  %4968 = vmatpush3.msra.mxu0 %v2284_v52 }
0x1536   :  { %v3488_v20 = vadd.f32 %v3487_v63, %v6129_v33  ;;  %v4976_v26 = vpop.f32.mrb[37].mxu1  ;;  %4982 = vmatprep.subr.mxu0 %v5633_v48  ;;  %v3907_v8 = vpop.permute.xlu0 %3906 }
0x1537   :  { %v2286_v26 = vld [vmem:[%s6328_s16 + $0x18] sm:$0xff] }
0x1538   :  { %v3569_v46 = vsel %vm619_vm2, %v3488_v20, -inf }
0x1539   :  { %v3565_v47 = vpop.f32.mrb[38].mxu1  ;;  %3570 = vmax.xlane.f32.xlu1 %v3569_v46 }
0x153a   :  { %v3566_v49 = vadd.f32 %v3565_v47, %v6126_v32  ;;  %v4981_v50 = vpop.f32.mrb[39].mxu1  ;;  %v3827_v18 = vpop.permute.xlu0 %3826 }
0x153b   :  { %v4575_v50 = vld [vmem:[#allocation16] ss:$0 sm:$0xff] }
0x153c   :  { %v3572_v51 = vsel %vm619_vm2, %v3566_v49, -inf }
0x153d   :  { %3573 = vmax.xlane.f32.xlu1 %v3572_v51  ;;  %v2594_v51 = vadd.f32 %v6058_v27, %v4575_v50 }
0x15c6   :  { %v3571_v53 = vpop.xlane.xlu1 %3570 }
0x15c7   :  { %v3575_v55 = vsub.f32 %v3488_v20, %v3571_v53  ;;  %v2593_v53 = vadd.f32 %v6060_v29, %v4575_v50 }
0x15c9   :  { %v3577_v56 = vmul.f32 1.442695, %v3575_v55 }
0x15ca   :  { %v3574_v57 = vpop.xlane.xlu1 %3573 }
0x15cb   :  { %5245 = vpow2.f32 %v3577_v56  ;;  %v3576_v58 = vsub.f32 %v3566_v49, %v3574_v57 }
0x15cd   :  { %v3579_v59 = vmul.f32 1.442695, %v3576_v58 }
0x15cf   :  { %5247 = vpow2.f32 %v3579_v59 }
0x15d5   :  { %v5246_v61 = vpop.eup %5245 }
0x15d6   :  { %v3581_v5 = vsel %vm619_vm2, %v5246_v61, 0.0 }
0x15d7   :  { %3582 = vadd.xlane.f32.xlu1 %v3581_v5 }
0x15d9   :  { %v5248_v6 = vpop.eup %5247 }
0x15da   :  { %v3584_v7 = vsel %vm619_vm2, %v5248_v6, 0.0 }
0x15db   :  { %3585 = vadd.xlane.f32.xlu1 %v3584_v7 }
0x15ec   :  { %3591 = vrot.lane.b32.xlu1 %v6120_v0, %s5636_s9 }
0x15f0   :  { %3904 = vrot.lane.b32.xlu1 %v6106_v25, %s5637_s14 }
0x1607   :  { %v3326_v4 = vpop.f32.mrb[26].mxu0 }
0x1608   :  { %v4966_v9 = vpop.f32.mrb[27].mxu0  ;;  %4970 = vmatmul.mubr.msk.f32.vlgmr.msra.gmra.mrb[22].mxu0 %vm619_vm2, %v3326_v4 }
0x1609   :  { %4984 = vmatprep.mubr.msk.f32.mxu0 %vm5634_vm1, %v5633_v48 }
0x1664   :  { %v3583_v10 = vpop.xlane.xlu1 %3582 }
0x1665   :  { %5249 = vrcp.f32 %v3583_v10 }
0x1668   :  { %v3586_v11 = vpop.xlane.xlu1 %3585 }
0x1669   :  { %5251 = vrcp.f32 %v3586_v11 }
0x166c   :  { %v3592_v13 = vpop.permute.xlu1 %3591 }
0x166d   :  { %4983 = vmatpush3.msra.mxu0 %v3592_v13  ;;  %v4284_v13 = vld [vmem:[%s6329_s18 + $0x8] sm:$0xff] }
0x166e   :  { %4992 = vmatprep.subr.mxu0 %v2285_v12 }
0x166f   :  { %v5250_v15 = vpop.eup %5249 }
0x1670   :  { %v3589_v16 = vmul.f32 %v5250_v15, %v5246_v61  ;;  %v3905_v21 = vpop.permute.xlu1 %3904  ;;  %v4285_v15 = vld [vmem:[%s6329_s18 + $0x10] sm:$0xff] }
0x1672   :  { %4985 = vmatmul.mubr.msk.f32.vlgmr.msra.gmra.mrb[28].mxu0 %vm619_vm2, %v3589_v16  ;;  %v4286_v16 = vld [vmem:[%s6329_s18 + $0x18] sm:$0xff] }
0x1673   :  { %v5252_v25 = vpop.eup %5251  ;;  %4993 = vmatpush3.msra.mxu0 %v2285_v12  ;;  %v4283_v12 = vld [vmem:[%s6329_s18] sm:$0xff] }
0x1674   :  { %v3590_v17 = vmul.f32 %v5252_v25, %v5248_v6  ;;  %5002 = vmatprep.subr.mxu0 %v5633_v48  ;;  %v5104_v25 = vpack.c.bf16 %v4286_v16, %v4285_v15 }
0x1676   :  { %4990 = vmatmul.mubr.msk.f32.vlgmr.msra.gmra.mrb[40].mxu1 %vm619_vm2, %v3590_v17  ;;  %v4378_v17 = vld [vmem:[%s5786_s8 + $0x8] sm:$0xff] }
0x1677   :  { %4998 = vmatpush3.xpose.msk.msra.mxu1 %vm619_vm2, %v3829_v14  ;;  %4999 = vmatprep.mubr.msk.f32.mxu1 %vm5634_vm1, %v5633_v48  ;;  %v5100_v14 = vpack.c.bf16 %v4284_v13, %v4283_v12 }
0x1678   :  { %5007 = vmatprep.subr.mxu1 %v5633_v48 }
0x167a   :  { %5000 = vmatmul.mubr.msk.f32.vlgmr.msra.gmra.mrb[42].mxu1 %vm619_vm2, %v3827_v18  ;;  %v4379_v18 = vld [vmem:[%s5786_s8 + $0x10] sm:$0xff] }
0x167b   :  { %5009 = vmatprep.mubr.msk.f32.mxu1 %vm5634_vm1, %v5633_v48 }
0x1745   :  { %v3663_v3 = vpop.f32.mrb[28].mxu0 }
0x1746   :  { %v4986_v60 = vpop.f32.mrb[29].mxu0  ;;  %4994 = vmatprep.mubr.msk.f32.mxu0 %vm619_vm2, %v3663_v3 }
0x1747   :  { %v4380_v60 = vld [vmem:[%s5786_s8 + $0x18] sm:$0xff] }
0x1749   :  { %v3739_v62 = vpop.f32.mrb[40].mxu1 }
0x174a   :  { %v4991_v19 = vpop.f32.mrb[41].mxu1  ;;  %4995 = vmatmul.mubr.msk.f32.vlgmr.msra.gmra.mrb[22].mxu0 %vm619_vm2, %v3739_v62  ;;  %v5112_v62 = vpack.c.bf16 %v4380_v60, %v4379_v18 }
0x174b   :  { %5003 = vmatpush3.xpose.msk.msra.mxu0 %vm619_vm2, %v3907_v8  ;;  %5004 = vmatprep.mubr.msk.f32.mxu0 %vm5634_vm1, %v5633_v48  ;;  %v4377_v8 = vld [vmem:[%s5786_s8] sm:$0xff] }
0x174c   :  { %5012 = vmatprep.subr.mxu0 %v5633_v48  ;;  %v5108_v3 = vpack.c.bf16 %v4378_v17, %v4377_v8  ;;  %v4381_v19 = vld [vmem:[%s5786_s8 + $0x20] sm:$0xff] }
0x174d   :  { %v3900_v54 = vpop.f32.mrb[42].mxu1 }
0x174e   :  { %v3901_v22 = vadd.f32 %v3900_v54, %v6129_v33  ;;  %v5001_v23 = vpop.f32.mrb[43].mxu1  ;;  %5005 = vmatmul.mubr.msk.f32.vlgmr.msra.gmra.mrb[30].mxu0 %vm619_vm2, %v3905_v21  ;;  %v4382_v21 = vld [vmem:[%s5786_s8 + $0x28] sm:$0xff] }
0x174f   :  { %5014 = vmatprep.mubr.msk.f32.mxu0 %vm5634_vm1, %v5633_v48  ;;  %v5116_v54 = vpack.c.bf16 %v4382_v21, %v4381_v19 }
0x1750   :  { %v3982_v24 = vsel %vm619_vm2, %v3901_v22, -inf }
0x1751   :  { %3983 = vmax.xlane.f32.xlu0 %v3982_v24 }
0x17de   :  { %v3984_v28 = vpop.xlane.xlu0 %3983 }
0x17df   :  { %v3988_v30 = vsub.f32 %v3901_v22, %v3984_v28 }
0x17e1   :  { %v3990_v1 = vmul.f32 1.442695, %v3988_v30 }
0x17e3   :  { %5253 = vpow2.f32 %v3990_v1 }
0x17ed   :  { %v5254_v34 = vpop.eup %5253 }
0x17ee   :  { %v3994_v35 = vsel %vm619_vm2, %v5254_v34, 0.0 }
0x17ef   :  { %3995 = vadd.xlane.f32.xlu0 %v3994_v35  ;;  %v4608_v35 = vld [vmem:[#allocation18] ss:$0 sm:$0xff] }
0x1821   :  { %v3978_v36 = vpop.f32.mrb[30].mxu0 }
0x1822   :  { %v3979_v33 = vadd.f32 %v3978_v36, %v6126_v32  ;;  %v5006_v37 = vpop.f32.mrb[31].mxu0 }
0x1824   :  { %v3985_v38 = vsel %vm619_vm2, %v3979_v33, -inf }
0x1825   :  { %3986 = vmax.xlane.f32.xlu1 %v3985_v38  ;;  %v4609_v38 = vld [vmem:[#allocation19] ss:$0 sm:$0xff] }
0x1836   :  { %4080 = vrot.lane.b32.xlu1 %v6118_v31, %s5637_s14 }
0x187c   :  { %v3996_v32 = vpop.xlane.xlu0 %3995 }
0x18b2   :  { %v3987_v48 = vpop.xlane.xlu1 %3986 }
0x18b3   :  { %v3989_v39 = vsub.f32 %v3979_v33, %v3987_v48 }
0x18b5   :  { %v3992_v40 = vmul.f32 1.442695, %v3989_v39 }
0x18b6   :  { %v4081_v41 = vpop.permute.xlu1 %4080 }
0x18b7   :  { %5255 = vpow2.f32 %v3992_v40  ;;  %5013 = vmatpush3.msra.mxu0 %v4081_v41 }
0x18b8   :  { %5257 = vrcp.f32 %v3996_v32  ;;  %5017 = vmatprep.subr.mxu0 %v2286_v26 }
0x18c1   :  { %v5256_v42 = vpop.eup %5255 }
0x18c2   :  { %v3997_v43 = vsel %vm619_vm2, %v5256_v42, 0.0  ;;  %v5258_v44 = vpop.eup %5257 }
0x18c3   :  { %3998 = vadd.xlane.f32.xlu0 %v3997_v43  ;;  %v4002_v31 = vmul.f32 %v5258_v44, %v5254_v34  ;;  %v4384_v43 = vld [vmem:[%s5786_s8 + $0x38] sm:$0xff] }
0x18d9   :  { %4004 = vrot.lane.b32.xlu0 %v6120_v0, %s5637_s14 }
0x1950   :  { %v3999_v2 = vpop.xlane.xlu0 %3998 }
0x1951   :  { %5259 = vrcp.f32 %v3999_v2  ;;  %v4610_v2 = vld [vmem:[#allocation21] ss:$0 sm:$0xff] }
0x1954   :  { %v4005_v45 = vpop.permute.xlu0 %4004 }
0x1955   :  { %5008 = vmatpush3.msra.mxu1 %v4005_v45 }
0x1956   :  { %5010 = vmatmul.mubr.msk.f32.vlgmr.msra.gmra.mrb[44].mxu1 %vm619_vm2, %v4002_v31  ;;  %5101 = vmatprep.subr.bf16.mxu1 %v5100_v14 }
0x1957   :  { %5103 = vmatpush3.bf16.msra.mxu1 %v5100_v14 }
0x1958   :  { %5105 = vmatprep.subr.bf16.mxu1 %v5104_v25 }
0x195b   :  { %v5260_v63 = vpop.eup %5259  ;;  %5107 = vmatpush3.bf16.msra.mxu1 %v5104_v25 }
0x195c   :  { %v4003_v20 = vmul.f32 %v5260_v63, %v5256_v42  ;;  %v4383_v42 = vld [vmem:[%s5786_s8 + $0x30] sm:$0xff] }
0x195d   :  { %v5120_v32 = vpack.c.bf16 %v4384_v43, %v4383_v42 }
0x195e   :  { %5015 = vmatmul.mubr.msk.f32.vlgmr.msra.gmra.mrb[32].mxu0 %vm619_vm2, %v4003_v20 }
0x195f   :  { %5018 = vmatpush3.msra.mxu0 %v2286_v26 }
0x1960   :  { %5109 = vmatprep.subr.bf16.mxu0 %v5108_v3 }
0x1a29   :  { %v4076_v46 = vpop.f32.mrb[44].mxu1 }
0x1a2a   :  { %v5011_v47 = vpop.f32.mrb[45].mxu1  ;;  %5019 = vmatprep.mubr.msk.f32.mxu0 %vm619_vm2, %v4076_v46  ;;  %v4613_v46 = vld [vmem:[#allocation22] ss:$0 sm:$0xff] }
0x1a31   :  { %v4152_v0 = vpop.f32.mrb[32].mxu0 }
0x1a32   :  { %v5016_v49 = vpop.f32.mrb[33].mxu0  ;;  %5020 = vmatmul.mubr.msk.f32.vlgmr.msra.gmra.mrb[22].mxu0 %vm619_vm2, %v4152_v0 }
0x1a33   :  { %5111 = vmatpush3.bf16.msra.mxu0 %v5108_v3 }
0x1a34   :  { %5113 = vmatprep.subr.bf16.mxu0 %v5112_v62 }
0x1a37   :  { %5115 = vmatpush3.bf16.msra.mxu0 %v5112_v62 }
0x1a38   :  { %5117 = vmatprep.subr.bf16.mxu0 %v5116_v54 }
0x1a3b   :  { %5119 = vmatpush3.bf16.msra.mxu0 %v5116_v54 }
0x1a3c   :  { %5121 = vmatprep.subr.bf16.mxu0 %v5120_v32 }
0x1a3f   :  { %5123 = vmatpush3.bf16.msra.mxu0 %v5120_v32 }
0x1b05   :  { %v5021_v52 = vpop.f32.mrb[22].mxu0 }
0x1b06   :  { %v6260_v55 = vadd.f32 %v5021_v52, %v2594_v51  ;;  %v4228_v56 = vpop.f32.mrb[23].mxu0 }
0x1b07   :  { %v6262_v57 = vadd.f32 %v4228_v56, %v2593_v53 }
0x1b08   :  { %v4244_v58 = vsel %vm316_vm0, %v6260_v55, 0.0 }
0x1b09   :  { %4245 = vadd.xlane.f32.xlu0 %v4244_v58  ;;  %v4241_v59 = vsel %vm316_vm0, %v6262_v57, 0.0 }
0x1b0a   :  { %4242 = vadd.xlane.f32.xlu1 %v4241_v59 }
0x1b96   :  { %v4246_v27 = vpop.xlane.xlu0 %4245 }
0x1b97   :  { %v4248_v61 = vmul.f32 0.03125, %v4246_v27  ;;  %v4243_v29 = vpop.xlane.xlu1 %4242 }
0x1b98   :  { %v4247_v5 = vmul.f32 0.03125, %v4243_v29 }
0x1b99   :  { %v4250_v6 = vsub.f32 %v6260_v55, %v4248_v61 }
0x1b9a   :  { %v4249_v7 = vsub.f32 %v6262_v57, %v4247_v5 }
0x1b9b   :  { %v4252_v4 = vmul.f32 %v4250_v6, %v4250_v6 }
0x1b9c   :  { %v4251_v9 = vmul.f32 %v4249_v7, %v4249_v7 }
0x1b9d   :  { %v4256_v10 = vsel %vm316_vm0, %v4252_v4, 0.0 }
0x1b9e   :  { %4257 = vadd.xlane.f32.xlu1 %v4256_v10  ;;  %v4253_v11 = vsel %vm316_vm0, %v4251_v9, 0.0 }
0x1b9f   :  { %4254 = vadd.xlane.f32.xlu0 %v4253_v11 }
0x1c2b   :  { %v4258_v22 = vpop.xlane.xlu1 %4257 }
0x1c2c   :  { %v4260_v23 = vmul.f32 0.03125, %v4258_v22  ;;  %v4255_v24 = vpop.xlane.xlu0 %4254 }
0x1c2d   :  { %v4259_v28 = vmul.f32 0.03125, %v4255_v24 }
0x1c2e   :  { %v4262_v30 = vadd.f32 1e-05, %v4260_v23 }
0x1c2f   :  { %v4261_v1 = vadd.f32 1e-05, %v4259_v28 }
0x1c30   :  { %5261 = vrsqrt.f32 %v4262_v30 }
0x1c31   :  { %5263 = vrsqrt.f32 %v4261_v1 }
0x1c3a   :  { %v5262_v34 = vpop.eup %5261 }
0x1c3b   :  { %v5264_v36 = vpop.eup %5263  ;;  %v4266_v33 = vmul.f32 %v5262_v34, %v4250_v6 }
0x1c3c   :  { %v4265_v37 = vmul.f32 %v5264_v36, %v4249_v7 }
0x1c3d   :  { %v4274_v48 = vmul.f32 %v4608_v35, %v4266_v33 }
0x1c3e   :  { %v4273_v39 = vmul.f32 %v4608_v35, %v4265_v37 }
0x1c3f   :  { %v4282_v41 = vadd.f32 %v4609_v38, %v4274_v48 }
0x1c40   :  { %v4281_v40 = vadd.f32 %v4609_v38, %v4273_v39 }
0x1c42   :  { %5030 = vmatprep.mubr.msk.f32.mxu1 %vm316_vm0, %v4281_v40 }
0x1c43   :  { %5031 = vmatmul.mubr.msk.f32.vlgmr.msra.gmra.mrb[46].mxu1 %vm316_vm0, %v4282_v41 }
0x1d16   :  { %v5032_v44 = vpop.f32.mrb[46].mxu1 }
0x1d17   :  { %v4372_v31 = vadd.f32 %v5032_v44, %v4610_v2  ;;  %v4366_v45 = vpop.f32.mrb[47].mxu1 }
0x1d18   :  { %v4367_v63 = vadd.f32 %v4610_v2, %v4366_v45 }
0x1d19   :  { %v4376_v26 = vmax.f32 %v4372_v31, 0.0 }
0x1d1a   :  { %v4375_v20 = vmax.f32 %v4367_v63, 0.0 }
0x1d1c   :  { %5049 = vmatprep.mubr.msk.f32.mxu0 %vm4392_vm3, %v4375_v20 }
0x1d1d   :  { %5050 = vmatmul.mubr.msk.f32.vlgmr.msra.gmra.mrb[34].mxu0 %vm4392_vm3, %v4376_v26 }
0x1df0   :  { %v5051_v47 = vpop.f32.mrb[34].mxu0 }
0x1df1   :  { %v4471_v0 = vadd.f32 %v5051_v47, %v4613_v46  ;;  %v4465_v49 = vpop.f32.mrb[35].mxu0 }
0x1df2   :  { %v4466_v50 = vadd.f32 %v4613_v46, %v4465_v49 }
0x1df3   :  { %v4475_v51 = vadd.f32 %v6260_v55, %v4471_v0 }
0x1df4   :  { %v4474_v52 = vadd.f32 %v6262_v57, %v4466_v50 }
0x1df5   :  { %4477 = vst.msk [vmem:[%s5796_s17 + $0x8] sm:$0xff] %vm316_vm0, %v4475_v51 }
0x1df6   :  { %4476 = vst.msk [vmem:[%s5796_s17] sm:$0xff] %vm316_vm0, %v4474_v52 }
0x1df7   :  { %4482 = vsyncpa [#allocation3], 1 }
0x1df8   :  { %4483 = vsyncpa [#allocation5], 1 }
0x1df9   :  { %4484 = vsyncpa [#allocation8], 1 }
0x1dfa   :  { %4485 = vsyncpa [#allocation11], 1 }
0x1dfb   :  { %4486 = vsyncpa [#allocation14], 1 }
0x1dfc   :  { %4487 = vsyncpa [#allocation17], 1 }
0x1dfd   :  { %4488 = vsyncpa [#allocation20], 1 }
0x1dfe   :  { %4489 = vsyncpa [#allocation23], 1 }

</bundles_post_ra>
